<compile_context>
chip_gen: v7x
topology: tpu7x:2x2x1
jax: 0.10.0
libtpu: 0.0.40
codegen_flags: <defaults>
</compile_context>

<pallas_src>
import numpy as np
import jax
import jax.numpy as jnp
from jax.experimental import pallas as pl
from jax.experimental.pallas import tpu as pltpu

# ----------------------------- configuration -------------------------------
B, K, L = 2, 4, 16            # batch, target_dim (features), time length
EMB_TIME = 16                 # config['model']['timeemb']
EMB_FEAT = 8                  # config['model']['featureemb']
SIDE_DIM = EMB_TIME + EMB_FEAT + 1   # conditional model -> +1 mask channel
NUM_STEPS = 4                 # config['diffusion']['num_steps']
BETA_START, BETA_END = 1e-4, 0.5     # quad schedule
INPUT_DIM = 2                 # conditional -> cat([cond_obs, noisy_target])
C_IN = INPUT_DIM + SIDE_DIM   # channels fed to the denoiser surrogate (27)


# ------------------------------- fused kernel --------------------------------
def _csdi_valid_loss_kernel(ca_ref, cb_ref,            # SMEM: sqrt(a_t), sqrt(1-a_t)
                            tp_ref, freq_ref, feat_ref, w_ref,
                            obs_ref, cond_ref, omask_ref, noise_ref,
                            loss_ref,                  # SMEM output (1,1)
                            side_ref, base_ref):       # VMEM scratch
    t = pl.program_id(0)
    obs = obs_ref[...]          # (B, K, L)
    cond = cond_ref[...]        # (B, K, L)

    @pl.when(t == 0)
    def _init():
        # ---------------- get_side_info -> VMEM scratch (B, SIDE_DIM, K, L) ----
        pos = tp_ref[...]                                            # (B, L)
        arg = jnp.broadcast_to(
            pos[:, None, None, :] * freq_ref[...][None, :, :, :],
            (B, EMB_TIME, K, L))
        cidx = jax.lax.broadcasted_iota(jnp.int32, (B, EMB_TIME, K, L), 1)
        time_emb = jnp.where(cidx % 2 == 0, jnp.sin(arg), jnp.cos(arg))
        feat_emb = jnp.broadcast_to(feat_ref[...][None, :, :, None],
                                    (B, EMB_FEAT, K, L))
        side_ref[:, 0:EMB_TIME, :, :] = time_emb
        side_ref[:, EMB_TIME:EMB_TIME + EMB_FEAT, :, :] = feat_emb
        side_ref[:, EMB_TIME + EMB_FEAT:SIDE_DIM, :, :] = cond[:, None, :, :]

        # -------- t-invariant part of the surrogate projection (VPU reduce) ---
        # channel order matches cat([cond_obs, noisy_target, side_info]):
        #   w[0]*cond_obs + w[1]*noisy_target + sum_c w[2+c]*side_info[c]
        side_contrib = jnp.sum(
            side_ref[...] * w_ref[2:C_IN, :, :][None, :, :, :], axis=1)
        base_ref[...] = w_ref[0:1, :, :] * (cond * obs) + side_contrib

        loss_ref[0, 0] = jnp.float32(0.0)

    # ---- per-step: forward diffusion + surrogate prediction + masked MSE -----
    ca = ca_ref[t]              # sqrt(alpha_t)        (SMEM scalar)
    cb = cb_ref[t]              # sqrt(1 - alpha_t)    (SMEM scalar)
    noise = noise_ref[0]        # (B, K, L)

    noisy = ca * obs + cb * noise
    noisy_target = (1.0 - cond) * noisy
    # TODO(synk): real diff_CSDI would consume side_ref here; surrogate below.
    predicted = base_ref[...] + w_ref[1:2, :, :] * noisy_target

    target_mask = omask_ref[...] - cond
    resid = (noise - predicted) * target_mask
    num_eval = jnp.sum(target_mask)
    loss_t = jnp.sum(resid * resid) / jnp.where(num_eval > 0, num_eval, 1.0)
    loss_ref[0, 0] = loss_ref[0, 0] + loss_t

    @pl.when(t == pl.num_programs(0) - 1)
    def _finalize():
        loss_ref[0, 0] = loss_ref[0, 0] / NUM_STEPS


# ------------------------------ wrapper ---------------------------------------
def csdi_valid_loss(observed_data, cond_mask, observed_mask, observed_tp,
                    feat_embed, w_proj, sqrt_alpha, sqrt_1m_alpha, noise_all):
    # host-side constants for the sinusoidal time embedding
    half = np.arange(0, EMB_TIME, 2, dtype=np.float32)
    div_term = 1.0 / np.power(10000.0, half / EMB_TIME)          # (EMB_TIME//2,)
    freq = jnp.asarray(np.repeat(div_term, 2), jnp.float32).reshape(EMB_TIME, 1, 1)
    feat_t = feat_embed.T                                        # (EMB_FEAT, K)
    w3 = w_proj.reshape(C_IN, 1, 1)

    grid_spec = pltpu.PrefetchScalarGridSpec(
        num_scalar_prefetch=0,
        grid=(NUM_STEPS,),
        in_specs=[
            pl.BlockSpec(memory_space=pltpu.MemorySpace.SMEM),    # sqrt(alpha)
            pl.BlockSpec(memory_space=pltpu.MemorySpace.SMEM),    # sqrt(1-alpha)
            pl.BlockSpec((B, L), lambda t: (0, 0)),               # observed_tp
            pl.BlockSpec((EMB_TIME, 1, 1), lambda t: (0, 0, 0)),  # freq table
            pl.BlockSpec((EMB_FEAT, K), lambda t: (0, 0)),        # feat_embed^T
            pl.BlockSpec((C_IN, 1, 1), lambda t: (0, 0, 0)),      # surrogate w
            pl.BlockSpec((B, K, L), lambda t: (0, 0, 0)),         # observed_data
            pl.BlockSpec((B, K, L), lambda t: (0, 0, 0)),         # cond_mask
            pl.BlockSpec((B, K, L), lambda t: (0, 0, 0)),         # observed_mask
            pl.BlockSpec((1, B, K, L), lambda t: (t, 0, 0, 0)),   # noise[t]
        ],
        out_specs=pl.BlockSpec(memory_space=pltpu.MemorySpace.SMEM),
        scratch_shapes=[
            pltpu.VMEM((B, SIDE_DIM, K, L), jnp.float32),   # side_info (resident)
            pltpu.VMEM((B, K, L), jnp.float32),             # t-invariant projection
        ],
    )
    loss = pl.pallas_call(
        _csdi_valid_loss_kernel,
        out_shape=jax.ShapeDtypeStruct((1, 1), jnp.float32),
        grid_spec=grid_spec,
        compiler_params=pltpu.CompilerParams(
            dimension_semantics=("arbitrary",)),   # t is a serial reduction axis
    )(sqrt_alpha, sqrt_1m_alpha, observed_tp, freq, feat_t, w3,
      observed_data, cond_mask, observed_mask, noise_all)
    return loss[0, 0]


@jax.jit
def forward_valid(batch, params, key):
    """CSDI_base.forward with is_train=0: cond_mask = gt_mask, calc_loss_valid."""
    observed_data = batch["observed_data"]
    observed_mask = batch["observed_mask"]
    observed_tp = batch["timepoints"]
    cond_mask = batch["gt_mask"]                      # is_train == 0 path

    noise_all = jax.random.normal(
        key, (NUM_STEPS,) + observed_data.shape, jnp.float32)
    alpha = params["alpha"]
    sqrt_alpha = jnp.sqrt(alpha).astype(jnp.float32)          # current_alpha ** 0.5
    sqrt_1m_alpha = jnp.sqrt(1.0 - alpha).astype(jnp.float32)  # (1-current_alpha)**0.5

    return csdi_valid_loss(observed_data, cond_mask, observed_mask, observed_tp,
                           params["feat_embed"], params["w_proj"],
                           sqrt_alpha, sqrt_1m_alpha, noise_all)


# -------------------------------- main ---------------------------------------
if __name__ == "__main__":
    root = jax.random.PRNGKey(0)
    k_emb, k_w, k_data, k_m1, k_m2, k_noise = jax.random.split(root, 6)

    # diffusion schedule ('quad')
    beta = np.linspace(BETA_START ** 0.5, BETA_END ** 0.5, NUM_STEPS) ** 2
    alpha_hat = 1.0 - beta

    # deterministic parameter init (nn.Embedding ~ N(0,1); surrogate projection)
    params = {
        "feat_embed": jax.random.normal(k_emb, (K, EMB_FEAT), jnp.float32),
        "w_proj": jax.random.normal(k_w, (C_IN,), jnp.float32) * 0.05,
        "alpha": jnp.asarray(np.cumprod(alpha_hat), jnp.float32),
    }

    observed_data = jax.random.normal(k_data, (B, K, L), jnp.float32)
    observed_mask = (jax.random.uniform(k_m1, (B, K, L)) > 0.2).astype(jnp.float32)
    gt_mask = observed_mask * (jax.random.uniform(k_m2, (B, K, L)) > 0.3).astype(jnp.float32)
    timepoints = jnp.broadcast_to(jnp.arange(L, dtype=jnp.float32), (B, L))

    batch = {
        "observed_data": observed_data,
        "observed_mask": observed_mask,
        "timepoints": timepoints,
        "gt_mask": gt_mask,
    }

    loss = forward_valid(batch, params, k_noise)
    loss = jax.block_until_ready(loss)
    assert np.isfinite(float(loss))
    print("KERNEL_OK")
</pallas_src>

<mosaic_0001>
module attributes {stable_mosaic.version = 11 : i64} {
  func.func @_csdi_valid_loss_kernel(%arg0: i32, %arg1: memref<4xf32, #tpu.memory_space<smem>>, %arg2: memref<4xf32, #tpu.memory_space<smem>>, %arg3: memref<2x16xf32, #tpu.memory_space<vmem>>, %arg4: memref<16x1x1xf32, #tpu.memory_space<vmem>>, %arg5: memref<8x4xf32, #tpu.memory_space<vmem>>, %arg6: memref<27x1x1xf32, #tpu.memory_space<vmem>>, %arg7: memref<2x4x16xf32, #tpu.memory_space<vmem>>, %arg8: memref<2x4x16xf32, #tpu.memory_space<vmem>>, %arg9: memref<2x4x16xf32, #tpu.memory_space<vmem>>, %arg10: memref<1x2x4x16xf32, #tpu.memory_space<vmem>>, %arg11: memref<1x1xf32, #tpu.memory_space<smem>>, %arg12: memref<2x25x4x16xf32, #tpu.memory_space<vmem>>, %arg13: memref<2x4x16xf32, #tpu.memory_space<vmem>>) attributes {dimension_semantics = [#tpu.dimension_semantics<arbitrary>], iteration_bounds = array<i64: 4>, scalar_prefetch = 0 : i64, scratch_operands = 2 : i64, tpu.core_type = #tpu.core_type<tc>, window_params = [{transform_indices = @transform_0, window_bounds = array<i64: 4>}, {transform_indices = @transform_1, window_bounds = array<i64: 4>}, {pipeline_mode = #tpu.pipeline_mode<synchronous>, transform_indices = @transform_2, window_bounds = array<i64: 2, 16>}, {pipeline_mode = #tpu.pipeline_mode<synchronous>, transform_indices = @transform_3, window_bounds = array<i64: 16, 1, 1>}, {pipeline_mode = #tpu.pipeline_mode<synchronous>, transform_indices = @transform_4, window_bounds = array<i64: 8, 4>}, {pipeline_mode = #tpu.pipeline_mode<synchronous>, transform_indices = @transform_5, window_bounds = array<i64: 27, 1, 1>}, {pipeline_mode = #tpu.pipeline_mode<synchronous>, transform_indices = @transform_6, window_bounds = array<i64: 2, 4, 16>}, {pipeline_mode = #tpu.pipeline_mode<synchronous>, transform_indices = @transform_7, window_bounds = array<i64: 2, 4, 16>}, {pipeline_mode = #tpu.pipeline_mode<synchronous>, transform_indices = @transform_8, window_bounds = array<i64: 2, 4, 16>}, {transform_indices = @transform_9, window_bounds = array<i64: 1, 2, 4, 16>}, {transform_indices = @transform_10, window_bounds = array<i64: 1, 1>}]} {
    %c0 = arith.constant 0 : index
    %c0_0 = arith.constant 0 : index
    %c0_1 = arith.constant 0 : index
    %0 = vector.load %arg7[%c0, %c0_0, %c0_1] : memref<2x4x16xf32, #tpu.memory_space<vmem>>, vector<2x4x16xf32>
    %c0_2 = arith.constant 0 : index
    %c0_3 = arith.constant 0 : index
    %c0_4 = arith.constant 0 : index
    %1 = vector.load %arg8[%c0_2, %c0_3, %c0_4] : memref<2x4x16xf32, #tpu.memory_space<vmem>>, vector<2x4x16xf32>
    %c0_i32 = arith.constant 0 : i32
    %2 = arith.cmpi eq, %arg0, %c0_i32 : i32
    %3 = arith.extui %2 : i1 to i32
    %c0_i32_5 = arith.constant 0 : i32
    %4 = arith.cmpi ne, %3, %c0_i32_5 : i32
    scf.if %4 {
      %c0_27 = arith.constant 0 : index
      %c0_28 = arith.constant 0 : index
      %46 = vector.load %arg3[%c0_27, %c0_28] : memref<2x16xf32, #tpu.memory_space<vmem>>, vector<2x16xf32>
      %47 = vector.shape_cast %46 : vector<2x16xf32> to vector<2x1x1x16xf32>
      %c0_29 = arith.constant 0 : index
      %c0_30 = arith.constant 0 : index
      %c0_31 = arith.constant 0 : index
      %48 = vector.load %arg4[%c0_29, %c0_30, %c0_31] : memref<16x1x1xf32, #tpu.memory_space<vmem>>, vector<16x1x1xf32>
      %49 = vector.shape_cast %48 : vector<16x1x1xf32> to vector<1x16x1x1xf32>
      %50 = vector.broadcast %47 : vector<2x1x1x16xf32> to vector<2x16x1x16xf32>
      %51 = vector.broadcast %49 : vector<1x16x1x1xf32> to vector<2x16x1x16xf32>
      %52 = arith.mulf %50, %51 : vector<2x16x1x16xf32>
      %53 = vector.shape_cast %52 : vector<2x16x1x16xf32> to vector<2x16x1x16xf32>
      %54 = vector.broadcast %53 : vector<2x16x1x16xf32> to vector<2x16x4x16xf32>
      %55 = tpu.iota {dimensions = array<i32: 1>} : vector<2x16x4x16xi32>
      %c2_i32 = arith.constant 2 : i32
      %c0_i32_32 = arith.constant 0 : i32
      %56 = arith.cmpi eq, %c2_i32, %c0_i32_32 : i32
      %c1_i32 = arith.constant 1 : i32
      %57 = arith.select %56, %c1_i32, %c2_i32 : i32
      %58 = vector.broadcast %57 : i32 to vector<2x16x4x16xi32>
      %59 = arith.remsi %55, %58 : vector<2x16x4x16xi32>
      %c0_i32_33 = arith.constant 0 : i32
      %60 = vector.broadcast %c0_i32_33 : i32 to vector<2x16x4x16xi32>
      %61 = arith.cmpi ne, %59, %60 : vector<2x16x4x16xi32>
      %c0_i32_34 = arith.constant 0 : i32
      %62 = vector.broadcast %c0_i32_34 : i32 to vector<2x16x4x16xi32>
      %63 = arith.cmpi slt, %59, %62 : vector<2x16x4x16xi32>
      %c0_i32_35 = arith.constant 0 : i32
      %64 = arith.cmpi slt, %57, %c0_i32_35 : i32
      %65 = vector.broadcast %64 : i1 to vector<2x16x4x16xi1>
      %66 = vector.broadcast %65 : vector<2x16x4x16xi1> to vector<2x16x4x16xi1>
      %67 = arith.xori %63, %66 : vector<2x16x4x16xi1>
      %68 = arith.andi %67, %61 : vector<2x16x4x16xi1>
      %69 = vector.broadcast %57 : i32 to vector<2x16x4x16xi32>
      %70 = arith.addi %59, %69 : vector<2x16x4x16xi32>
      %71 = arith.select %68, %70, %59 : vector<2x16x4x16xi1>, vector<2x16x4x16xi32>
      %c0_i32_36 = arith.constant 0 : i32
      %72 = vector.broadcast %c0_i32_36 : i32 to vector<2x16x4x16xi32>
      %73 = arith.cmpi eq, %71, %72 : vector<2x16x4x16xi32>
      %74 = math.sin %54 : vector<2x16x4x16xf32>
      %75 = math.cos %54 : vector<2x16x4x16xf32>
      %76 = arith.select %73, %74, %75 : vector<2x16x4x16xi1>, vector<2x16x4x16xf32>
      %c0_37 = arith.constant 0 : index
      %c0_38 = arith.constant 0 : index
      %77 = vector.load %arg5[%c0_37, %c0_38] : memref<8x4xf32, #tpu.memory_space<vmem>>, vector<8x4xf32>
      %78 = vector.shape_cast %77 : vector<8x4xf32> to vector<1x8x4x1xf32>
      %79 = vector.shape_cast %78 : vector<1x8x4x1xf32> to vector<1x8x4x1xf32>
      %80 = vector.broadcast %79 : vector<1x8x4x1xf32> to vector<2x8x4x16xf32>
      %c0_39 = arith.constant 0 : index
      %c0_40 = arith.constant 0 : index
      %c0_41 = arith.constant 0 : index
      %c0_42 = arith.constant 0 : index
      %81 = vector.load %arg12[%c0_39, %c0_40, %c0_41, %c0_42] : memref<2x25x4x16xf32, #tpu.memory_space<vmem>>, vector<2x16x4x16xf32>
      tpu.vector_store %arg12[%c0_39, %c0_40, %c0_41, %c0_42], %76 {strides = array<i32>} : memref<2x25x4x16xf32, #tpu.memory_space<vmem>>, vector<2x16x4x16xf32>,
      %c0_43 = arith.constant 0 : index
      %c16 = arith.constant 16 : index
      %c0_44 = arith.constant 0 : index
      %c0_45 = arith.constant 0 : index
      %82 = vector.load %arg12[%c0_43, %c16, %c0_44, %c0_45] : memref<2x25x4x16xf32, #tpu.memory_space<vmem>>, vector<2x8x4x16xf32>
      tpu.vector_store %arg12[%c0_43, %c16, %c0_44, %c0_45], %80 {strides = array<i32>} : memref<2x25x4x16xf32, #tpu.memory_space<vmem>>, vector<2x8x4x16xf32>,
      %83 = vector.shape_cast %1 : vector<2x4x16xf32> to vector<2x1x4x16xf32>
      %c0_46 = arith.constant 0 : index
      %c24 = arith.constant 24 : index
      %c0_47 = arith.constant 0 : index
      %c0_48 = arith.constant 0 : index
      %84 = vector.load %arg12[%c0_46, %c24, %c0_47, %c0_48] : memref<2x25x4x16xf32, #tpu.memory_space<vmem>>, vector<2x1x4x16xf32>
      tpu.vector_store %arg12[%c0_46, %c24, %c0_47, %c0_48], %83 {strides = array<i32>} : memref<2x25x4x16xf32, #tpu.memory_space<vmem>>, vector<2x1x4x16xf32>,
      %c0_49 = arith.constant 0 : index
      %c0_50 = arith.constant 0 : index
      %c0_51 = arith.constant 0 : index
      %c0_52 = arith.constant 0 : index
      %85 = vector.load %arg12[%c0_49, %c0_50, %c0_51, %c0_52] : memref<2x25x4x16xf32, #tpu.memory_space<vmem>>, vector<2x25x4x16xf32>
      %c2 = arith.constant 2 : index
      %c0_53 = arith.constant 0 : index
      %c0_54 = arith.constant 0 : index
      %86 = vector.load %arg6[%c2, %c0_53, %c0_54] : memref<27x1x1xf32, #tpu.memory_space<vmem>>, vector<25x1x1xf32>
      %87 = vector.shape_cast %86 : vector<25x1x1xf32> to vector<1x25x1x1xf32>
      %88 = vector.broadcast %87 : vector<1x25x1x1xf32> to vector<2x25x4x16xf32>
      %89 = arith.mulf %85, %88 : vector<2x25x4x16xf32>
      %cst_55 = arith.constant dense<0.000000e+00> : vector<2x4x16xf32>
      %90 = vector.multi_reduction <add>, %89, %cst_55 [1] : vector<2x25x4x16xf32> to vector<2x4x16xf32>
      %c0_56 = arith.constant 0 : index
      %c0_57 = arith.constant 0 : index
      %c0_58 = arith.constant 0 : index
      %91 = vector.load %arg6[%c0_56, %c0_57, %c0_58] : memref<27x1x1xf32, #tpu.memory_space<vmem>>, vector<1x1x1xf32>
      %92 = arith.mulf %1, %0 : vector<2x4x16xf32>
      %93 = vector.broadcast %91 : vector<1x1x1xf32> to vector<2x4x16xf32>
      %94 = arith.mulf %93, %92 : vector<2x4x16xf32>
      %95 = arith.addf %94, %90 : vector<2x4x16xf32>
      %c0_59 = arith.constant 0 : index
      %c0_60 = arith.constant 0 : index
      %c0_61 = arith.constant 0 : index
      %96 = vector.load %arg13[%c0_59, %c0_60, %c0_61] : memref<2x4x16xf32, #tpu.memory_space<vmem>>, vector<2x4x16xf32>
      tpu.vector_store %arg13[%c0_59, %c0_60, %c0_61], %95 {strides = array<i32>} : memref<2x4x16xf32, #tpu.memory_space<vmem>>, vector<2x4x16xf32>,
      %cst_62 = arith.constant 0.000000e+00 : f32
      %c0_63 = arith.constant 0 : index
      %c0_64 = arith.constant 0 : index
      %97 = memref.load %arg11[%c0_63, %c0_64] : memref<1x1xf32, #tpu.memory_space<smem>>
      memref.store %cst_62, %arg11[%c0_63, %c0_64] : memref<1x1xf32, #tpu.memory_space<smem>>
    } else {
    }
    %5 = arith.index_cast %arg0 : i32 to index
    %6 = memref.load %arg1[%5] : memref<4xf32, #tpu.memory_space<smem>>
    %7 = arith.index_cast %arg0 : i32 to index
    %8 = memref.load %arg2[%7] : memref<4xf32, #tpu.memory_space<smem>>
    %c0_6 = arith.constant 0 : index
    %c0_7 = arith.constant 0 : index
    %c0_8 = arith.constant 0 : index
    %c0_9 = arith.constant 0 : index
    %9 = vector.load %arg10[%c0_6, %c0_7, %c0_8, %c0_9] : memref<1x2x4x16xf32, #tpu.memory_space<vmem>>, vector<1x2x4x16xf32>
    %10 = vector.shape_cast %9 : vector<1x2x4x16xf32> to vector<2x4x16xf32>
    %11 = vector.broadcast %6 : f32 to vector<2x4x16xf32>
    %12 = arith.mulf %11, %0 : vector<2x4x16xf32>
    %13 = vector.broadcast %8 : f32 to vector<2x4x16xf32>
    %14 = arith.mulf %13, %10 : vector<2x4x16xf32>
    %15 = arith.addf %12, %14 : vector<2x4x16xf32>
    %cst = arith.constant 1.000000e+00 : f32
    %16 = vector.broadcast %cst : f32 to vector<2x4x16xf32>
    %17 = arith.subf %16, %1 : vector<2x4x16xf32>
    %18 = arith.mulf %17, %15 : vector<2x4x16xf32>
    %c0_10 = arith.constant 0 : index
    %c0_11 = arith.constant 0 : index
    %c0_12 = arith.constant 0 : index
    %19 = vector.load %arg13[%c0_10, %c0_11, %c0_12] : memref<2x4x16xf32, #tpu.memory_space<vmem>>, vector<2x4x16xf32>
    %c1 = arith.constant 1 : index
    %c0_13 = arith.constant 0 : index
    %c0_14 = arith.constant 0 : index
    %20 = vector.load %arg6[%c1, %c0_13, %c0_14] : memref<27x1x1xf32, #tpu.memory_space<vmem>>, vector<1x1x1xf32>
    %21 = vector.broadcast %20 : vector<1x1x1xf32> to vector<2x4x16xf32>
    %22 = arith.mulf %21, %18 : vector<2x4x16xf32>
    %23 = arith.addf %19, %22 : vector<2x4x16xf32>
    %c0_15 = arith.constant 0 : index
    %c0_16 = arith.constant 0 : index
    %c0_17 = arith.constant 0 : index
    %24 = vector.load %arg9[%c0_15, %c0_16, %c0_17] : memref<2x4x16xf32, #tpu.memory_space<vmem>>, vector<2x4x16xf32>
    %25 = arith.subf %24, %1 : vector<2x4x16xf32>
    %26 = arith.subf %10, %23 : vector<2x4x16xf32>
    %27 = arith.mulf %26, %25 : vector<2x4x16xf32>
    %28 = vector.shape_cast %25 : vector<2x4x16xf32> to vector<1x2x4x16xf32>
    %cst_18 = arith.constant dense<0.000000e+00> : vector<1xf32>
    %29 = vector.multi_reduction <add>, %28, %cst_18 [1, 2, 3] : vector<1x2x4x16xf32> to vector<1xf32>
    %30 = vector.shape_cast %29 : vector<1xf32> to vector<1x1x1x1xf32>
    %31 = vector.extract %30[0, 0, 0, 0] : f32 from vector<1x1x1x1xf32>
    %32 = arith.mulf %27, %27 : vector<2x4x16xf32>
    %33 = vector.shape_cast %32 : vector<2x4x16xf32> to vector<1x2x4x16xf32>
    %cst_19 = arith.constant dense<0.000000e+00> : vector<1xf32>
    %34 = vector.multi_reduction <add>, %33, %cst_19 [1, 2, 3] : vector<1x2x4x16xf32> to vector<1xf32>
    %35 = vector.shape_cast %34 : vector<1xf32> to vector<1x1x1x1xf32>
    %36 = vector.extract %35[0, 0, 0, 0] : f32 from vector<1x1x1x1xf32>
    %cst_20 = arith.constant 0.000000e+00 : f32
    %37 = arith.cmpf ogt, %31, %cst_20 : f32
    %cst_21 = arith.constant 1.000000e+00 : f32
    %38 = arith.select %37, %31, %cst_21 : f32
    %39 = arith.divf %36, %38 : f32
    %c0_22 = arith.constant 0 : index
    %c0_23 = arith.constant 0 : index
    %40 = memref.load %arg11[%c0_22, %c0_23] : memref<1x1xf32, #tpu.memory_space<smem>>
    %41 = arith.addf %40, %39 : f32
    %c0_24 = arith.constant 0 : index
    %c0_25 = arith.constant 0 : index
    %42 = memref.load %arg11[%c0_24, %c0_25] : memref<1x1xf32, #tpu.memory_space<smem>>
    memref.store %41, %arg11[%c0_24, %c0_25] : memref<1x1xf32, #tpu.memory_space<smem>>
    %c3_i32 = arith.constant 3 : i32
    %43 = arith.cmpi eq, %arg0, %c3_i32 : i32
    %44 = arith.extui %43 : i1 to i32
    %c0_i32_26 = arith.constant 0 : i32
    %45 = arith.cmpi ne, %44, %c0_i32_26 : i32
    scf.if %45 {
      %c0_27 = arith.constant 0 : index
      %c0_28 = arith.constant 0 : index
      %46 = memref.load %arg11[%c0_27, %c0_28] : memref<1x1xf32, #tpu.memory_space<smem>>
      %cst_29 = arith.constant 4.000000e+00 : f32
      %47 = arith.divf %46, %cst_29 : f32
      %c0_30 = arith.constant 0 : index
      %c0_31 = arith.constant 0 : index
      %48 = memref.load %arg11[%c0_30, %c0_31] : memref<1x1xf32, #tpu.memory_space<smem>>
      memref.store %47, %arg11[%c0_30, %c0_31] : memref<1x1xf32, #tpu.memory_space<smem>>
    } else {
    }
    return
  }
  func.func @transform_0(%arg0: i32) -> i32 {
    %c0_i32 = arith.constant 0 : i32
    %c0_i32_0 = arith.constant 0 : i32
    return %c0_i32 : i32
  }
  func.func @transform_1(%arg0: i32) -> i32 {
    %c0_i32 = arith.constant 0 : i32
    %c0_i32_0 = arith.constant 0 : i32
    return %c0_i32 : i32
  }
  func.func @transform_2(%arg0: i32) -> (i32, i32) {
    %c0_i32 = arith.constant 0 : i32
    %c0_i32_0 = arith.constant 0 : i32
    %c0_i32_1 = arith.constant 0 : i32
    return %c0_i32, %c0_i32_0 : i32, i32
  }
  func.func @transform_3(%arg0: i32) -> (i32, i32, i32) {
    %c0_i32 = arith.constant 0 : i32
    %c0_i32_0 = arith.constant 0 : i32
    %c0_i32_1 = arith.constant 0 : i32
    %c0_i32_2 = arith.constant 0 : i32
    return %c0_i32, %c0_i32_0, %c0_i32_1 : i32, i32, i32
  }
  func.func @transform_4(%arg0: i32) -> (i32, i32) {
    %c0_i32 = arith.constant 0 : i32
    %c0_i32_0 = arith.constant 0 : i32
    %c0_i32_1 = arith.constant 0 : i32
    return %c0_i32, %c0_i32_0 : i32, i32
  }
  func.func @transform_5(%arg0: i32) -> (i32, i32, i32) {
    %c0_i32 = arith.constant 0 : i32
    %c0_i32_0 = arith.constant 0 : i32
    %c0_i32_1 = arith.constant 0 : i32
    %c0_i32_2 = arith.constant 0 : i32
    return %c0_i32, %c0_i32_0, %c0_i32_1 : i32, i32, i32
  }
  func.func @transform_6(%arg0: i32) -> (i32, i32, i32) {
    %c0_i32 = arith.constant 0 : i32
    %c0_i32_0 = arith.constant 0 : i32
    %c0_i32_1 = arith.constant 0 : i32
    %c0_i32_2 = arith.constant 0 : i32
    return %c0_i32, %c0_i32_0, %c0_i32_1 : i32, i32, i32
  }
  func.func @transform_7(%arg0: i32) -> (i32, i32, i32) {
    %c0_i32 = arith.constant 0 : i32
    %c0_i32_0 = arith.constant 0 : i32
    %c0_i32_1 = arith.constant 0 : i32
    %c0_i32_2 = arith.constant 0 : i32
    return %c0_i32, %c0_i32_0, %c0_i32_1 : i32, i32, i32
  }
  func.func @transform_8(%arg0: i32) -> (i32, i32, i32) {
    %c0_i32 = arith.constant 0 : i32
    %c0_i32_0 = arith.constant 0 : i32
    %c0_i32_1 = arith.constant 0 : i32
    %c0_i32_2 = arith.constant 0 : i32
    return %c0_i32, %c0_i32_0, %c0_i32_1 : i32, i32, i32
  }
  func.func @transform_9(%arg0: i32) -> (i32, i32, i32, i32) {
    %c0_i32 = arith.constant 0 : i32
    %c0_i32_0 = arith.constant 0 : i32
    %c0_i32_1 = arith.constant 0 : i32
    %c0_i32_2 = arith.constant 0 : i32
    return %arg0, %c0_i32, %c0_i32_0, %c0_i32_1 : i32, i32, i32, i32
  }
  func.func @transform_10(%arg0: i32) -> (i32, i32) {
    %c0_i32 = arith.constant 0 : i32
    %c0_i32_0 = arith.constant 0 : i32
    %c0_i32_1 = arith.constant 0 : i32
    return %c0_i32, %c0_i32_0 : i32, i32
  }
}

</mosaic_0001>

<bundles_post_ra>
// kernel: forward_valid.1
= control target key start
LH: loop header
LB: loop body
LE: loop exit
PB: predicated region body
PF: predicated region fallthrough
CT: control target
= control target key end

     0   :  { %15 = vsyncpa [#allocation6], 0  ;;  %s12140_s0 = inlined_call_operand.vmem [shape: f32[4], index: 0, kind: input, shape index: {}]   ;;  %s12141_s1 = inlined_call_operand.vmem [shape: f32[4], index: 1, kind: input, shape index: {}]   ;;  %s12142_s2 = inlined_call_operand.vmem [shape: f32[2,16], index: 2, kind: input, shape index: {}]   ;;  %s12143_s3 = inlined_call_operand.vmem [shape: f32[16,1,1], index: 3, kind: input, shape index: {}]   ;;  %s12144_s4 = inlined_call_operand.vmem [shape: f32[8,4], index: 4, kind: input, shape index: {}]   ;;  %s12145_s5 = inlined_call_operand.vmem [shape: f32[27,1,1], index: 5, kind: input, shape index: {}]   ;;  %s12146_s6 = inlined_call_operand.vmem [shape: f32[2,4,16], index: 6, kind: input, shape index: {}]   ;;  %s12147_s7 = inlined_call_operand.vmem [shape: f32[2,4,16], index: 7, kind: input, shape index: {}]   ;;  %s12148_s8 = inlined_call_operand.vmem [shape: f32[2,4,16], index: 8, kind: input, shape index: {}]   ;;  %s12149_s9 = inlined_call_operand.vmem [shape: f32[4,2,4,16], index: 9, kind: input, shape index: {}]   ;;  %s12150_s10 = inlined_call_operand.hbm [shape: f32[1,1], index: 10, kind: output, shape index: {}]  }
   0x1   :  { %16 = vsyncpa [#allocation8], 0 }
   0x2   :  { %17 = vsyncpa [#allocation5], 0  ;;  %s8953_s13 = smov 0  }
   0x3 LB: > { %s8959_s14 = sadd.s32 4294967295, %s8883_s13   ;;  %p8181_p0 = scmp.ge.s32.totalorder %s8883_s13, 1  ;;  %s8883_s13 = sphi %s8953_s13, %s23_s13  }
   0x4   : > { %p264_p1 = scmp.lt.s32.totalorder %s8883_s13, 5  ;;  %s277_s17 = sshll.u32 %s12140_s0, 4  ;;  %s278_s17 = int_to_ptr.vmem [resolvable:$true] %s277_s17 }
   0x5   : > { %p12151_p4 = scmp.eq.s32.totalorder %s8959_s14, 0  ;;  %s288_s21 = sshll.u32 %s12141_s1, 4  ;;  %s289_s21 = int_to_ptr.vmem [resolvable:$true] %s288_s21 }
   0x6   : > { %p8967_p3 = pnand %p8181_p0, %p264_p1  ;;  %s8823_s23 = scalar_lea.vmem %s278_s17, 16 }
   0x7   : > { %p8824_p7 = scmp.ne.s32.totalorder %s278_s17, %s8823_s23  ;;  %p8831_p11 = scmp.lt.s32.totalorder %s278_s17, %s278_s17 }
   0x8   : > { %s12153_s18 = scalar_select %p8967_p3, 1, 0 }
   0x9   : > { %p8655_p5 = pneg %p8967_p3  ;;  %p8832_p12 = scmp.lt.s32.totalorder %s8823_s23, %s8823_s23 }
   0xb   : > { %p8979_p6 = pnand %p12151_p4, %p8655_p5  ;;  %p8833_p13 = por %p8832_p12, %p8831_p11 }
   0xd   : > { %p8825_p8 = pneg %p8979_p6 }
   0xf   : > { %p8826_p9 = pnand %p8825_p8, %p8824_p7 }
  0x11   : > { %p8827_p10 = pneg %p8826_p9 }
  0x13   : > { %p8834_p0 = pnand %p8833_p13, %p8827_p10 }
  0x15   : > { %8837 = shalt.err (!%p8834_p0)
}
  0x16   : > { %s8885_s24 = smov [#allocation4]   ;;  %s8838_s25 = scalar_lea.vmem %s289_s21, 16 }
  0x17   : > { %8658 = dma.vmem_to_smem (!%p8979_p6), %s278_s17, 16, %s8885_s24, [#allocation6]  }
  0x18   : > { %p8839_p1 = scmp.ne.s32.totalorder %s289_s21, %s8838_s25  ;;  %p8846_p4 = scmp.lt.s32.totalorder %s289_s21, %s289_s21 }
  0x19   : > { %p8847_p3 = scmp.lt.s32.totalorder %s8838_s25, %s8838_s25 }
  0x1a   : > { %p8841_p5 = pnand %p8839_p1, %p8825_p8 }
  0x1b   : > { %p8848_p7 = por %p8847_p3, %p8846_p4 }
  0x1c   : > { %p8842_p2 = pneg %p8841_p5 }
  0x1e   : > { %p8849_p9 = pnand %p8848_p7, %p8842_p2 }
  0x20   : > { %8852 = shalt.err (!%p8849_p9)
}
  0x21   : > { %s8886_s26 = smov [#allocation7]   ;;  %p12155_p10 = scmp.ne.s32.totalorder %s12153_s18, 0 }
  0x22   : > { %8661 = dma.vmem_to_smem (!%p8979_p6), %s289_s21, 16, %s8886_s26, [#allocation8]  }
  0x23   : > { %330 = sbr.rel (%p12155_p10) target bundleno = 1419 (0x58b), region = 60  ;;  %p12156_p11 = scmp.eq.s32.totalorder (!%p12155_p10), %s8959_s14, 0 }
  0x2a   : > { %8870 = dma.done.wait (%p12156_p11), [#allocation6], 16   ;;  %p12157_p12 = pmov %p12156_p11 }
  0x2b   : > { %p12158_p8 = pmov %p12156_p11 }
  0x2c   : > { %8872 = vsyncadd (%p12157_p12), [#allocation6], 4294967280 }
  0x2d   : > { %8874 = dma.done.wait (%p12158_p8), [#allocation8], 16   ;;  %p12159_p3 = pmov %p12158_p8 }
  0x2f   : > { %8876 = vsyncadd (%p12159_p3), [#allocation8], 4294967280 }
  0x30   : > { %340 = sfence }
  0x31   : > { %p368_p2 = scmp.lt.s32.totalorder %s8959_s14, 3  ;;  %v9003_v0 = vld [vmem:[%s12146_s6] sm:$0xf]  ;;  %v9008_v1 = vld [vmem:[%s12146_s6 + $0x4] sm:$0xf]  ;;  %p12160_p4 = scmp.ne.s32.totalorder %s8959_s14, 0 }
  0x32   : > { %v9013_v2 = vld [vmem:[%s12147_s7] sm:$0xf]  ;;  %v9018_v3 = vld [vmem:[%s12147_s7 + $0x4] sm:$0xf]  ;;  %v8887_v6 = vmov (!%p12160_p4), 0   ;;  %vm7504_vm0 = vcmask (!%p12160_p4), 125952   ;;  %v394_v15 = vlaneseq (!%p12160_p4) }
  0x33   : > { %s369_s17 = scalar_select %p368_p2, %s8959_s14, 3 }
  0x34   : > { %380 = sbr.rel (%p12160_p4) target bundleno = 1058 (0x422), region = 72  ;;  %v409_v4 = vld [vmem:[%s12143_s3 + $0x2] sm:$0x1] (!%p12160_p4)  ;;  %v407_v5 = vld [vmem:[%s12143_s3] sm:$0x1] (!%p12160_p4)  ;;  %8691 = vset.pattern.permute.xlu1 (!%p12160_p4), %v8887_v6  ;;  %8690 = vset.pattern.permute.xlu0 (!%p12160_p4), %v8887_v6  ;;  %v9068_v18 = vshrl.u32 (!%p12160_p4), %v394_v15, 7 }
  0x35   : > { %s8506_s18 = sshll.u32 %s369_s17, 3  ;;  %443 = vperm.xlu1 (!%p12160_p4), %8691, %v409_v4   ;;  %425 = vperm.xlu0 (!%p12160_p4), %8690, %v407_v5   ;;  %v410_v7 = vld [vmem:[%s12143_s3 + $0x3] sm:$0x1] (!%p12160_p4)  ;;  %v408_v8 = vld [vmem:[%s12143_s3 + $0x1] sm:$0x1] (!%p12160_p4)  ;;  %s8895_s25 = smov (!%p12160_p4), 0.0  }
  0x36   : > { %s9024_s21 = scalar_lea.vmem %s12149_s9, %s8506_s18  ;;  %v412_v9 = vld [vmem:[%s12143_s3 + $0x5] sm:$0x1] (!%p12160_p4)  ;;  %v411_v10 = vld [vmem:[%s12143_s3 + $0x4] sm:$0x1] (!%p12160_p4)  ;;  %7555 = vst.msk [vmem:[#allocation2 + $0x60] sm:$0xf] (!%p12160_p4), %vm7504_vm0, %v9013_v2 }
  0x37   : > { %7556 = vst.msk [vmem:[#allocation2 + $0xc4] sm:$0xf] (!%p12160_p4), %vm7504_vm0, %v9018_v3  ;;  %v414_v11 = vld [vmem:[%s12143_s3 + $0x7] sm:$0x1] (!%p12160_p4)  ;;  %v413_v12 = vld [vmem:[%s12143_s3 + $0x6] sm:$0x1] (!%p12160_p4) }
  0x38   : > { %v416_v13 = vld [vmem:[%s12143_s3 + $0x9] sm:$0x1] (!%p12160_p4)  ;;  %v415_v14 = vld [vmem:[%s12143_s3 + $0x8] sm:$0x1] (!%p12160_p4)  ;;  %v418_v16 = vld [vmem:[%s12143_s3 + $0xb] sm:$0x1] (!%p12160_p4) }
  0x39   : > { %452 = vperm.xlu1 (!%p12160_p4), %8691, %v410_v7   ;;  %434 = vperm.xlu0 (!%p12160_p4), %8690, %v408_v8   ;;  %v417_v17 = vld [vmem:[%s12143_s3 + $0xa] sm:$0x1] (!%p12160_p4)  ;;  %v420_v19 = vld [vmem:[%s12143_s3 + $0xd] sm:$0x1] (!%p12160_p4)  ;;  %v419_v20 = vld [vmem:[%s12143_s3 + $0xc] sm:$0x1] (!%p12160_p4) }
  0x3a   : > { %v9077_v21 = vsub.s32 (!%p12160_p4), 0, %v9068_v18  ;;  %v422_v22 = vld [vmem:[%s12143_s3 + $0xf] sm:$0x1] (!%p12160_p4)  ;;  %v421_v23 = vld [vmem:[%s12143_s3 + $0xe] sm:$0x1] (!%p12160_p4)  ;;  %v9088_v24 = vld [vmem:[%s12144_s4] sm:$0xff] (!%p12160_p4) }
  0x3b   : > { %v8473_v26 = vld [vmem:[%s12145_s5 + $0x2] ss:$0 sm:$0xff]  ;;  %v8475_v27 = vld [vmem:[%s12145_s5 + $0x4] ss:$0 sm:$0xff]  ;;  %v8474_v28 = vld [vmem:[%s12145_s5 + $0x3] ss:$0 sm:$0xff] }
  0x3c   : > { %v7451_v25 = vrot.slane %v9088_v24, %v9077_v21  ;;  %v8477_v29 = vld [vmem:[%s12145_s5 + $0x6] ss:$0 sm:$0xff]  ;;  %v8476_v30 = vld [vmem:[%s12145_s5 + $0x5] ss:$0 sm:$0xff]  ;;  %v8479_v31 = vld [vmem:[%s12145_s5 + $0x8] ss:$0 sm:$0xff] }
  0x3d   : > { %470 = vperm.xlu1 %8691, %v412_v9   ;;  %461 = vperm.xlu0 %8690, %v411_v10   ;;  %v8478_v32 = vld [vmem:[%s12145_s5 + $0x7] ss:$0 sm:$0xff]  ;;  %v8481_v33 = vld [vmem:[%s12145_s5 + $0xa] ss:$0 sm:$0xff]  ;;  %v8480_v34 = vld [vmem:[%s12145_s5 + $0x9] ss:$0 sm:$0xff] }
  0x3e   : > { %v8483_v35 = vld [vmem:[%s12145_s5 + $0xc] ss:$0 sm:$0xff]  ;;  %v8482_v36 = vld [vmem:[%s12145_s5 + $0xb] ss:$0 sm:$0xff]  ;;  %v8485_v37 = vld [vmem:[%s12145_s5 + $0xe] ss:$0 sm:$0xff] }
  0x3f   : > { %v8484_v38 = vld [vmem:[%s12145_s5 + $0xd] ss:$0 sm:$0xff]  ;;  %v8487_v39 = vld [vmem:[%s12145_s5 + $0x10] ss:$0 sm:$0xff]  ;;  %v8486_v40 = vld [vmem:[%s12145_s5 + $0xf] ss:$0 sm:$0xff] }
  0x40   : > { %v7457_v41 = vsub.s32 1, %v9068_v18  ;;  %v8489_v42 = vld [vmem:[%s12145_s5 + $0x12] ss:$0 sm:$0xff]  ;;  %v8488_v43 = vld [vmem:[%s12145_s5 + $0x11] ss:$0 sm:$0xff]  ;;  %v7464_v45 = vsub.s32 2, %v9068_v18 }
  0x41   : > { %488 = vperm.xlu1 %8691, %v414_v11   ;;  %479 = vperm.xlu0 %8690, %v413_v12   ;;  %v8490_v46 = vld [vmem:[%s12145_s5 + $0x13] ss:$0 sm:$0xff]  ;;  %v7471_v48 = vsub.s32 3, %v9068_v18  ;;  %v8491_v49 = vld [vmem:[%s12145_s5 + $0x14] ss:$0 sm:$0xff]  ;;  %v7478_v51 = vsub.s32 4, %v9068_v18 }
  0x42   : > { %v7458_v44 = vrot.slane %v9088_v24, %v7457_v41  ;;  %v7465_v47 = vrot.slane %v9088_v24, %v7464_v45  ;;  %v8492_v52 = vld [vmem:[%s12145_s5 + $0x15] ss:$0 sm:$0xff]  ;;  %v7485_v54 = vsub.s32 5, %v9068_v18  ;;  %v8493_v55 = vld [vmem:[%s12145_s5 + $0x16] ss:$0 sm:$0xff]  ;;  %v7492_v57 = vsub.s32 6, %v9068_v18 }
  0x43   : > { %v7472_v50 = vrot.slane %v9088_v24, %v7471_v48  ;;  %v7479_v53 = vrot.slane %v9088_v24, %v7478_v51  ;;  %v8494_v58 = vld [vmem:[%s12145_s5 + $0x17] ss:$0 sm:$0xff]  ;;  %v7499_v60 = vsub.s32 7, %v9068_v18  ;;  %v8495_v61 = vld [vmem:[%s12145_s5 + $0x18] ss:$0 sm:$0xff]  ;;  %8025 = sst [smem:[#allocation9]] %s8895_s25 }
  0x44   : > { %v7486_v56 = vrot.slane %v9088_v24, %v7485_v54  ;;  %v7493_v59 = vrot.slane %v9088_v24, %v7492_v57  ;;  %v8496_v63 = vld [vmem:[%s12145_s5 + $0x19] ss:$0 sm:$0xff]  ;;  %v8498_v4 = vld [vmem:[%s12145_s5] ss:$0 sm:$0xff]  ;;  %v8497_v5 = vld [vmem:[%s12145_s5 + $0x1a] ss:$0 sm:$0xff] }
  0x45   : > { %506 = vperm.xlu1 %8691, %v416_v13   ;;  %497 = vperm.xlu0 %8690, %v415_v14   ;;  %v7500_v62 = vrot.slane %v9088_v24, %v7499_v60  ;;  %v8888_v6 = vmov 1966171168   ;;  %v8191_v9 = vld.sshfl [vmem:[%s12142_s2] sm:$0x11 pattern:$0x75316420] }
  0x46   : > { %v392_v7 = vunpack.c.l.s4 %v8888_v6  ;;  %v390_v10 = vcombine.high %v8191_v9, %v8191_v9  ;;  %v8889_v54 = vmov 683565275   ;;  %v8892_v60 = vmov 2102212464  }
  0x48   : > { %v393_v8 = vunpack.c.0.s8 %v392_v7 }
  0x49   : > { %524 = vperm.xlu1 %8691, %v418_v16   ;;  %515 = vperm.xlu0 %8690, %v417_v17  }
  0x4a   : > { %v396_v11 = vsub.s32 %v393_v8, %v9068_v18 }
  0x4c   : > { %v9188_v12 = vrot.slane %v8191_v9, %v396_v11  ;;  %v9190_v13 = vrot.slane %v390_v10, %v396_v11  ;;  %v8894_v11 = vmov 1326507024  }
  0x4d   : > { %542 = vperm.xlu1 %8691, %v420_v19   ;;  %533 = vperm.xlu0 %8690, %v419_v20  }
  0x51   : > { %560 = vperm.xlu1 %8691, %v422_v22   ;;  %551 = vperm.xlu0 %8690, %v421_v23  }
  0x55   : > { %7759 = vperm.xlu1 %8691, %v8473_v26   ;;  %7453 = vbcast.lane.b32.xlu0 %v7451_v25, 256 }
  0x59   : > { %7767 = vperm.xlu1 %8691, %v8475_v27   ;;  %7763 = vperm.xlu0 %8690, %v8474_v28  }
  0x5d   : > { %7775 = vperm.xlu1 %8691, %v8477_v29   ;;  %7771 = vperm.xlu0 %8690, %v8476_v30  }
  0x61   : > { %7783 = vperm.xlu1 %8691, %v8479_v31   ;;  %7779 = vperm.xlu0 %8690, %v8478_v32  }
  0x65   : > { %7791 = vperm.xlu1 %8691, %v8481_v33   ;;  %7787 = vperm.xlu0 %8690, %v8480_v34  }
  0x69   : > { %7799 = vperm.xlu1 %8691, %v8483_v35   ;;  %7795 = vperm.xlu0 %8690, %v8482_v36  }
  0x6d   : > { %7807 = vperm.xlu1 %8691, %v8485_v37   ;;  %7803 = vperm.xlu0 %8690, %v8484_v38  }
  0x71   : > { %7815 = vperm.xlu1 %8691, %v8487_v39   ;;  %7811 = vperm.xlu0 %8690, %v8486_v40  }
  0x75   : > { %7823 = vperm.xlu1 %8691, %v8489_v42   ;;  %7819 = vperm.xlu0 %8690, %v8488_v43  }
  0x79   : > { %7827 = vperm.xlu1 %8691, %v8490_v46   ;;  %7460 = vbcast.lane.b32.xlu0 %v7458_v44, 256 }
  0x7d   : > { %7831 = vperm.xlu1 %8691, %v8491_v49   ;;  %7467 = vbcast.lane.b32.xlu0 %v7465_v47, 256 }
  0x81   : > { %7835 = vperm.xlu1 %8691, %v8492_v52   ;;  %7474 = vbcast.lane.b32.xlu0 %v7472_v50, 256 }
  0x85   : > { %7839 = vperm.xlu1 %8691, %v8493_v55   ;;  %7481 = vbcast.lane.b32.xlu0 %v7479_v53, 256 }
  0x89   : > { %7843 = vperm.xlu1 %8691, %v8494_v58   ;;  %7488 = vbcast.lane.b32.xlu0 %v7486_v56, 256  ;;  %v8890_v56 = vmov 2475754826   ;;  %v8891_v58 = vmov 2131351028  }
  0x8d   : > { %7847 = vperm.xlu1 %8691, %v8495_v61   ;;  %7495 = vbcast.lane.b32.xlu0 %v7493_v59, 256 }
  0x91   : > { %7851 = vperm.xlu1 %8691, %v8496_v63   ;;  %7502 = vbcast.lane.b32.xlu0 %v7500_v62, 256  ;;  %v8893_v62 = vmov 920167782  }
  0x95   : > { %8015 = vperm.xlu1 %8691, %v8498_v4   ;;  %7855 = vperm.xlu0 %8690, %v8497_v5  }
  0xb4   : > { %v444_v14 = vpop.permute.xlu1 %443  ;;  %v426_v15 = vpop.permute.xlu0 %425 }
  0xb5   : > { %v449_v16 = vrot.slane %v444_v14, %v9077_v21  ;;  %v431_v17 = vrot.slane %v426_v15, %v9077_v21 }
  0xb7   : > { %v569_v19 = vmul.f32 %v449_v16, %v9188_v12  ;;  %v585_v20 = vmul.f32 %v449_v16, %v9190_v13  ;;  %v567_v22 = vmul.f32 %v431_v17, %v9188_v12  ;;  %v583_v39 = vmul.f32 %v431_v17, %v9190_v13 }
  0xb9   : > { %v9198_v23 = vrot.slane %v569_v19, %v9077_v21  ;;  %v9201_v18 = vrot.slane %v585_v20, %v9077_v21  ;;  %v9204_v24 = vrot.slane %v567_v22, %v9077_v21  ;;  %v9220_v48 = vrot.slane %v583_v39, %v9077_v21 }
  0xbb   : > { %v999_v25 = vand.u32 2147483647, %v9198_v23  ;;  %v1002_v26 = vand.u32 2139095040, %v9198_v23  ;;  %v2663_v27 = vand.u32 2147483647, %v9201_v18  ;;  %v2666_v28 = vand.u32 2139095040, %v9201_v18 }
  0xbc   : > { %v794_v33 = vand.u32 2139095040, %v9204_v24  ;;  %v791_v42 = vand.u32 2147483647, %v9204_v24  ;;  %vm1001_vm14 = vcmp.lt.s32.totalorder %v9198_v23, 0 }
  0xbd   : > { %v1003_v29 = vshrl.u32 %v1002_v26, 23  ;;  %v1006_v30 = vand.u32 8388607, %v999_v25  ;;  %v2667_v31 = vshrl.u32 %v2666_v28, 23  ;;  %v2670_v32 = vand.u32 8388607, %v2663_v27 }
  0xbe   : > { %v795_v36 = vshrl.u32 %v794_v33, 23  ;;  %v9226_v52 = vand.u32 8388607, %v791_v42  ;;  %vm9325_vm15 = vcmp.le.f32.partialorder %v999_v25, 0.7853982 }
  0xbf   : > { %v8200_v34 = vadd.s32 4294967169, %v1003_v29  ;;  %v8264_v35 = vadd.s32 4294967169, %v2667_v31  ;;  %v1007_v37 = vor.u32 8388608, %v1006_v30  ;;  %v2671_v40 = vor.u32 8388608, %v2670_v32 }
  0xc0   : > { %v8192_v44 = vadd.s32 4294967169, %v795_v36 }
  0xc1   : > { %v1009_v38 = vadd.s32 1, %v8200_v34  ;;  %v2673_v41 = vadd.s32 1, %v8264_v35  ;;  %v9217_v46 = vshll.u32 %v1007_v37, 8  ;;  %v9222_v51 = vshll.u32 %v2671_v40, 8 }
  0xc2   : > { %v9235_v5 = vadd.s32 1, %v8192_v44 }
  0xc3   : > { %vm1010_vm1 = vcmp.gt.s32.totalorder %v1009_v38, 0  ;;  %vm2674_vm2 = vcmp.gt.s32.totalorder %v2673_v41, 0 }
  0xc4   : > { %v1011_v43 = vsel %vm1010_vm1, %v1009_v38, 0  ;;  %v2675_v47 = vsel %vm2674_vm2, %v2673_v41, 0  ;;  %vm802_vm6 = vcmp.gt.s32.totalorder %v9235_v5, 0 }
  0xc5   : > { %v1013_v45 = vand.u32 31, %v1011_v43  ;;  %v1012_v49 = vshrl.u32 %v1011_v43, 5  ;;  %v2677_v50 = vand.u32 31, %v2675_v47  ;;  %v9233_v4 = vshrl.u32 %v2675_v47, 5 }
  0xc7   : > { %v1014_v53 = vsub.s32 32, %v1013_v45  ;;  %v1016_v55 = vshll.u32 %v8889_v54, %v1013_v45  ;;  %v1019_v57 = vshll.u32 %v8890_v56, %v1013_v45  ;;  %v1022_v59 = vshll.u32 %v8891_v58, %v1013_v45 }
  0xc8   : > { %v1025_v61 = vshll.u32 %v8892_v60, %v1013_v45  ;;  %v1028_v63 = vshll.u32 %v8893_v62, %v1013_v45  ;;  %vm1031_vm3 = vcmp.lt.s32.totalorder %v1012_v49, 1  ;;  %vm1033_vm4 = vcmp.lt.s32.totalorder %v1012_v49, 3 }
  0xc9   : > { %v1015_v6 = vshrl.u32 %v8889_v54, %v1014_v53  ;;  %v1017_v7 = vshrl.u32 %v8890_v56, %v1014_v53  ;;  %v1020_v8 = vshrl.u32 %v8891_v58, %v1014_v53  ;;  %v1023_v9 = vshrl.u32 %v8892_v60, %v1014_v53 }
  0xca   : > { %v1026_v10 = vshrl.u32 %v8893_v62, %v1014_v53  ;;  %v1029_v14 = vshrl.u32 %v8894_v11, %v1014_v53  ;;  %v2678_v19 = vsub.s32 32, %v2677_v50  ;;  %vm1034_vm5 = vcmp.lt.s32.totalorder %v1012_v49, 4 }
  0xcb   : > { %v1018_v15 = vor.u32 %v1017_v7, %v1016_v55  ;;  %v1021_v16 = vor.u32 %v1020_v8, %v1019_v57  ;;  %v1024_v17 = vor.u32 %v1023_v9, %v1022_v59  ;;  %v2680_v26 = vshll.u32 %v8889_v54, %v2677_v50 }
  0xcc   : > { %v1027_v20 = vor.u32 %v1026_v10, %v1025_v61  ;;  %v1030_v22 = vor.u32 %v1029_v14, %v1028_v63  ;;  %v2683_v35 = vshll.u32 %v8890_v56, %v2677_v50  ;;  %vm1032_vm7 = vcmp.lt.s32.totalorder %v1012_v49, 2 }
  0xcd   : > { %v1035_v28 = vsel %vm1031_vm3, %v1015_v6, %v1018_v15  ;;  %v1036_v29 = vsel %vm1034_vm5, %v1024_v17, 2102212464  ;;  %v1039_v30 = vsel %vm1031_vm3, %v1018_v15, %v1021_v16  ;;  %v1043_v31 = vsel %vm1031_vm3, %v1021_v16, %v1024_v17 }
  0xce   : > { %v1037_v32 = vsel %vm1033_vm4, %v1021_v16, %v1036_v29  ;;  %v1040_v33 = vsel %vm1034_vm5, %v1027_v20, 920167782  ;;  %v1044_v34 = vsel %vm1034_vm5, %v1030_v22, 1326507024  ;;  %v2681_v38 = vshrl.u32 %v8890_v56, %v2678_v19 }
  0xcf   : > { %v1041_v36 = vsel %vm1033_vm4, %v1024_v17, %v1040_v33  ;;  %v1045_v37 = vsel %vm1033_vm4, %v1027_v20, %v1044_v34  ;;  %v1038_v39 = vsel %vm1032_vm7, %v1035_v28, %v1037_v32  ;;  %v2684_v43 = vshrl.u32 %v8891_v58, %v2678_v19 }
  0xd0   : > { %v1042_v40 = vsel %vm1032_vm7, %v1039_v30, %v1041_v36  ;;  %v1046_v41 = vsel %vm1032_vm7, %v1043_v31, %v1045_v37  ;;  %v2682_v55 = vor.u32 %v2681_v38, %v2680_v26  ;;  %v2686_v49 = vshll.u32 %v8891_v58, %v2677_v50 }
  0xd1   : > { %v9252_v44 = vmul.u32.u64.low %v9217_v46, %v1046_v41  ;;  %v9253_v45 = vmul.u32.u64.high %v9217_v46, %v1046_v41, %v9252_v44  ;;  %v9256_v47 = vmul.u32.u64.low %v9217_v46, %v1042_v40  ;;  %v9257_v53 = vmul.u32.u64.high %v9217_v46, %v1042_v40, %v9256_v47 }
  0xd2   : > { %v2685_v57 = vor.u32 %v2684_v43, %v2683_v35  ;;  %v2687_v59 = vshrl.u32 %v8892_v60, %v2678_v19  ;;  %v2689_v61 = vshll.u32 %v8892_v60, %v2677_v50  ;;  %v2690_v63 = vshrl.u32 %v8893_v62, %v2678_v19 }
  0xd3   : > { %v2692_v6 = vshll.u32 %v8893_v62, %v2677_v50  ;;  %v2693_v7 = vshrl.u32 %v8894_v11, %v2678_v19  ;;  %v1054_v8 = vmul.u32 %v9217_v46, %v1038_v39  ;;  %v2679_v9 = vshrl.u32 %v8889_v54, %v2678_v19 }
  0xd4   : > { %v2688_v10 = vor.u32 %v2687_v59, %v2686_v49  ;;  %vm2695_vm8 = vcmp.lt.s32.totalorder %v9233_v4, 1  ;;  %vm1056_vm9 = vc.u32 %v9253_v45, %v9256_v47  ;;  %v1057_v14 = vadd.s32 1, %v9257_v53 }
  0xd5   : > { %v2691_v15 = vor.u32 %v2690_v63, %v2689_v61  ;;  %vm2696_vm10 = vcmp.lt.s32.totalorder %v9233_v4, 2  ;;  %v2694_v16 = vor.u32 %v2693_v7, %v2692_v6  ;;  %vm2697_vm11 = vcmp.lt.s32.totalorder %v9233_v4, 3 }
  0xd6   : > { %vm2698_vm12 = vcmp.lt.s32.totalorder %v9233_v4, 4  ;;  %v2703_v50 = vsel %vm2695_vm8, %v2682_v55, %v2685_v57  ;;  %v1058_v46 = vsel %vm1056_vm9, %v1057_v14, %v9257_v53  ;;  %v2707_v20 = vsel %vm2695_vm8, %v2685_v57, %v2688_v10 }
  0xd7   : > { %v2700_v17 = vsel %vm2698_vm12, %v2688_v10, 2102212464  ;;  %v2704_v19 = vsel %vm2698_vm12, %v2691_v15, 920167782  ;;  %v1059_v22 = vadd.s32 %v1058_v46, %v1054_v8  ;;  %v2699_v26 = vsel %vm2695_vm8, %v2679_v9, %v2682_v55 }
  0xd8   : > { %v2705_v28 = vsel %vm2697_vm11, %v2688_v10, %v2704_v19  ;;  %v2708_v29 = vsel %vm2698_vm12, %v2694_v16, 1326507024  ;;  %v2701_v30 = vsel %vm2697_vm11, %v2685_v57, %v2700_v17  ;;  %v803_v33 = vsel %vm802_vm6, %v9235_v5, 0 }
  0xd9   : > { %v2706_v31 = vsel %vm2696_vm10, %v2703_v50, %v2705_v28  ;;  %v2709_v32 = vsel %vm2697_vm11, %v2691_v15, %v2708_v29  ;;  %v1060_v34 = vadd.s32 536870912, %v1059_v22  ;;  %v2458_v40 = vand.u32 2139095040, %v9220_v48 }
  0xda   : > { %v2710_v35 = vsel %vm2696_vm10, %v2707_v20, %v2709_v32  ;;  %v9282_v36 = vmul.u32.u64.low %v9222_v51, %v2706_v31  ;;  %v9283_v37 = vmul.u32.u64.high %v9222_v51, %v2706_v31, %v9282_v36  ;;  %v2702_v43 = vsel %vm2696_vm10, %v2699_v26, %v2701_v30 }
  0xdb   : > { %v9287_v38 = vmul.u32.u64.low %v9222_v51, %v2710_v35  ;;  %v9288_v39 = vmul.u32.u64.high %v9222_v51, %v2710_v35, %v9287_v38  ;;  %v1061_v41 = vshrl.u32 %v1060_v34, 30  ;;  %v805_v5 = vand.u32 31, %v803_v33 }
  0xdc   : > { %v2455_v44 = vand.u32 2147483647, %v9220_v48  ;;  %v799_v53 = vor.u32 8388608, %v9226_v52  ;;  %v2721_v57 = vadd.s32 1, %v9283_v37  ;;  %v2718_v59 = vmul.u32 %v9222_v51, %v2702_v43 }
  0xdd   : > { %v1062_v55 = vshll.u32 %v1061_v41, 30  ;;  %v806_v49 = vsub.s32 32, %v805_v5  ;;  %vm2720_vm13 = vc.u32 %v9288_v39, %v9282_v36  ;;  %v2459_v61 = vshrl.u32 %v2458_v40, 23 }
  0xde   : > { %v2722_v4 = vsel %vm2720_vm13, %v2721_v57, %v9283_v37  ;;  %v9305_v6 = vand.u32 8388607, %v2455_v44  ;;  %v1055_v52 = vadd.s32 %v9256_v47, %v9253_v45  ;;  %v9309_v51 = vshll.u32 %v799_v53, 8 }
  0xdf   : > { %v9300_v63 = vsub.s32 %v1059_v22, %v1062_v55  ;;  %v2723_v7 = vadd.s32 %v2722_v4, %v2718_v59  ;;  %v809_v8 = vshrl.u32 %v8890_v56, %v806_v49  ;;  %v9312_v10 = vshrl.u32 %v803_v33, 5 }
  0xe0   : > { %v812_v14 = vshrl.u32 %v8891_v58, %v806_v49  ;;  %v815_v15 = vshrl.u32 %v8892_v60, %v806_v49  ;;  %v1085_v16 = vsub.s32 4, %v1061_v41  ;;  %v808_v46 = vshll.u32 %v8889_v54, %v805_v5 }
  0xe1   : > { %v1065_v9 = vsub.s32 0, %v9300_v63  ;;  %v2724_v50 = vadd.s32 536870912, %v2723_v7  ;;  %v8256_v17 = vadd.s32 4294967169, %v2459_v61  ;;  %v811_v47 = vshll.u32 %v8890_v56, %v805_v5 }
  0xe2   : > { %v814_v19 = vshll.u32 %v8891_v58, %v805_v5  ;;  %v818_v20 = vshrl.u32 %v8893_v62, %v806_v49  ;;  %v810_v26 = vor.u32 %v809_v8, %v808_v46  ;;  %v817_v28 = vshll.u32 %v8892_v60, %v805_v5 }
  0xe3   : > { %v8201_v45 = vmin.u32 %v1065_v9, %v9300_v63  ;;  %v2725_v22 = vshrl.u32 %v2724_v50, 30  ;;  %v821_v29 = vshrl.u32 %v8894_v11, %v806_v49  ;;  %v813_v32 = vor.u32 %v812_v14, %v811_v47 }
  0xe4   : > { %v816_v33 = vor.u32 %v815_v15, %v814_v19  ;;  %v820_v34 = vshll.u32 %v8893_v62, %v805_v5  ;;  %v819_v37 = vor.u32 %v818_v20, %v817_v28  ;;  %vm823_vm1 = vcmp.lt.s32.totalorder %v9312_v10, 1 }
  0xe5   : > { %v1067_v31 = vclz %v8201_v45  ;;  %v2726_v35 = vshll.u32 %v2725_v22, 30  ;;  %v2463_v38 = vor.u32 8388608, %v9305_v6  ;;  %vm824_vm2 = vcmp.lt.s32.totalorder %v9312_v10, 2 }
  0xe6   : > { %v822_v43 = vor.u32 %v821_v29, %v820_v34  ;;  %vm826_vm3 = vcmp.lt.s32.totalorder %v9312_v10, 4  ;;  %v1086_v25 = vsel %vm1001_vm14, %v1085_v16, %v1061_v41  ;;  %vm2665_vm4 = vcmp.lt.s32.totalorder %v9201_v18, 0 }
  0xe7   : > { %v8202_v40 = vadd.s32 4294967294, %v1067_v31  ;;  %v9337_v53 = vsub.s32 %v2723_v7, %v2726_v35  ;;  %vm825_vm5 = vcmp.lt.s32.totalorder %v9312_v10, 3  ;;  %v832_v5 = vsel %vm826_vm3, %v819_v37, 920167782 }
  0xe8   : > { %v807_v55 = vshrl.u32 %v8889_v54, %v806_v49  ;;  %v831_v57 = vsel %vm823_vm1, %v810_v26, %v813_v32  ;;  %v833_v59 = vsel %vm825_vm5, %v816_v33, %v832_v5  ;;  %v2749_v4 = vsub.s32 4, %v2725_v22 }
  0xe9   : > { %vm8203_vm6 = vcmp.lt.s32.totalorder %v8202_v40, 0  ;;  %v2729_v41 = vsub.s32 0, %v9337_v53  ;;  %v835_v7 = vsel %vm823_vm1, %v813_v32, %v816_v33  ;;  %vm9352_vm7 = vcmp.le.f32.partialorder %v2663_v27, 0.7853982 }
  0xea   : > { %v1070_v61 = vsel %vm8203_vm6, 0, %v8202_v40  ;;  %v828_v49 = vsel %vm826_vm3, %v816_v33, 2102212464  ;;  %v836_v15 = vsel %vm826_vm3, %v822_v43, 1326507024  ;;  %v834_v46 = vsel %vm824_vm2, %v831_v57, %v833_v59 }
  0xeb   : > { %v1071_v8 = vsub.s32 32, %v1070_v61  ;;  %v1075_v9 = vsub.s32 4294967266, %v1070_v61  ;;  %v1072_v16 = vshll.u32 %v9300_v63, %v1070_v61  ;;  %v8265_v50 = vmin.u32 %v2729_v41, %v9337_v53 }
  0xec   : > { %v837_v45 = vsel %vm825_vm5, %v819_v37, %v836_v15  ;;  %v2465_v20 = vadd.s32 1, %v8256_v17  ;;  %v1088_v28 = vsel %vm9325_vm15, 0, %v1086_v25  ;;  %v827_v63 = vsel %vm823_vm1, %v807_v55, %v810_v26 }
  0xed   : > { %v1073_v27 = vshrl.u32 %v1055_v52, %v1071_v8  ;;  %v1076_v47 = vadd.s32 127, %v1075_v9  ;;  %v838_v19 = vsel %vm824_vm2, %v835_v7, %v837_v45  ;;  %v2731_v29 = vclz %v8265_v50 }
  0xee   : > { %v829_v31 = vsel %vm825_vm5, %v813_v32, %v828_v49  ;;  %v9375_v35 = vmul.u32.u64.low %v9309_v51, %v838_v19  ;;  %v9376_v52 = vmul.u32.u64.high %v9309_v51, %v838_v19, %v9375_v35  ;;  %vm2466_vm8 = vcmp.gt.s32.totalorder %v2465_v20, 0 }
  0xef   : > { %v1074_v33 = vor.u32 %v1073_v27, %v1072_v16  ;;  %v1077_v34 = vshll.u32 %v1076_v47, 23  ;;  %v8266_v37 = vadd.s32 4294967294, %v2731_v29  ;;  %v2719_v26 = vadd.s32 %v9282_v36, %v9288_v39 }
  0xf0   : > { %v9379_v40 = vmul.u32.u64.low %v9309_v51, %v834_v46  ;;  %v9380_v17 = vmul.u32.u64.high %v9309_v51, %v834_v46, %v9379_v40  ;;  %v2750_v32 = vsel %vm2665_vm4, %v2749_v4, %v2725_v22  ;;  %v2467_v25 = vsel %vm2466_vm8, %v2465_v20, 0 }
  0xf1   : > { %v1078_v43 = vor.u32 4788187, %v1077_v34  ;;  %v1092_v5 = vadd.s32 3, %v1088_v28  ;;  %vm8267_vm9 = vcmp.lt.s32.totalorder %v8266_v37, 0  ;;  %v830_v55 = vsel %vm824_vm2, %v827_v63, %v829_v31 }
  0xf2   : > { %v2469_v57 = vand.u32 31, %v2467_v25  ;;  %v1081_v61 = vcvt.s32.f32 %v1074_v33  ;;  %v2734_v41 = vsel %vm8267_vm9, 0, %v8266_v37  ;;  %vm848_vm10 = vc.u32 %v9376_v52, %v9379_v40 }
  0xf3   : > { %v1079_v59 = vand.u32 2147483647, %v1078_v43  ;;  %v2735_v7 = vsub.s32 32, %v2734_v41  ;;  %v2739_v8 = vsub.s32 4294967266, %v2734_v41  ;;  %v2752_v36 = vsel %vm9352_vm7, 0, %v2750_v32  ;;  %v453_v32 = vpop.permute.xlu1 %452 }
  0xf4   : > { %v849_v39 = vadd.s32 1, %v9380_v17  ;;  %v846_v4 = vmul.u32 %v9309_v51, %v830_v55  ;;  %v9395_v9 = vshrl.u32 %v2467_v25, 5  ;;  %v2470_v10 = vsub.s32 32, %v2469_v57 }
  0xf5   : > { %v1082_v22 = vmul.f32 %v1081_v61, %v1079_v59  ;;  %v2736_v49 = vshll.u32 %v9337_v53, %v2734_v41  ;;  %v2737_v15 = vshrl.u32 %v2719_v26, %v2735_v7  ;;  %v2740_v16 = vadd.s32 127, %v2739_v8 }
  0xf6   : > { %v850_v50 = vsel %vm848_vm10, %v849_v39, %v9380_v17  ;;  %v2472_v27 = vshll.u32 %v8889_v54, %v2469_v57  ;;  %v2473_v47 = vshrl.u32 %v8890_v56, %v2470_v10  ;;  %v2475_v28 = vshll.u32 %v8890_v56, %v2469_v57 }
  0xf7   : > { %v1083_v46 = vxor.u32 2147483648, %v1082_v22  ;;  %v851_v45 = vadd.s32 %v850_v50, %v846_v4  ;;  %v2738_v19 = vor.u32 %v2737_v15, %v2736_v49  ;;  %v2741_v20 = vshll.u32 %v2740_v16, 23 }
  0xf8   : > { %v2476_v51 = vshrl.u32 %v8891_v58, %v2470_v10  ;;  %v2478_v63 = vshll.u32 %v8891_v58, %v2469_v57  ;;  %v2479_v31 = vshrl.u32 %v8892_v60, %v2470_v10  ;;  %v2474_v35 = vor.u32 %v2473_v47, %v2472_v27 }
  0xf9   : > { %v1084_v29 = vsel %vm1001_vm14, %v1083_v46, %v1082_v22  ;;  %v852_v53 = vadd.s32 536870912, %v851_v45  ;;  %v2742_v34 = vor.u32 4788187, %v2741_v20  ;;  %v2481_v37 = vshll.u32 %v8892_v60, %v2469_v57 }
  0xfa   : > { %v1087_v33 = vsel %vm9325_vm15, %v9198_v23, %v1084_v29  ;;  %v2745_v17 = vcvt.s32.f32 %v2738_v19  ;;  %v2482_v26 = vshrl.u32 %v8893_v62, %v2470_v10  ;;  %v2477_v55 = vor.u32 %v2476_v51, %v2475_v28 }
  0xfb   : > { %8692 = vcosq.f32 %v1087_v33  ;;  %v9411_v43 = vshrl.u32 %v852_v53, 30  ;;  %v2743_v25 = vand.u32 2147483647, %v2742_v34  ;;  %v2485_v59 = vshrl.u32 %v8894_v11, %v2470_v10 }
  0xfc   : > { %8694 = vsinq.f32 %v1087_v33  ;;  %v1093_v61 = vand.u32 3, %v1092_v5  ;;  %v2483_v41 = vor.u32 %v2482_v26, %v2481_v37  ;;  %v2480_v8 = vor.u32 %v2479_v31, %v2478_v63 }
  0xfd   : > { %v854_v30 = vshll.u32 %v9411_v43, 30  ;;  %v2746_v7 = vmul.f32 %v2745_v17, %v2743_v25  ;;  %v2484_v39 = vshll.u32 %v8893_v62, %v2469_v57  ;;  %v9418_v22 = vrot.slane %v453_v32, %v9077_v21 }
  0xfe   : > { %v2756_v4 = vadd.s32 3, %v2752_v36  ;;  %vm2487_vm11 = vcmp.lt.s32.totalorder %v9395_v9, 1  ;;  %v9425_v15 = vshll.u32 %v2463_v38, 8  ;;  %vm2490_vm12 = vcmp.lt.s32.totalorder %v9395_v9, 4 }
  0xff   : > { %v9420_v49 = vsub.s32 %v851_v45, %v854_v30  ;;  %v2747_v5 = vxor.u32 2147483648, %v2746_v7  ;;  %v2486_v16 = vor.u32 %v2485_v59, %v2484_v39  ;;  %v2495_v50 = vsel %vm2487_vm11, %v2474_v35, %v2477_v55 }
 0x100   : > { %vm1094_vm13 = vcmp.lt.s32.totalorder %v1093_v61, 2  ;;  %v2471_v36 = vshrl.u32 %v8889_v54, %v2470_v10  ;;  %vm2489_vm14 = vcmp.lt.s32.totalorder %v9395_v9, 3  ;;  %v2496_v46 = vsel %vm2490_vm12, %v2483_v41, 920167782 }
 0x101   : > { %v857_v57 = vsub.s32 0, %v9420_v49  ;;  %vm1091_vm15 = vweird.f32 %v9198_v23  ;;  %v2748_v6 = vsel %vm2665_vm4, %v2747_v5, %v2746_v7  ;;  %vm2488_vm1 = vcmp.lt.s32.totalorder %v9395_v9, 2 }
 0x102   : > { %v2492_v38 = vsel %vm2490_vm12, %v2480_v8, 2102212464  ;;  %v2497_v45 = vsel %vm2489_vm14, %v2480_v8, %v2496_v46  ;;  %v2751_v10 = vsel %vm9352_vm7, %v9201_v18, %v2748_v6  ;;  %v2499_v19 = vsel %vm2487_vm11, %v2477_v55, %v2480_v8 }
 0x103   : > { %v8193_v27 = vmin.u32 %v857_v57, %v9420_v49  ;;  %v2498_v47 = vsel %vm2488_vm1, %v2495_v50, %v2497_v45  ;;  %8696 = vcosq.f32 %v2751_v10  ;;  %v2500_v20 = vsel %vm2490_vm12, %v2486_v16, 1326507024 }
 0x104   : > { %v9454_v28 = vmul.u32.u64.low %v9425_v15, %v2498_v47  ;;  %v9455_v51 = vmul.u32.u64.high %v9425_v15, %v2498_v47, %v9454_v28  ;;  %vm1095_vm2 = vcmp.eq.s32.totalorder %v1093_v61, 0  ;;  %vm1098_vm3 = vcmp.eq.s32.totalorder %v1093_v61, 2 }
 0x105   : > { %v8693_v29 = vpop.eup %8692  ;;  %8698 = vsinq.f32 %v2751_v10  ;;  %vm793_vm4 = vcmp.lt.s32.totalorder %v9204_v24, 0  ;;  %v859_v14 = vclz %v8193_v27  ;;  %v2491_v31 = vsel %vm2487_vm11, %v2471_v36, %v2474_v35 }
 0x106   : > { %v8695_v53 = vpop.eup %8694  ;;  %v1099_v63 = vxor.u32 2147483648, %v8693_v29  ;;  %v2493_v33 = vsel %vm2489_vm14, %v2477_v55, %v2492_v38  ;;  %v2501_v34 = vsel %vm2489_vm14, %v2483_v41, %v2500_v20  ;;  %v570_v32 = vmul.f32 %v9418_v22, %v9188_v12 }
 0x107   : > { %v1096_v37 = vxor.u32 2147483648, %v8695_v53  ;;  %v8194_v17 = vadd.s32 4294967294, %v859_v14  ;;  %v2502_v26 = vsel %vm2488_vm1, %v2499_v19, %v2501_v34  ;;  %v2757_v59 = vand.u32 3, %v2756_v4 }
 0x108   : > { %v1100_v25 = vsel %vm1098_vm3, %v1099_v63, %v8695_v53  ;;  %vm9471_vm5 = vcmp.le.f32.partialorder %v791_v42, 0.7853982  ;;  %v9476_v55 = vmul.u32.u64.low %v9425_v15, %v2502_v26  ;;  %v9477_v30 = vmul.u32.u64.high %v9425_v15, %v2502_v26, %v9476_v55 }
 0x109   : > { %v1097_v41 = vsel %vm1095_vm2, %v8693_v29, %v1096_v37  ;;  %vm8195_vm6 = vcmp.lt.s32.totalorder %v8194_v17, 0  ;;  %v2494_v7 = vsel %vm2488_vm1, %v2491_v31, %v2493_v33  ;;  %v2513_v8 = vadd.s32 1, %v9455_v51  ;;  %v435_v37 = vpop.permute.xlu0 %434 }
 0x10a   : > { %v1101_v39 = vsel %vm1094_vm13, %v1097_v41, %v1100_v25  ;;  %v862_v4 = vsel %vm8195_vm6, 0, %v8194_v17  ;;  %v877_v42 = vsub.s32 4, %v9411_v43  ;;  %v9486_v5 = vrot.slane %v570_v32, %v9077_v21 }
 0x10b   : > { %v1102_v16 = vsel %vm1091_vm15, nan, %v1101_v39  ;;  %v847_v50 = vadd.s32 %v9379_v40, %v9376_v52  ;;  %v863_v57 = vsub.s32 32, %v862_v4  ;;  %v867_v36 = vsub.s32 4294967266, %v862_v4 }
 0x10c   : > { %vm2758_vm7 = vcmp.lt.s32.totalorder %v2757_v59, 2  ;;  %7507 = vst.msk [vmem:[#allocation2 + $0x8] sm:$0xf] %vm7504_vm0, %v1102_v16  ;;  %v2510_v9 = vmul.u32 %v9425_v15, %v2494_v7  ;;  %vm2512_vm8 = vc.u32 %v9477_v30, %v9454_v28  ;;  %v586_v61 = vmul.f32 %v9418_v22, %v9190_v13 }
 0x10d   : > { %v864_v46 = vshll.u32 %v9420_v49, %v862_v4  ;;  %v865_v23 = vshrl.u32 %v847_v50, %v863_v57  ;;  %v868_v6 = vadd.s32 127, %v867_v36  ;;  %v2514_v38 = vsel %vm2512_vm8, %v2513_v8, %v9455_v51  ;;  %v8697_v52 = vpop.eup %8696 }
 0x10e   : > { %v878_v40 = vsel %vm793_vm4, %v877_v42, %v9411_v43  ;;  %v2515_v45 = vadd.s32 %v2514_v38, %v2510_v9  ;;  %v4428_v15 = vand.u32 2147483647, %v9486_v5  ;;  %v4431_v10 = vand.u32 2139095040, %v9486_v5 }
 0x10f   : > { %v8699_v27 = vpop.eup %8698  ;;  %vm2759_vm9 = vcmp.eq.s32.totalorder %v2757_v59, 0  ;;  %v2763_v47 = vxor.u32 2147483648, %v8697_v52  ;;  %v866_v22 = vor.u32 %v865_v23, %v864_v46  ;;  %v869_v19 = vshll.u32 %v868_v6, 23 }
 0x110   : > { %v2760_v49 = vxor.u32 2147483648, %v8699_v27  ;;  %vm2762_vm10 = vcmp.eq.s32.totalorder %v2757_v59, 2  ;;  %v2516_v20 = vadd.s32 536870912, %v2515_v45  ;;  %v4432_v29 = vshrl.u32 %v4431_v10, 23 }
 0x111   : > { %v2764_v51 = vsel %vm2762_vm10, %v2763_v47, %v8699_v27  ;;  %v870_v14 = vor.u32 4788187, %v869_v19  ;;  %v880_v53 = vsel %vm9471_vm5, 0, %v878_v40  ;;  %v9508_v43 = vrot.slane %v586_v61, %v9077_v21 }
 0x112   : > { %v2761_v63 = vsel %vm2759_vm9, %v8697_v52, %v2760_v49  ;;  %v9510_v31 = vshrl.u32 %v2516_v20, 30  ;;  %v8332_v33 = vadd.s32 4294967169, %v4432_v29  ;;  %v4435_v34 = vand.u32 8388607, %v4428_v15 }
 0x113   : > { %vm2755_vm11 = vweird.f32 %v9201_v18  ;;  %v2765_v17 = vsel %vm2758_vm7, %v2761_v63, %v2764_v51  ;;  %v871_v26 = vand.u32 2147483647, %v870_v14  ;;  %v873_v32 = vcvt.s32.f32 %v866_v22 }
 0x114   : > { %v2766_v25 = vsel %vm2755_vm11, nan, %v2765_v17  ;;  %v2518_v55 = vshll.u32 %v9510_v31, 30  ;;  %v4438_v41 = vadd.s32 1, %v8332_v33  ;;  %v884_v8 = vadd.s32 3, %v880_v53 }
 0x115   : > { %7523 = vst.msk [vmem:[#allocation2 + $0x6c] sm:$0xf] %vm7504_vm0, %v2766_v25  ;;  %v874_v7 = vmul.f32 %v873_v32, %v871_v26  ;;  %v6079_v39 = vand.u32 2139095040, %v9508_v43  ;;  %v9520_v4 = vrot.slane %v435_v37, %v9077_v21  ;;  %v4436_v18 = vor.u32 8388608, %v4435_v34 }
 0x116   : > { %v9522_v42 = vsub.s32 %v2515_v45, %v2518_v55  ;;  %vm4439_vm12 = vcmp.gt.s32.totalorder %v4438_v41, 0  ;;  %v6076_v50 = vand.u32 2147483647, %v9508_v43  ;;  %v9528_v46 = vand.u32 3, %v884_v8 }
 0x117   : > { %v875_v59 = vxor.u32 2147483648, %v874_v7  ;;  %v4440_v16 = vsel %vm4439_vm12, %v4438_v41, 0  ;;  %v6080_v9 = vshrl.u32 %v6079_v39, 23  ;;  %v2511_v23 = vadd.s32 %v9454_v28, %v9477_v30 }
 0x118   : > { %v2521_v57 = vsub.s32 0, %v9522_v42  ;;  %v4442_v36 = vand.u32 31, %v4440_v16  ;;  %v9534_v6 = vmul.f32 %v9520_v4, %v9188_v12  ;;  %v9540_v45 = vshll.u32 %v4436_v18, 8 }
 0x119   : > { %v876_v61 = vsel %vm793_vm4, %v875_v59, %v874_v7  ;;  %v2541_v10 = vsub.s32 4, %v9510_v31  ;;  %v9543_v27 = vshrl.u32 %v4440_v16, 5  ;;  %v9547_v28 = vand.u32 8388607, %v6076_v50 }
 0x11a   : > { %v879_v38 = vsel %vm9471_vm5, %v9204_v24, %v876_v61  ;;  %v8257_v52 = vmin.u32 %v2521_v57, %v9522_v42  ;;  %v4443_v40 = vsub.s32 32, %v4442_v36  ;;  %v4445_v47 = vshll.u32 %v8889_v54, %v4442_v36 }
 0x11b   : > { %8700 = vcosq.f32 %v879_v38  ;;  %v8396_v35 = vadd.s32 4294967169, %v6080_v9  ;;  %v4448_v19 = vshll.u32 %v8890_v56, %v4442_v36  ;;  %v4451_v20 = vshll.u32 %v8891_v58, %v4442_v36 }
 0x11c   : > { %8702 = vsinq.f32 %v879_v38  ;;  %v2523_v30 = vclz %v8257_v52  ;;  %v4446_v22 = vshrl.u32 %v8890_v56, %v4443_v40  ;;  %v4449_v49 = vshrl.u32 %v8891_v58, %v4443_v40 }
 0x11d   : > { %v4452_v51 = vshrl.u32 %v8892_v60, %v4443_v40  ;;  %v4454_v14 = vshll.u32 %v8892_v60, %v4442_v36  ;;  %v4455_v53 = vshrl.u32 %v8893_v62, %v4443_v40  ;;  %vm890_vm13 = vcmp.eq.s32.totalorder %v9528_v46, 2 }
 0x11e   : > { %v8258_v29 = vadd.s32 4294967294, %v2523_v30  ;;  %vm2457_vm14 = vcmp.lt.s32.totalorder %v9220_v48, 0  ;;  %v4447_v63 = vor.u32 %v4446_v22, %v4445_v47  ;;  %v4450_v33 = vor.u32 %v4449_v49, %v4448_v19 }
 0x11f   : > { %v4457_v34 = vshll.u32 %v8893_v62, %v4442_v36  ;;  %v4458_v37 = vshrl.u32 %v8894_v11, %v4443_v40  ;;  %vm887_vm15 = vcmp.eq.s32.totalorder %v9528_v46, 0  ;;  %v4444_v17 = vshrl.u32 %v8889_v54, %v4443_v40 }
 0x120   : > { %vm8259_vm1 = vcmp.lt.s32.totalorder %v8258_v29, 0  ;;  %v4453_v26 = vor.u32 %v4452_v51, %v4451_v20  ;;  %v4456_v32 = vor.u32 %v4455_v53, %v4454_v14  ;;  %vm886_vm2 = vcmp.lt.s32.totalorder %v9528_v46, 2 }
 0x121   : > { %v2526_v25 = vsel %vm8259_vm1, 0, %v8258_v29  ;;  %v4459_v55 = vor.u32 %v4458_v37, %v4457_v34  ;;  %vm4460_vm3 = vcmp.lt.s32.totalorder %v9543_v27, 1  ;;  %vm4461_vm4 = vcmp.lt.s32.totalorder %v9543_v27, 2 }
 0x122   : > { %vm883_vm5 = vweird.f32 %v9204_v24  ;;  %vm9569_vm6 = vcmp.le.f32.partialorder %v2455_v44, 0.7853982  ;;  %v2527_v7 = vsub.s32 32, %v2526_v25  ;;  %v2531_v8 = vsub.s32 4294967266, %v2526_v25 }
 0x123   : > { %vm4462_vm7 = vcmp.lt.s32.totalorder %v9543_v27, 3  ;;  %vm4463_vm8 = vcmp.lt.s32.totalorder %v9543_v27, 4  ;;  %v2528_v39 = vshll.u32 %v9522_v42, %v2526_v25  ;;  %v4468_v59 = vsel %vm4460_vm3, %v4447_v63, %v4450_v33 }
 0x124   : > { %v4465_v18 = vsel %vm4463_vm8, %v4453_v26, 2102212464  ;;  %v4469_v16 = vsel %vm4463_vm8, %v4456_v32, 920167782  ;;  %v2529_v57 = vshrl.u32 %v2511_v23, %v2527_v7  ;;  %v2532_v36 = vadd.s32 127, %v2531_v8 }
 0x125   : > { %v4464_v44 = vsel %vm4460_vm3, %v4444_v17, %v4447_v63  ;;  %v4470_v9 = vsel %vm4462_vm7, %v4453_v26, %v4469_v16  ;;  %v8701_v61 = vpop.eup %8700  ;;  %v4466_v38 = vsel %vm4462_vm7, %v4450_v33, %v4465_v18  ;;  %v4472_v52 = vsel %vm4460_vm3, %v4450_v33, %v4453_v26 }
 0x126   : > { %v4471_v42 = vsel %vm4461_vm4, %v4468_v59, %v4470_v9  ;;  %v4473_v40 = vsel %vm4463_vm8, %v4459_v55, 1326507024  ;;  %v8703_v30 = vpop.eup %8702  ;;  %v891_v23 = vxor.u32 2147483648, %v8701_v61  ;;  %v2530_v47 = vor.u32 %v2529_v57, %v2528_v39 }
 0x127   : > { %v2533_v22 = vshll.u32 %v2532_v36, 23  ;;  %v4474_v19 = vsel %vm4462_vm7, %v4456_v32, %v4473_v40  ;;  %v888_v49 = vxor.u32 2147483648, %v8703_v30  ;;  %v2542_v63 = vsel %vm2457_vm14, %v2541_v10, %v9510_v31 }
 0x128   : > { %v4475_v20 = vsel %vm4461_vm4, %v4472_v52, %v4474_v19  ;;  %v9593_v29 = vmul.u32.u64.low %v9540_v45, %v4471_v42  ;;  %v9594_v51 = vmul.u32.u64.high %v9540_v45, %v4471_v42, %v9593_v29  ;;  %v892_v14 = vsel %vm890_vm13, %v891_v23, %v8703_v30 }
 0x129   : > { %v2534_v53 = vor.u32 4788187, %v2533_v22  ;;  %v9604_v33 = vrot.slane %v9534_v6, %v9077_v21  ;;  %v889_v34 = vsel %vm887_vm15, %v8701_v61, %v888_v49  ;;  %v6086_v26 = vadd.s32 1, %v8396_v35 }
 0x12a   : > { %v9609_v37 = vmul.u32.u64.low %v9540_v45, %v4475_v20  ;;  %v9610_v17 = vmul.u32.u64.high %v9540_v45, %v4475_v20, %v9609_v37  ;;  %v893_v32 = vsel %vm886_vm2, %v889_v34, %v892_v14  ;;  %v2537_v55 = vcvt.s32.f32 %v2530_v47 }
 0x12b   : > { %v2535_v25 = vand.u32 2147483647, %v2534_v53  ;;  %v4467_v31 = vsel %vm4461_vm4, %v4464_v44, %v4466_v38  ;;  %v894_v6 = vsel %vm883_vm5, nan, %v893_v32  ;;  %v2544_v10 = vsel %vm9569_vm6, 0, %v2542_v63 }
 0x12c   : > { %v4486_v7 = vadd.s32 1, %v9594_v51  ;;  %vm6087_vm9 = vcmp.gt.s32.totalorder %v6086_v26, 0  ;;  %7505 = vst.msk [vmem:[#allocation2] sm:$0xf] %vm7504_vm0, %v894_v6  ;;  %v4483_v46 = vmul.u32 %v9540_v45, %v4467_v31  ;;  %vm4485_vm10 = vc.u32 %v9610_v17, %v9593_v29 }
 0x12d   : > { %v2538_v8 = vmul.f32 %v2537_v55, %v2535_v25  ;;  %v6088_v35 = vsel %vm6087_vm9, %v6086_v26, 0  ;;  %v2548_v18 = vadd.s32 3, %v2544_v10  ;;  %v6084_v59 = vor.u32 8388608, %v9547_v28 }
 0x12e   : > { %v6090_v27 = vand.u32 31, %v6088_v35  ;;  %v4487_v24 = vsel %vm4485_vm10, %v4486_v7, %v9594_v51  ;;  %v9627_v57 = vshrl.u32 %v6088_v35, 5  ;;  %v4225_v44 = vand.u32 2139095040, %v9604_v33 }
 0x12f   : > { %v2539_v39 = vxor.u32 2147483648, %v2538_v8  ;;  %v4488_v16 = vadd.s32 %v4487_v24, %v4483_v46  ;;  %v2549_v63 = vand.u32 3, %v2548_v18  ;;  %v6124_v25 = vshll.u32 %v6084_v59, 8 }
 0x130   : > { %v6091_v36 = vsub.s32 32, %v6090_v27  ;;  %v6093_v45 = vshll.u32 %v8889_v54, %v6090_v27  ;;  %v6096_v61 = vshll.u32 %v8890_v56, %v6090_v27  ;;  %v6099_v38 = vshll.u32 %v8891_v58, %v6090_v27 }
 0x131   : > { %v2540_v9 = vsel %vm2457_vm14, %v2539_v39, %v2538_v8  ;;  %v4489_v28 = vadd.s32 536870912, %v4488_v16  ;;  %v6102_v40 = vshll.u32 %v8892_v60, %v6090_v27  ;;  %v6105_v14 = vshll.u32 %v8893_v62, %v6090_v27 }
 0x132   : > { %v2543_v42 = vsel %vm9569_vm6, %v9220_v48, %v2540_v9  ;;  %v6094_v52 = vshrl.u32 %v8890_v56, %v6091_v36  ;;  %v6097_v30 = vshrl.u32 %v8891_v58, %v6091_v36  ;;  %v6100_v23 = vshrl.u32 %v8892_v60, %v6091_v36 }
 0x133   : > { %8704 = vcosq.f32 %v2543_v42  ;;  %v6103_v47 = vshrl.u32 %v8893_v62, %v6091_v36  ;;  %v9643_v22 = vshrl.u32 %v4489_v28, 30  ;;  %v6106_v49 = vshrl.u32 %v8894_v11, %v6091_v36 }
 0x134   : > { %8706 = vsinq.f32 %v2543_v42  ;;  %v6095_v19 = vor.u32 %v6094_v52, %v6093_v45  ;;  %v6098_v41 = vor.u32 %v6097_v30, %v6096_v61  ;;  %v6101_v20 = vor.u32 %v6100_v23, %v6099_v38 }
 0x135   : > { %v6104_v51 = vor.u32 %v6103_v47, %v6102_v40  ;;  %v4491_v53 = vshll.u32 %v9643_v22, 30  ;;  %vm6108_vm11 = vcmp.lt.s32.totalorder %v9627_v57, 1  ;;  %v6107_v34 = vor.u32 %v6106_v49, %v6105_v14 }
 0x136   : > { %vm6111_vm12 = vcmp.lt.s32.totalorder %v9627_v57, 4  ;;  %v6116_v37 = vsel %vm6108_vm11, %v6095_v19, %v6098_v41  ;;  %vm6110_vm13 = vcmp.lt.s32.totalorder %v9627_v57, 3  ;;  %vm6109_vm14 = vcmp.lt.s32.totalorder %v9627_v57, 2 }
 0x137   : > { %v9652_v26 = vsub.s32 %v4488_v16, %v4491_v53  ;;  %v6117_v32 = vsel %vm6111_vm12, %v6104_v51, 920167782  ;;  %v6113_v55 = vsel %vm6111_vm12, %v6101_v20, 2102212464  ;;  %v4226_v6 = vshrl.u32 %v4225_v44, 23 }
 0x138   : > { %v6118_v31 = vsel %vm6110_vm13, %v6101_v20, %v6117_v32  ;;  %vm2547_vm15 = vweird.f32 %v9220_v48  ;;  %v6092_v7 = vshrl.u32 %v8889_v54, %v6091_v36  ;;  %v584_v35 = vmul.f32 %v9520_v4, %v9190_v13 }
 0x139   : > { %v4494_v10 = vsub.s32 0, %v9652_v26  ;;  %v6119_v8 = vsel %vm6109_vm14, %v6116_v37, %v6118_v31  ;;  %vm4430_vm1 = vcmp.lt.s32.totalorder %v9486_v5, 0  ;;  %v6120_v46 = vsel %vm6108_vm11, %v6098_v41, %v6101_v20 }
 0x13a   : > { %v6121_v27 = vsel %vm6111_vm12, %v6107_v34, 1326507024  ;;  %v9674_v39 = vmul.u32.u64.low %v6124_v25, %v6119_v8  ;;  %v9675_v18 = vmul.u32.u64.high %v6124_v25, %v6119_v8, %v9674_v39  ;;  %vm2551_vm2 = vcmp.eq.s32.totalorder %v2549_v63, 0 }
 0x13b   : > { %v8333_v24 = vmin.u32 %v4494_v10, %v9652_v26  ;;  %v6112_v59 = vsel %vm6108_vm11, %v6092_v7, %v6095_v19  ;;  %v6114_v4 = vsel %vm6110_vm13, %v6098_v41, %v6113_v55  ;;  %vm2554_vm3 = vcmp.eq.s32.totalorder %v2549_v63, 2 }
 0x13c   : > { %v6122_v36 = vsel %vm6110_vm13, %v6104_v51, %v6121_v27  ;;  %v4222_v44 = vand.u32 2147483647, %v9604_v33  ;;  %v8324_v9 = vadd.s32 4294967169, %v4226_v6  ;;  %v4514_v42 = vsub.s32 4, %v9643_v22 }
 0x13d   : > { %v8705_v16 = vpop.eup %8704  ;;  %v4496_v38 = vclz %v8333_v24  ;;  %v6123_v28 = vsel %vm6109_vm14, %v6120_v46, %v6122_v36  ;;  %v6115_v40 = vsel %vm6109_vm14, %v6112_v59, %v6114_v4  ;;  %v6134_v49 = vadd.s32 1, %v9675_v18 }
 0x13e   : > { %v8707_v45 = vpop.eup %8706  ;;  %v2555_v61 = vxor.u32 2147483648, %v8705_v16  ;;  %v9691_v30 = vmul.u32.u64.low %v6124_v25, %v6123_v28  ;;  %v9692_v23 = vmul.u32.u64.high %v6124_v25, %v6123_v28, %v9691_v30  ;;  %v4232_v41 = vadd.s32 1, %v8324_v9 }
 0x13f   : > { %v2552_v52 = vxor.u32 2147483648, %v8707_v45  ;;  %v8334_v19 = vadd.s32 4294967294, %v4496_v38  ;;  %vm2550_vm4 = vcmp.lt.s32.totalorder %v2549_v63, 2  ;;  %v9697_v51 = vrot.slane %v584_v35, %v9077_v21 }
 0x140   : > { %v2556_v47 = vsel %vm2554_vm3, %v2555_v61, %v8707_v45  ;;  %v4229_v14 = vand.u32 8388607, %v4222_v44  ;;  %v4484_v57 = vadd.s32 %v9593_v29, %v9610_v17  ;;  %vm4233_vm6 = vcmp.gt.s32.totalorder %v4232_v41, 0 }
 0x141   : > { %v2553_v20 = vsel %vm2551_vm2, %v8705_v16, %v2552_v52  ;;  %vm8335_vm5 = vcmp.lt.s32.totalorder %v8334_v19, 0  ;;  %v6131_v32 = vmul.u32 %v6124_v25, %v6115_v40  ;;  %vm6133_vm7 = vc.u32 %v9692_v23, %v9674_v39 }
 0x142   : > { %v2557_v53 = vsel %vm2550_vm4, %v2553_v20, %v2556_v47  ;;  %v4499_v37 = vsel %vm8335_vm5, 0, %v8334_v19  ;;  %v9711_v31 = vsel %vm4430_vm1, %v4514_v42, %v9643_v22  ;;  %v6135_v29 = vsel %vm6133_vm7, %v6134_v49, %v9675_v18 }
 0x143   : > { %v2558_v34 = vsel %vm2547_vm15, nan, %v2557_v53  ;;  %v4500_v63 = vsub.s32 32, %v4499_v37  ;;  %v4504_v55 = vsub.s32 4294967266, %v4499_v37  ;;  %v6136_v17 = vadd.s32 %v6135_v29, %v6131_v32 }
 0x144   : > { %7521 = vst.msk [vmem:[#allocation2 + $0x64] sm:$0xf] %vm7504_vm0, %v2558_v34  ;;  %v4230_v6 = vor.u32 8388608, %v4229_v14  ;;  %v4234_v48 = vsel %vm4233_vm6, %v4232_v41, 0  ;;  %v5873_v10 = vand.u32 2139095040, %v9697_v51  ;;  %v4501_v25 = vshll.u32 %v9652_v26, %v4499_v37 }
 0x145   : > { %v4502_v7 = vshrl.u32 %v4484_v57, %v4500_v63  ;;  %v4505_v8 = vadd.s32 127, %v4504_v55  ;;  %v4236_v35 = vand.u32 31, %v4234_v48  ;;  %v6137_v46 = vadd.s32 536870912, %v6136_v17 }
 0x146   : > { %vm9718_vm8 = vcmp.le.f32.partialorder %v4428_v15, 0.7853982  ;;  %v5870_v26 = vand.u32 2147483647, %v9697_v51  ;;  %v9729_v9 = vshll.u32 %v4230_v6, 8  ;;  %v5874_v15 = vshrl.u32 %v5873_v10, 23 }
 0x147   : > { %v4503_v22 = vor.u32 %v4502_v7, %v4501_v25  ;;  %v4506_v24 = vshll.u32 %v4505_v8, 23  ;;  %v4237_v18 = vsub.s32 32, %v4236_v35  ;;  %v4517_v59 = vsel %vm9718_vm8, 0, %v9711_v31 }
 0x148   : > { %v9725_v4 = vshrl.u32 %v6137_v46, 30  ;;  %v4239_v61 = vshll.u32 %v8889_v54, %v4236_v35  ;;  %v4242_v40 = vshll.u32 %v8890_v56, %v4236_v35  ;;  %v4235_v19 = vshrl.u32 %v4234_v48, 5 }
 0x149   : > { %v4507_v16 = vor.u32 4788187, %v4506_v24  ;;  %v4240_v36 = vshrl.u32 %v8890_v56, %v4237_v18  ;;  %v4243_v38 = vshrl.u32 %v8891_v58, %v4237_v18  ;;  %v4246_v42 = vshrl.u32 %v8892_v60, %v4237_v18 }
 0x14a   : > { %v6139_v45 = vshll.u32 %v9725_v4, 30  ;;  %v4510_v52 = vcvt.s32.f32 %v4503_v22  ;;  %v4249_v30 = vshrl.u32 %v8893_v62, %v4237_v18  ;;  %v4245_v49 = vshll.u32 %v8891_v58, %v4236_v35 }
 0x14b   : > { %v4508_v28 = vand.u32 2147483647, %v4507_v16  ;;  %v4248_v41 = vshll.u32 %v8892_v60, %v4236_v35  ;;  %v4241_v14 = vor.u32 %v4240_v36, %v4239_v61  ;;  %v4244_v53 = vor.u32 %v4243_v38, %v4242_v40 }
 0x14c   : > { %v9737_v47 = vsub.s32 %v6136_v17, %v6139_v45  ;;  %v4252_v57 = vshrl.u32 %v8894_v11, %v4237_v18  ;;  %v4247_v37 = vor.u32 %v4246_v42, %v4245_v49  ;;  %v4251_v63 = vshll.u32 %v8893_v62, %v4236_v35 }
 0x14d   : > { %v4511_v20 = vmul.f32 %v4510_v52, %v4508_v28  ;;  %v4250_v32 = vor.u32 %v4249_v30, %v4248_v41  ;;  %v6162_v31 = vsub.s32 4, %v9725_v4  ;;  %v4238_v29 = vshrl.u32 %v8889_v54, %v4237_v18 }
 0x14e   : > { %v6142_v34 = vsub.s32 0, %v9737_v47  ;;  %v8388_v17 = vadd.s32 4294967169, %v5874_v15  ;;  %vm6078_vm9 = vcmp.lt.s32.totalorder %v9508_v43, 0  ;;  %v4253_v48 = vor.u32 %v4252_v57, %v4251_v63 }
 0x14f   : > { %v4512_v55 = vxor.u32 2147483648, %v4511_v20  ;;  %vm4254_vm10 = vcmp.lt.s32.totalorder %v4235_v19, 1  ;;  %vm4255_vm11 = vcmp.lt.s32.totalorder %v4235_v19, 2  ;;  %vm4256_vm12 = vcmp.lt.s32.totalorder %v4235_v19, 3 }
 0x150   : > { %v8397_v6 = vmin.u32 %v6142_v34, %v9737_v47  ;;  %vm4257_vm13 = vcmp.lt.s32.totalorder %v4235_v19, 4  ;;  %v4262_v25 = vsel %vm4254_vm10, %v4241_v14, %v4244_v53  ;;  %v4258_v22 = vsel %vm4254_vm10, %v4238_v29, %v4241_v14 }
 0x151   : > { %v4513_v10 = vsel %vm4430_vm1, %v4512_v55, %v4511_v20  ;;  %v4259_v35 = vsel %vm4257_vm13, %v4247_v37, 2102212464  ;;  %v4263_v46 = vsel %vm4257_vm13, %v4250_v32, 920167782  ;;  %v4266_v18 = vsel %vm4254_vm10, %v4244_v53, %v4247_v37 }
 0x152   : > { %v4516_v7 = vsel %vm9718_vm8, %v9486_v5, %v4513_v10  ;;  %v6144_v8 = vclz %v8397_v6  ;;  %v4264_v24 = vsel %vm4256_vm12, %v4247_v37, %v4263_v46  ;;  %vm9756_vm14 = vcmp.le.f32.partialorder %v6076_v50, 0.7853982 }
 0x153   : > { %8708 = vcosq.f32 %v4516_v7  ;;  %v4265_v15 = vsel %vm4255_vm11, %v4262_v25, %v4264_v24  ;;  %v4267_v27 = vsel %vm4257_vm13, %v4253_v48, 1326507024  ;;  %v4260_v45 = vsel %vm4256_vm12, %v4244_v53, %v4259_v35 }
 0x154   : > { %8710 = vsinq.f32 %v4516_v7  ;;  %v8398_v36 = vadd.s32 4294967294, %v6144_v8  ;;  %v4268_v61 = vsel %vm4256_vm12, %v4250_v32, %v4267_v27  ;;  %v4521_v28 = vand.u32 3, %v4517_v59 }
 0x155   : > { %v9764_v38 = vmul.u32.u64.low %v9729_v9, %v4265_v15  ;;  %v9765_v42 = vmul.u32.u64.high %v9729_v9, %v4265_v15, %v9764_v38  ;;  %v4269_v50 = vsel %vm4255_vm11, %v4266_v18, %v4268_v61  ;;  %v5880_v52 = vadd.s32 1, %v8388_v17 }
 0x156   : > { %vm8399_vm15 = vcmp.lt.s32.totalorder %v8398_v36, 0  ;;  %v6132_v40 = vadd.s32 %v9674_v39, %v9692_v23  ;;  %v9772_v49 = vmul.u32.u64.low %v9729_v9, %v4269_v50  ;;  %v9773_v41 = vmul.u32.u64.high %v9729_v9, %v4269_v50, %v9772_v49 }
 0x157   : > { %v6147_v30 = vsel %vm8399_vm15, 0, %v8398_v36  ;;  %v4261_v53 = vsel %vm4255_vm11, %v4258_v22, %v4260_v45  ;;  %vm5881_vm1 = vcmp.gt.s32.totalorder %v5880_v52, 0  ;;  %v6163_v59 = vsel %vm6078_vm9, %v6162_v31, %v9725_v4  ;;  %v471_v4 = vpop.permute.xlu1 %470 }
 0x158   : > { %v6148_v20 = vsub.s32 32, %v6147_v30  ;;  %v6152_v14 = vsub.s32 4294967266, %v6147_v30  ;;  %v4280_v57 = vadd.s32 1, %v9765_v42  ;;  %v5877_v34 = vand.u32 8388607, %v5870_v26 }
 0x159   : > { %v5882_v39 = vsel %vm5881_vm1, %v5880_v52, 0  ;;  %vm4520_vm2 = vweird.f32 %v9486_v5  ;;  %v6149_v23 = vshll.u32 %v9737_v47, %v6147_v30  ;;  %vm4522_vm3 = vcmp.lt.s32.totalorder %v4521_v28, 2 }
 0x15a   : > { %v6150_v37 = vshrl.u32 %v6132_v40, %v6148_v20  ;;  %v6153_v32 = vadd.s32 127, %v6152_v14  ;;  %v5884_v63 = vand.u32 31, %v5882_v39  ;;  %vm4523_vm4 = vcmp.eq.s32.totalorder %v4521_v28, 0 }
 0x15b   : > { %v4277_v19 = vmul.u32 %v9729_v9, %v4261_v53  ;;  %vm4279_vm5 = vc.u32 %v9773_v41, %v9764_v38  ;;  %vm4526_vm6 = vcmp.eq.s32.totalorder %v4521_v28, 2  ;;  %v6165_v47 = vsel %vm9756_vm14, 0, %v6163_v59 }
 0x15c   : > { %v6151_v55 = vor.u32 %v6150_v37, %v6149_v23  ;;  %v6154_v31 = vshll.u32 %v6153_v32, 23  ;;  %v4281_v29 = vsel %vm4279_vm5, %v4280_v57, %v9765_v42  ;;  %v5885_v17 = vsub.s32 32, %v5884_v63 }
 0x15d   : > { %v8709_v6 = vpop.eup %8708  ;;  %v4282_v48 = vadd.s32 %v4281_v29, %v4277_v19  ;;  %v5878_v10 = vor.u32 8388608, %v5877_v34  ;;  %v9790_v9 = vshrl.u32 %v5882_v39, 5  ;;  %v9793_v35 = vrot.slane %v471_v4, %v9077_v21 }
 0x15e   : > { %v8711_v25 = vpop.eup %8710  ;;  %v4527_v7 = vxor.u32 2147483648, %v8709_v6  ;;  %v6155_v8 = vor.u32 4788187, %v6154_v31  ;;  %v5887_v24 = vshll.u32 %v8889_v54, %v5884_v63  ;;  %v5888_v18 = vshrl.u32 %v8890_v56, %v5885_v17 }
 0x15f   : > { %v4524_v46 = vxor.u32 2147483648, %v8711_v25  ;;  %v4283_v22 = vadd.s32 536870912, %v4282_v48  ;;  %v6158_v27 = vcvt.s32.f32 %v6151_v55  ;;  %v5891_v45 = vshrl.u32 %v8891_v58, %v5885_v17 }
 0x160   : > { %v4528_v36 = vsel %vm4526_vm6, %v4527_v7, %v8711_v25  ;;  %v6156_v15 = vand.u32 2147483647, %v6155_v8  ;;  %v5890_v50 = vshll.u32 %v8890_v56, %v5884_v63  ;;  %v5894_v52 = vshrl.u32 %v8892_v60, %v5885_v17 }
 0x161   : > { %v4525_v61 = vsel %vm4523_vm4, %v8709_v6, %v4524_v46  ;;  %v9799_v42 = vshrl.u32 %v4283_v22, 30  ;;  %v5896_v49 = vshll.u32 %v8892_v60, %v5884_v63  ;;  %v5897_v20 = vshrl.u32 %v8893_v62, %v5885_v17 }
 0x162   : > { %v4529_v40 = vsel %vm4522_vm3, %v4525_v61, %v4528_v36  ;;  %v6159_v30 = vmul.f32 %v6158_v27, %v6156_v15  ;;  %v5889_v59 = vor.u32 %v5888_v18, %v5887_v24  ;;  %v5893_v57 = vshll.u32 %v8891_v58, %v5884_v63 }
 0x163   : > { %v4530_v14 = vsel %vm4520_vm2, nan, %v4529_v40  ;;  %v4285_v53 = vshll.u32 %v9799_v42, 30  ;;  %v5892_v39 = vor.u32 %v5891_v45, %v5890_v50  ;;  %v5898_v23 = vor.u32 %v5897_v20, %v5896_v49 }
 0x164   : > { %v6160_v34 = vxor.u32 2147483648, %v6159_v30  ;;  %7508 = vst.msk [vmem:[#allocation2 + $0xc] sm:$0xf] %vm7504_vm0, %v4530_v14  ;;  %v5900_v28 = vshrl.u32 %v8894_v11, %v5885_v17  ;;  %v5895_v32 = vor.u32 %v5894_v52, %v5893_v57  ;;  %v5899_v19 = vshll.u32 %v8893_v62, %v5884_v63 }
 0x165   : > { %v9812_v37 = vsub.s32 %v4282_v48, %v4285_v53  ;;  %v9815_v4 = vshll.u32 %v5878_v10, 8  ;;  %v9819_v55 = vand.u32 3, %v6165_v47  ;;  %vm5902_vm7 = vcmp.lt.s32.totalorder %v9790_v9, 1 }
 0x166   : > { %v6161_v5 = vsel %vm6078_vm9, %v6160_v34, %v6159_v30  ;;  %v572_v31 = vmul.f32 %v9793_v35, %v9188_v12  ;;  %v5901_v48 = vor.u32 %v5900_v28, %v5899_v19  ;;  %vm5905_vm8 = vcmp.lt.s32.totalorder %v9790_v9, 4 }
 0x167   : > { %v6164_v29 = vsel %vm9756_vm14, %v9508_v43, %v6161_v5  ;;  %v4288_v6 = vsub.s32 0, %v9812_v37  ;;  %v5886_v63 = vshrl.u32 %v8889_v54, %v5885_v17  ;;  %v5910_v47 = vsel %vm5902_vm7, %v5889_v59, %v5892_v39 }
 0x168   : > { %8712 = vcosq.f32 %v6164_v29  ;;  %v5911_v10 = vsel %vm5905_vm8, %v5898_v23, 920167782  ;;  %vm5904_vm9 = vcmp.lt.s32.totalorder %v9790_v9, 3  ;;  %v5907_v16 = vsel %vm5905_vm8, %v5895_v32, 2102212464 }
 0x169   : > { %8714 = vsinq.f32 %v6164_v29  ;;  %v8325_v25 = vmin.u32 %v4288_v6, %v9812_v37  ;;  %vm5903_vm10 = vcmp.lt.s32.totalorder %v9790_v9, 2  ;;  %v5912_v7 = vsel %vm5904_vm9, %v5895_v32, %v5911_v10 }
 0x16a   : > { %v5914_v17 = vsel %vm5902_vm7, %v5892_v39, %v5895_v32  ;;  %v9842_v8 = vrot.slane %v572_v31, %v9077_v21  ;;  %v5906_v22 = vsel %vm5902_vm7, %v5886_v63, %v5889_v59  ;;  %v5913_v24 = vsel %vm5903_vm10, %v5910_v47, %v5912_v7 }
 0x16b   : > { %v4290_v46 = vclz %v8325_v25  ;;  %v5915_v18 = vsel %vm5905_vm8, %v5901_v48, 1326507024  ;;  %v5908_v36 = vsel %vm5904_vm9, %v5892_v39, %v5907_v16  ;;  %vm4224_vm11 = vcmp.lt.s32.totalorder %v9604_v33, 0 }
 0x16c   : > { %v5916_v15 = vsel %vm5904_vm9, %v5898_v23, %v5915_v18  ;;  %v9851_v27 = vmul.u32.u64.low %v9815_v4, %v5913_v24  ;;  %v9852_v45 = vmul.u32.u64.high %v9815_v4, %v5913_v24, %v9851_v27  ;;  %v4308_v50 = vsub.s32 4, %v9799_v42  ;;  %v462_v18 = vpop.permute.xlu0 %461 }
 0x16d   : > { %v8326_v61 = vadd.s32 4294967294, %v4290_v46  ;;  %v5917_v52 = vsel %vm5903_vm10, %v5914_v17, %v5916_v15  ;;  %vm6170_vm12 = vcmp.lt.s32.totalorder %v9819_v55, 2  ;;  %vm9862_vm13 = vcmp.le.f32.partialorder %v4222_v44, 0.7853982 }
 0x16e   : > { %v9867_v30 = vmul.u32.u64.low %v9815_v4, %v5917_v52  ;;  %v9868_v49 = vmul.u32.u64.high %v9815_v4, %v5917_v52, %v9867_v30  ;;  %v4637_v20 = vand.u32 2139095040, %v9842_v8  ;;  %vm6168_vm14 = vweird.f32 %v9508_v43 }
 0x16f   : > { %vm6174_vm15 = vcmp.eq.s32.totalorder %v9819_v55, 2  ;;  %vm8327_vm1 = vcmp.lt.s32.totalorder %v8326_v61, 0  ;;  %v5909_v14 = vsel %vm5903_vm10, %v5906_v22, %v5908_v36  ;;  %v588_v44 = vmul.f32 %v9793_v35, %v9190_v13 }
 0x170   : > { %v4293_v53 = vsel %vm8327_vm1, 0, %v8326_v61  ;;  %v5928_v59 = vadd.s32 1, %v9852_v45  ;;  %v4634_v57 = vand.u32 2147483647, %v9842_v8  ;;  %v4638_v34 = vshrl.u32 %v4637_v20, 23 }
 0x171   : > { %v4278_v39 = vadd.s32 %v9764_v38, %v9773_v41  ;;  %v4294_v23 = vsub.s32 32, %v4293_v53  ;;  %v4298_v28 = vsub.s32 4294967266, %v4293_v53  ;;  %v4309_v32 = vsel %vm4224_vm11, %v4308_v50, %v9799_v42 }
 0x172   : > { %v8713_v9 = vpop.eup %8712  ;;  %v4295_v19 = vshll.u32 %v9812_v37, %v4293_v53  ;;  %v5925_v35 = vmul.u32 %v9815_v4, %v5909_v14  ;;  %vm5927_vm2 = vc.u32 %v9868_v49, %v9851_v27  ;;  %v8340_v5 = vadd.s32 4294967169, %v4638_v34 }
 0x173   : > { %v8715_v31 = vpop.eup %8714  ;;  %v6175_v29 = vxor.u32 2147483648, %v8713_v9  ;;  %v4296_v6 = vshrl.u32 %v4278_v39, %v4294_v23  ;;  %v4299_v48 = vadd.s32 127, %v4298_v28  ;;  %v5929_v38 = vsel %vm5927_vm2, %v5928_v59, %v9852_v45 }
 0x174   : > { %v6172_v41 = vxor.u32 2147483648, %v8715_v31  ;;  %v5930_v63 = vadd.s32 %v5929_v38, %v5925_v35  ;;  %v4641_v42 = vand.u32 8388607, %v4634_v57  ;;  %v4644_v47 = vadd.s32 1, %v8340_v5 }
 0x175   : > { %vm6171_vm3 = vcmp.eq.s32.totalorder %v9819_v55, 0  ;;  %v6176_v37 = vsel %vm6174_vm15, %v6175_v29, %v8715_v31  ;;  %v4297_v4 = vor.u32 %v4296_v6, %v4295_v19  ;;  %v4300_v10 = vshll.u32 %v4299_v48, 23 }
 0x176   : > { %v6173_v25 = vsel %vm6171_vm3, %v8713_v9, %v6172_v41  ;;  %v5931_v16 = vadd.s32 536870912, %v5930_v63  ;;  %v9895_v7 = vrot.slane %v588_v44, %v9077_v21  ;;  %vm4645_vm4 = vcmp.gt.s32.totalorder %v4644_v47, 0 }
 0x177   : > { %v6177_v17 = vsel %vm6170_vm12, %v6173_v25, %v6176_v37  ;;  %v4301_v46 = vor.u32 4788187, %v4300_v10  ;;  %v4311_v22 = vsel %vm9862_vm13, 0, %v4309_v32  ;;  %v4646_v24 = vsel %vm4645_vm4, %v4644_v47, 0 }
 0x178   : > { %v6178_v36 = vsel %vm6168_vm14, nan, %v6177_v17  ;;  %v9903_v15 = vshrl.u32 %v5931_v16, 30  ;;  %v4642_v45 = vor.u32 8388608, %v4641_v42  ;;  %v4648_v61 = vand.u32 31, %v4646_v24 }
 0x179   : > { %7524 = vst.msk [vmem:[#allocation2 + $0x70] sm:$0xf] %vm7504_vm0, %v6178_v36  ;;  %v4302_v50 = vand.u32 2147483647, %v4301_v46  ;;  %v4304_v52 = vcvt.s32.f32 %v4297_v4  ;;  %v9908_v20 = vrot.slane %v462_v18, %v9077_v21  ;;  %v9910_v44 = vand.u32 3, %v4311_v22 }
 0x17a   : > { %v5933_v55 = vshll.u32 %v9903_v15, 30  ;;  %v4649_v30 = vsub.s32 32, %v4648_v61  ;;  %v6282_v43 = vand.u32 2147483647, %v9895_v7  ;;  %v6285_v53 = vand.u32 2139095040, %v9895_v7 }
 0x17b   : > { %v4305_v14 = vmul.f32 %v4304_v52, %v4302_v50  ;;  %v9916_v34 = vshrl.u32 %v4646_v24, 5  ;;  %v9919_v23 = vshll.u32 %v4642_v45, 8  ;;  %v4651_v32 = vshll.u32 %v8889_v54, %v4648_v61 }
 0x17c   : > { %v9914_v59 = vsub.s32 %v5930_v63, %v5933_v55  ;;  %v4652_v39 = vshrl.u32 %v8890_v56, %v4649_v30  ;;  %v4655_v9 = vshrl.u32 %v8891_v58, %v4649_v30  ;;  %v4658_v19 = vshrl.u32 %v8892_v60, %v4649_v30 }
 0x17d   : > { %v4306_v28 = vxor.u32 2147483648, %v4305_v14  ;;  %v4654_v5 = vshll.u32 %v8890_v56, %v4648_v61  ;;  %v4657_v31 = vshll.u32 %v8891_v58, %v4648_v61  ;;  %v4661_v29 = vshrl.u32 %v8893_v62, %v4649_v30 }
 0x17e   : > { %v5936_v35 = vsub.s32 0, %v9914_v59  ;;  %v4653_v48 = vor.u32 %v4652_v39, %v4651_v32  ;;  %v4660_v38 = vshll.u32 %v8892_v60, %v4648_v61  ;;  %v6286_v41 = vshrl.u32 %v6285_v53, 23 }
 0x17f   : > { %v4307_v6 = vsel %vm4224_vm11, %v4306_v28, %v4305_v14  ;;  %v4656_v47 = vor.u32 %v4655_v9, %v4654_v5  ;;  %v4659_v37 = vor.u32 %v4658_v19, %v4657_v31  ;;  %v4663_v10 = vshll.u32 %v8893_v62, %v4648_v61 }
 0x180   : > { %v4310_v63 = vsel %vm9862_vm13, %v9604_v33, %v4307_v6  ;;  %v8389_v42 = vmin.u32 %v5936_v35, %v9914_v59  ;;  %v4662_v4 = vor.u32 %v4661_v29, %v4660_v38  ;;  %v4664_v25 = vshrl.u32 %v8894_v11, %v4649_v30 }
 0x181   : > { %8716 = vcosq.f32 %v4310_v63  ;;  %v4650_v17 = vshrl.u32 %v8889_v54, %v4649_v30  ;;  %vm4666_vm5 = vcmp.lt.s32.totalorder %v9916_v34, 1  ;;  %vm5872_vm6 = vcmp.lt.s32.totalorder %v9697_v51, 0 }
 0x182   : > { %8718 = vsinq.f32 %v4310_v63  ;;  %v5938_v16 = vclz %v8389_v42  ;;  %v4665_v40 = vor.u32 %v4664_v25, %v4663_v10  ;;  %vm4667_vm7 = vcmp.lt.s32.totalorder %v9916_v34, 2 }
 0x183   : > { %vm4668_vm8 = vcmp.lt.s32.totalorder %v9916_v34, 3  ;;  %vm4669_vm9 = vcmp.lt.s32.totalorder %v9916_v34, 4  ;;  %v4674_v24 = vsel %vm4666_vm5, %v4653_v48, %v4656_v47  ;;  %v4670_v36 = vsel %vm4666_vm5, %v4650_v17, %v4653_v48 }
 0x184   : > { %v8390_v46 = vadd.s32 4294967294, %v5938_v16  ;;  %v4671_v22 = vsel %vm4669_vm9, %v4659_v37, 2102212464  ;;  %v4675_v18 = vsel %vm4669_vm9, %v4662_v4, 920167782  ;;  %v4678_v61 = vsel %vm4666_vm5, %v4656_v47, %v4659_v37 }
 0x185   : > { %v4676_v45 = vsel %vm4668_vm8, %v4659_v37, %v4675_v18  ;;  %v4679_v50 = vsel %vm4669_vm9, %v4665_v40, 1326507024  ;;  %vm9945_vm10 = vcmp.le.f32.partialorder %v5870_v26, 0.7853982  ;;  %v4672_v55 = vsel %vm4668_vm8, %v4656_v47, %v4671_v22 }
 0x186   : > { %vm8391_vm11 = vcmp.lt.s32.totalorder %v8390_v46, 0  ;;  %v4677_v30 = vsel %vm4667_vm7, %v4674_v24, %v4676_v45  ;;  %v4680_v14 = vsel %vm4668_vm8, %v4662_v4, %v4679_v50  ;;  %vm4316_vm12 = vcmp.lt.s32.totalorder %v9910_v44, 2 }
 0x187   : > { %v5941_v53 = vsel %vm8391_vm11, 0, %v8390_v46  ;;  %v4681_v39 = vsel %vm4667_vm7, %v4678_v61, %v4680_v14  ;;  %v9955_v28 = vmul.u32.u64.low %v9919_v23, %v4677_v30  ;;  %v9956_v32 = vmul.u32.u64.high %v9919_v23, %v4677_v30, %v9955_v28 }
 0x188   : > { %vm4314_vm13 = vweird.f32 %v9604_v33  ;;  %v5926_v26 = vadd.s32 %v9851_v27, %v9868_v49  ;;  %v5942_v9 = vsub.s32 32, %v5941_v53  ;;  %v5946_v19 = vsub.s32 4294967266, %v5941_v53 }
 0x189   : > { %v5956_v35 = vsub.s32 4, %v9903_v15  ;;  %v9964_v5 = vmul.u32.u64.low %v9919_v23, %v4681_v39  ;;  %v9965_v31 = vmul.u32.u64.high %v9919_v23, %v4681_v39, %v9964_v5  ;;  %v8404_v29 = vadd.s32 4294967169, %v6286_v41 }
 0x18a   : > { %v6289_v6 = vand.u32 8388607, %v6282_v43  ;;  %v5943_v48 = vshll.u32 %v9914_v59, %v5941_v53  ;;  %v5944_v38 = vshrl.u32 %v5926_v26, %v5942_v9  ;;  %v5947_v63 = vadd.s32 127, %v5946_v19 }
 0x18b   : > { %v4673_v42 = vsel %vm4667_vm7, %v4670_v36, %v4672_v55  ;;  %v8717_v27 = vpop.eup %8716  ;;  %vm4317_vm14 = vcmp.eq.s32.totalorder %v9910_v44, 0  ;;  %vm4320_vm15 = vcmp.eq.s32.totalorder %v9910_v44, 2  ;;  %v4692_v49 = vadd.s32 1, %v9956_v32 }
 0x18c   : > { %v6292_v47 = vadd.s32 1, %v8404_v29  ;;  %v8719_v37 = vpop.eup %8718  ;;  %v4321_v41 = vxor.u32 2147483648, %v8717_v27  ;;  %v5945_v4 = vor.u32 %v5944_v38, %v5943_v48  ;;  %v5948_v10 = vshll.u32 %v5947_v63, 23 }
 0x18d   : > { %v5957_v59 = vsel %vm5872_vm6, %v5956_v35, %v9903_v15  ;;  %v4318_v25 = vxor.u32 2147483648, %v8719_v37  ;;  %v4689_v34 = vmul.u32 %v9919_v23, %v4673_v42  ;;  %vm4691_vm1 = vc.u32 %v9965_v31, %v9955_v28 }
 0x18e   : > { %vm6293_vm2 = vcmp.gt.s32.totalorder %v6292_v47, 0  ;;  %v4322_v16 = vsel %vm4320_vm15, %v4321_v41, %v8719_v37  ;;  %v5949_v17 = vor.u32 4788187, %v5948_v10  ;;  %v4693_v40 = vsel %vm4691_vm1, %v4692_v49, %v9956_v32 }
 0x18f   : > { %v6290_v46 = vor.u32 8388608, %v6289_v6  ;;  %v4319_v22 = vsel %vm4317_vm14, %v8717_v27, %v4318_v25  ;;  %v5959_v24 = vsel %vm9945_vm10, 0, %v5957_v59  ;;  %v4694_v18 = vadd.s32 %v4693_v40, %v4689_v34 }
 0x190   : > { %v6294_v15 = vsel %vm6293_vm2, %v6292_v47, 0  ;;  %v4323_v23 = vsel %vm4316_vm12, %v4319_v22, %v4322_v16  ;;  %v5950_v36 = vand.u32 2147483647, %v5949_v17  ;;  %v5952_v45 = vcvt.s32.f32 %v5945_v4 }
 0x191   : > { %v6296_v61 = vand.u32 31, %v6294_v15  ;;  %v4324_v50 = vsel %vm4314_vm13, nan, %v4323_v23  ;;  %v4695_v55 = vadd.s32 536870912, %v4694_v18  ;;  %v9990_v14 = vand.u32 3, %v5959_v24 }
 0x192   : > { %v5953_v30 = vmul.f32 %v5952_v45, %v5950_v36  ;;  %7506 = vst.msk [vmem:[#allocation2 + $0x4] sm:$0xf] %vm7504_vm0, %v4324_v50  ;;  %v6295_v32 = vshrl.u32 %v6294_v15, 5  ;;  %v9995_v26 = vshll.u32 %v6290_v46, 8  ;;  %v571_v44 = vmul.f32 %v9908_v20, %v9188_v12 }
 0x193   : > { %v6297_v53 = vsub.s32 32, %v6296_v61  ;;  %v9993_v39 = vshrl.u32 %v4695_v55, 30  ;;  %v6299_v19 = vshll.u32 %v8889_v54, %v6296_v61  ;;  %v6302_v29 = vshll.u32 %v8890_v56, %v6296_v61 }
 0x194   : > { %v5954_v9 = vxor.u32 2147483648, %v5953_v30  ;;  %v6305_v63 = vshll.u32 %v8891_v58, %v6296_v61  ;;  %v6308_v42 = vshll.u32 %v8892_v60, %v6296_v61  ;;  %v6311_v41 = vshll.u32 %v8893_v62, %v6296_v61 }
 0x195   : > { %v6300_v33 = vshrl.u32 %v8890_v56, %v6297_v53  ;;  %v6303_v35 = vshrl.u32 %v8891_v58, %v6297_v53  ;;  %v4697_v5 = vshll.u32 %v9993_v39, 30  ;;  %v6306_v6 = vshrl.u32 %v8892_v60, %v6297_v53 }
 0x196   : > { %v6309_v48 = vshrl.u32 %v8893_v62, %v6297_v53  ;;  %v5955_v38 = vsel %vm5872_vm6, %v5954_v9, %v5953_v30  ;;  %v6312_v27 = vshrl.u32 %v8894_v11, %v6297_v53  ;;  %v6298_v34 = vshrl.u32 %v8889_v54, %v6297_v53 }
 0x197   : > { %v5958_v49 = vsel %vm9945_vm10, %v9697_v51, %v5955_v38  ;;  %v10014_v47 = vsub.s32 %v4694_v18, %v4697_v5  ;;  %v6301_v37 = vor.u32 %v6300_v33, %v6299_v19  ;;  %v6304_v4 = vor.u32 %v6303_v35, %v6302_v29 }
 0x198   : > { %8720 = vcosq.f32 %v5958_v49  ;;  %v6307_v10 = vor.u32 %v6306_v6, %v6305_v63  ;;  %v6310_v59 = vor.u32 %v6309_v48, %v6308_v42  ;;  %v6313_v16 = vor.u32 %v6312_v27, %v6311_v41 }
 0x199   : > { %8722 = vsinq.f32 %v5958_v49  ;;  %v4700_v25 = vsub.s32 0, %v10014_v47  ;;  %vm6314_vm3 = vcmp.lt.s32.totalorder %v6295_v32, 1  ;;  %vm6315_vm4 = vcmp.lt.s32.totalorder %v6295_v32, 2 }
 0x19a   : > { %v587_v52 = vmul.f32 %v9908_v20, %v9190_v13  ;;  %v10022_v17 = vrot.slane %v571_v44, %v9077_v21  ;;  %vm6316_vm5 = vcmp.lt.s32.totalorder %v6295_v32, 3  ;;  %vm6317_vm6 = vcmp.lt.s32.totalorder %v6295_v32, 4 }
 0x19b   : > { %v8341_v40 = vmin.u32 %v4700_v25, %v10014_v47  ;;  %v6318_v46 = vsel %vm6314_vm3, %v6298_v34, %v6301_v37  ;;  %v6319_v22 = vsel %vm6317_vm6, %v6307_v10, 2102212464  ;;  %v6322_v24 = vsel %vm6314_vm3, %v6301_v37, %v6304_v4 }
 0x19c   : > { %v6323_v18 = vsel %vm6317_vm6, %v6310_v59, 920167782  ;;  %v6326_v15 = vsel %vm6314_vm3, %v6304_v4, %v6307_v10  ;;  %vm4636_vm7 = vcmp.lt.s32.totalorder %v9842_v8, 0  ;;  %v6320_v36 = vsel %vm6316_vm5, %v6304_v4, %v6319_v22 }
 0x19d   : > { %v4702_v23 = vclz %v8341_v40  ;;  %v6324_v45 = vsel %vm6316_vm5, %v6307_v10, %v6323_v18  ;;  %v6327_v61 = vsel %vm6317_vm6, %v6313_v16, 1326507024  ;;  %vm5964_vm8 = vcmp.lt.s32.totalorder %v9990_v14, 2 }
 0x19e   : > { %vm5965_vm9 = vcmp.eq.s32.totalorder %v9990_v14, 0  ;;  %v6325_v20 = vsel %vm6315_vm4, %v6322_v24, %v6324_v45  ;;  %v6328_v50 = vsel %vm6316_vm5, %v6310_v59, %v6327_v61  ;;  %vm5962_vm10 = vweird.f32 %v9697_v51  ;;  %v489_v61 = vpop.permute.xlu1 %488 }
 0x19f   : > { %v8342_v55 = vadd.s32 4294967294, %v4702_v23  ;;  %v6329_v30 = vsel %vm6315_vm4, %v6326_v15, %v6328_v50  ;;  %v10032_v53 = vmul.u32.u64.low %v9995_v26, %v6325_v20  ;;  %v10033_v44 = vmul.u32.u64.high %v9995_v26, %v6325_v20, %v10032_v53 }
 0x1a0   : > { %v6321_v9 = vsel %vm6315_vm4, %v6318_v46, %v6320_v36  ;;  %v10037_v19 = vmul.u32.u64.low %v9995_v26, %v6329_v30  ;;  %v10038_v33 = vmul.u32.u64.high %v9995_v26, %v6329_v30, %v10037_v19  ;;  %v1210_v35 = vand.u32 2139095040, %v10022_v17 }
 0x1a1   : > { %vm5968_vm11 = vcmp.eq.s32.totalorder %v9990_v14, 2  ;;  %v4690_v5 = vadd.s32 %v9955_v28, %v9965_v31  ;;  %vm8343_vm12 = vcmp.lt.s32.totalorder %v8342_v55, 0  ;;  %v10045_v29 = vrot.slane %v587_v52, %v9077_v21 }
 0x1a2   : > { %v8721_v6 = vpop.eup %8720  ;;  %v4705_v48 = vsel %vm8343_vm12, 0, %v8342_v55  ;;  %v4720_v32 = vsub.s32 4, %v9993_v39  ;;  %v1207_v38 = vand.u32 2147483647, %v10022_v17  ;;  %v1211_v63 = vshrl.u32 %v1210_v35, 23 }
 0x1a3   : > { %v8723_v42 = vpop.eup %8722  ;;  %v5969_v27 = vxor.u32 2147483648, %v8721_v6  ;;  %v4706_v49 = vsub.s32 32, %v4705_v48  ;;  %v4710_v37 = vsub.s32 4294967266, %v4705_v48  ;;  %v6337_v41 = vmul.u32 %v9995_v26, %v6321_v9 }
 0x1a4   : > { %v5966_v4 = vxor.u32 2147483648, %v8723_v42  ;;  %v4707_v28 = vshll.u32 %v10014_v47, %v4705_v48  ;;  %vm6339_vm13 = vc.u32 %v10038_v33, %v10032_v53  ;;  %v6340_v31 = vadd.s32 1, %v10033_v44 }
 0x1a5   : > { %v5970_v10 = vsel %vm5968_vm11, %v5969_v27, %v8723_v42  ;;  %v4708_v59 = vshrl.u32 %v4690_v5, %v4706_v49  ;;  %v4711_v25 = vadd.s32 127, %v4710_v37  ;;  %v8208_v34 = vadd.s32 4294967169, %v1211_v63 }
 0x1a6   : > { %v5967_v16 = vsel %vm5965_vm9, %v8721_v6, %v5966_v4  ;;  %v4721_v26 = vsel %vm4636_vm7, %v4720_v32, %v9993_v39  ;;  %v6341_v52 = vsel %vm6339_vm13, %v6340_v31, %v10033_v44  ;;  %v2874_v47 = vand.u32 2139095040, %v10045_v29 }
 0x1a7   : > { %v5971_v40 = vsel %vm5964_vm8, %v5967_v16, %v5970_v10  ;;  %v4709_v46 = vor.u32 %v4708_v59, %v4707_v28  ;;  %v4712_v22 = vshll.u32 %v4711_v25, 23  ;;  %v6342_v24 = vadd.s32 %v6341_v52, %v6337_v41 }
 0x1a8   : > { %v5972_v18 = vsel %vm5962_vm10, nan, %v5971_v40  ;;  %v1217_v15 = vadd.s32 1, %v8208_v34  ;;  %vm10069_vm14 = vcmp.le.f32.partialorder %v4634_v57, 0.7853982  ;;  %v1214_v45 = vand.u32 8388607, %v1207_v38 }
 0x1a9   : > { %7522 = vst.msk [vmem:[#allocation2 + $0x68] sm:$0xf] %vm7504_vm0, %v5972_v18  ;;  %v4713_v23 = vor.u32 4788187, %v4712_v22  ;;  %v6343_v36 = vadd.s32 536870912, %v6342_v24  ;;  %v4723_v14 = vsel %vm10069_vm14, 0, %v4721_v26  ;;  %v4716_v50 = vcvt.s32.f32 %v4709_v46 }
 0x1aa   : > { %vm1218_vm15 = vcmp.gt.s32.totalorder %v1217_v15, 0  ;;  %v2875_v51 = vshrl.u32 %v2874_v47, 23  ;;  %v10081_v19 = vrot.slane %v489_v61, %v9077_v21  ;;  %v10083_v35 = vand.u32 3, %v4723_v14 }
 0x1ab   : > { %v4714_v20 = vand.u32 2147483647, %v4713_v23  ;;  %v10077_v55 = vshrl.u32 %v6343_v36, 30  ;;  %v1219_v30 = vsel %vm1218_vm15, %v1217_v15, 0  ;;  %v10086_v5 = vadd.s32 %v10032_v53, %v10038_v33 }
 0x1ac   : > { %v1221_v57 = vand.u32 31, %v1219_v30  ;;  %v2871_v48 = vand.u32 2147483647, %v10045_v29  ;;  %v1215_v42 = vor.u32 8388608, %v1214_v45  ;;  %v8272_v27 = vadd.s32 4294967169, %v2875_v51 }
 0x1ad   : > { %v4717_v44 = vmul.f32 %v4716_v50, %v4714_v20  ;;  %v6345_v9 = vshll.u32 %v10077_v55, 30  ;;  %v10091_v49 = vshrl.u32 %v1219_v30, 5  ;;  %vm4732_vm3 = vcmp.eq.s32.totalorder %v10083_v35, 2 }
 0x1ae   : > { %v1222_v6 = vsub.s32 32, %v1221_v57  ;;  %v1224_v37 = vshll.u32 %v8889_v54, %v1221_v57  ;;  %v1227_v28 = vshll.u32 %v8890_v56, %v1221_v57  ;;  %v1230_v59 = vshll.u32 %v8891_v58, %v1221_v57 }
 0x1af   : > { %v4718_v32 = vxor.u32 2147483648, %v4717_v44  ;;  %v10089_v63 = vsub.s32 %v6342_v24, %v6345_v9  ;;  %v1233_v25 = vshll.u32 %v8892_v60, %v1221_v57  ;;  %v10108_v46 = vshll.u32 %v1215_v42, 8 }
 0x1b0   : > { %v1225_v41 = vshrl.u32 %v8890_v56, %v1222_v6  ;;  %v1228_v4 = vshrl.u32 %v8891_v58, %v1222_v6  ;;  %v1231_v31 = vshrl.u32 %v8892_v60, %v1222_v6  ;;  %v1234_v34 = vshrl.u32 %v8893_v62, %v1222_v6 }
 0x1b1   : > { %v4719_v53 = vsel %vm4636_vm7, %v4718_v32, %v4717_v44  ;;  %v6348_v33 = vsub.s32 0, %v10089_v63  ;;  %v1236_v24 = vshll.u32 %v8893_v62, %v1221_v57  ;;  %v1237_v18 = vshrl.u32 %v8894_v11, %v1222_v6 }
 0x1b2   : > { %v4722_v10 = vsel %vm10069_vm14, %v9842_v8, %v4719_v53  ;;  %v1226_v26 = vor.u32 %v1225_v41, %v1224_v37  ;;  %v1229_v52 = vor.u32 %v1228_v4, %v1227_v28  ;;  %v1232_v47 = vor.u32 %v1231_v31, %v1230_v59 }
 0x1b3   : > { %8724 = vcosq.f32 %v4722_v10  ;;  %v8405_v16 = vmin.u32 %v6348_v33, %v10089_v63  ;;  %v1235_v40 = vor.u32 %v1234_v34, %v1233_v25  ;;  %v10114_v15 = vand.u32 8388607, %v2871_v48 }
 0x1b4   : > { %8726 = vsinq.f32 %v4722_v10  ;;  %v1223_v39 = vshrl.u32 %v8889_v54, %v1222_v6  ;;  %vm1239_vm1 = vcmp.lt.s32.totalorder %v10091_v49, 1  ;;  %vm1240_vm2 = vcmp.lt.s32.totalorder %v10091_v49, 2 }
 0x1b5   : > { %v6350_v22 = vclz %v8405_v16  ;;  %v2881_v23 = vadd.s32 1, %v8272_v27  ;;  %v1238_v14 = vor.u32 %v1237_v18, %v1236_v24  ;;  %vm1242_vm4 = vcmp.lt.s32.totalorder %v10091_v49, 4 }
 0x1b6   : > { %v1247_v45 = vsel %vm1239_vm1, %v1226_v26, %v1229_v52  ;;  %vm4729_vm5 = vcmp.eq.s32.totalorder %v10083_v35, 0  ;;  %vm1241_vm6 = vcmp.lt.s32.totalorder %v10091_v49, 3  ;;  %v1244_v51 = vsel %vm1242_vm4, %v1232_v47, 2102212464 }
 0x1b7   : > { %v8406_v36 = vadd.s32 4294967294, %v6350_v22  ;;  %v1248_v61 = vsel %vm1242_vm4, %v1235_v40, 920167782  ;;  %v1251_v20 = vsel %vm1239_vm1, %v1229_v52, %v1232_v47  ;;  %vm4728_vm7 = vcmp.lt.s32.totalorder %v10083_v35, 2 }
 0x1b8   : > { %vm6284_vm8 = vcmp.lt.s32.totalorder %v9895_v7, 0  ;;  %v1243_v50 = vsel %vm1239_vm1, %v1223_v39, %v1226_v26  ;;  %v1249_v30 = vsel %vm1241_vm6, %v1232_v47, %v1248_v61  ;;  %v1252_v57 = vsel %vm1242_vm4, %v1238_v14, 1326507024 }
 0x1b9   : > { %vm8407_vm9 = vcmp.lt.s32.totalorder %v8406_v36, 0  ;;  %vm4726_vm10 = vweird.f32 %v9842_v8  ;;  %v1250_v9 = vsel %vm1240_vm2, %v1247_v45, %v1249_v30  ;;  %v1253_v6 = vsel %vm1241_vm6, %v1235_v40, %v1252_v57 }
 0x1ba   : > { %v6353_v44 = vsel %vm8407_vm9, 0, %v8406_v36  ;;  %vm2882_vm11 = vcmp.gt.s32.totalorder %v2881_v23, 0  ;;  %v1245_v27 = vsel %vm1241_vm6, %v1229_v52, %v1244_v51  ;;  %v1254_v37 = vsel %vm1240_vm2, %v1251_v20, %v1253_v6 }
 0x1bb   : > { %v6354_v32 = vsub.s32 32, %v6353_v44  ;;  %v6358_v42 = vsub.s32 4294967266, %v6353_v44  ;;  %v10143_v41 = vmul.u32.u64.low %v10108_v46, %v1254_v37  ;;  %v10144_v4 = vmul.u32.u64.high %v10108_v46, %v1254_v37, %v10143_v41 }
 0x1bc   : > { %v10147_v53 = vmul.u32.u64.low %v10108_v46, %v1250_v9  ;;  %v10148_v33 = vmul.u32.u64.high %v10108_v46, %v1250_v9, %v10147_v53  ;;  %v6355_v31 = vshll.u32 %v10089_v63, %v6353_v44  ;;  %v2883_v25 = vsel %vm2882_vm11, %v2881_v23, 0 }
 0x1bd   : > { %v8725_v28 = vpop.eup %8724  ;;  %v6356_v10 = vshrl.u32 %v10086_v5, %v6354_v32  ;;  %v6359_v59 = vadd.s32 127, %v6358_v42  ;;  %v6368_v26 = vsub.s32 4, %v10077_v55  ;;  %v1246_v52 = vsel %vm1240_vm2, %v1243_v50, %v1245_v27 }
 0x1be   : > { %v8727_v34 = vpop.eup %8726  ;;  %v4733_v16 = vxor.u32 2147483648, %v8725_v28  ;;  %v2885_v47 = vand.u32 31, %v2883_v25  ;;  %v574_v18 = vmul.f32 %v10081_v19, %v9188_v12  ;;  %vm10162_vm12 = vcmp.le.f32.partialorder %v6282_v43, 0.7853982 }
 0x1bf   : > { %v4730_v40 = vxor.u32 2147483648, %v8727_v34  ;;  %v6357_v22 = vor.u32 %v6356_v10, %v6355_v31  ;;  %v6360_v24 = vshll.u32 %v6359_v59, 23  ;;  %vm1264_vm13 = vc.u32 %v10144_v4, %v10147_v53 }
 0x1c0   : > { %v4734_v63 = vsel %vm4732_vm3, %v4733_v16, %v8727_v34  ;;  %v1265_v49 = vadd.s32 1, %v10148_v33  ;;  %v2879_v39 = vor.u32 8388608, %v10114_v15  ;;  %v1262_v14 = vmul.u32 %v10108_v46, %v1246_v52 }
 0x1c1   : > { %v4731_v23 = vsel %vm4729_vm5, %v8725_v28, %v4730_v40  ;;  %v6361_v36 = vor.u32 4788187, %v6360_v24  ;;  %v2886_v45 = vsub.s32 32, %v2885_v47  ;;  %v6369_v51 = vsel %vm6284_vm8, %v6368_v26, %v10077_v55 }
 0x1c2   : > { %v4735_v43 = vsel %vm4728_vm7, %v4731_v23, %v4734_v63  ;;  %v1266_v61 = vsel %vm1264_vm13, %v1265_v49, %v10148_v33  ;;  %v10181_v20 = vmul.f32 %v10081_v19, %v9190_v13  ;;  %v6364_v30 = vcvt.s32.f32 %v6357_v22 }
 0x1c3   : > { %v4736_v15 = vsel %vm4726_vm10, nan, %v4735_v43  ;;  %v6362_v50 = vand.u32 2147483647, %v6361_v36  ;;  %v1267_v46 = vadd.s32 %v1266_v61, %v1262_v14  ;;  %v2888_v35 = vshll.u32 %v8889_v54, %v2885_v47 }
 0x1c4   : > { %7510 = vst.msk [vmem:[#allocation2 + $0x14] sm:$0xf] %vm7504_vm0, %v4736_v15  ;;  %v2889_v57 = vshrl.u32 %v8890_v56, %v2886_v45  ;;  %v2892_v55 = vshrl.u32 %v8891_v58, %v2886_v45  ;;  %v2895_v44 = vshrl.u32 %v8892_v60, %v2886_v45  ;;  %v2891_v19 = vshll.u32 %v8890_v56, %v2885_v47 }
 0x1c5   : > { %v6365_v9 = vmul.f32 %v6364_v30, %v6362_v50  ;;  %v1268_v6 = vadd.s32 536870912, %v1267_v46  ;;  %v2898_v8 = vshrl.u32 %v8893_v62, %v2886_v45  ;;  %v2884_v32 = vshrl.u32 %v2883_v25, 5 }
 0x1c6   : > { %v2890_v42 = vor.u32 %v2889_v57, %v2888_v35  ;;  %v2894_v27 = vshll.u32 %v8891_v58, %v2885_v47  ;;  %v2897_v37 = vshll.u32 %v8892_v60, %v2885_v47  ;;  %v2893_v28 = vor.u32 %v2892_v55, %v2891_v19 }
 0x1c7   : > { %v6366_v41 = vxor.u32 2147483648, %v6365_v9  ;;  %v1269_v33 = vshrl.u32 %v1268_v6, 30  ;;  %v2901_v31 = vshrl.u32 %v8894_v11, %v2886_v45  ;;  %v2900_v34 = vshll.u32 %v8893_v62, %v2885_v47 }
 0x1c8   : > { %v2896_v10 = vor.u32 %v2895_v44, %v2894_v27  ;;  %v2899_v59 = vor.u32 %v2898_v8, %v2897_v37  ;;  %v10196_v16 = vshll.u32 %v2879_v39, 8  ;;  %v6371_v25 = vsel %vm10162_vm12, 0, %v6369_v51 }
 0x1c9   : > { %v6367_v26 = vsel %vm6284_vm8, %v6366_v41, %v6365_v9  ;;  %v1270_v52 = vshll.u32 %v1269_v33, 30  ;;  %v10203_v40 = vrot.slane %v574_v18, %v9077_v21  ;;  %v2887_v24 = vshrl.u32 %v8889_v54, %v2886_v45 }
 0x1ca   : > { %v6370_v22 = vsel %vm10162_vm12, %v9895_v7, %v6367_v26  ;;  %v2902_v63 = vor.u32 %v2901_v31, %v2900_v34  ;;  %vm2903_vm14 = vcmp.lt.s32.totalorder %v2884_v32, 1  ;;  %vm2906_vm15 = vcmp.lt.s32.totalorder %v2884_v32, 4 }
 0x1cb   : > { %8728 = vcosq.f32 %v6370_v22  ;;  %v10209_v47 = vsub.s32 %v1267_v46, %v1270_v52  ;;  %v2911_v49 = vsel %vm2903_vm14, %v2890_v42, %v2893_v28  ;;  %vm2905_vm1 = vcmp.lt.s32.totalorder %v2884_v32, 3 }
 0x1cc   : > { %8730 = vsinq.f32 %v6370_v22  ;;  %v2908_v39 = vsel %vm2906_vm15, %v2896_v10, 2102212464  ;;  %v2912_v23 = vsel %vm2906_vm15, %v2899_v59, 920167782  ;;  %vm2904_vm2 = vcmp.lt.s32.totalorder %v2884_v32, 2 }
 0x1cd   : > { %v1273_v18 = vsub.s32 0, %v10209_v47  ;;  %v2913_v36 = vsel %vm2905_vm1, %v2896_v10, %v2912_v23  ;;  %v2915_v5 = vsel %vm2903_vm14, %v2893_v28, %v2896_v10  ;;  %v6375_v14 = vand.u32 3, %v6371_v25 }
 0x1ce   : > { %v1293_v45 = vsub.s32 4, %v1269_v33  ;;  %v2914_v43 = vsel %vm2904_vm2, %v2911_v49, %v2913_v36  ;;  %v2916_v51 = vsel %vm2906_vm15, %v2902_v63, 1326507024  ;;  %v2907_v15 = vsel %vm2903_vm14, %v2887_v24, %v2890_v42 }
 0x1cf   : > { %v8209_v61 = vmin.u32 %v1273_v18, %v10209_v47  ;;  %v2909_v50 = vsel %vm2905_vm1, %v2893_v28, %v2908_v39  ;;  %v2917_v30 = vsel %vm2905_vm1, %v2899_v59, %v2916_v51  ;;  %v4843_v55 = vand.u32 2139095040, %v10203_v40 }
 0x1d0   : > { %v2918_v46 = vsel %vm2904_vm2, %v2915_v5, %v2917_v30  ;;  %v10219_v35 = vmul.u32.u64.low %v10196_v16, %v2914_v43  ;;  %v10220_v57 = vmul.u32.u64.high %v10196_v16, %v2914_v43, %v10219_v35  ;;  %vm10226_vm3 = vcmp.le.f32.partialorder %v1207_v38, 0.7853982  ;;  %v480_v30 = vpop.permute.xlu0 %479 }
 0x1d1   : > { %vm1209_vm4 = vcmp.lt.s32.totalorder %v10022_v17, 0  ;;  %v1275_v9 = vclz %v8209_v61  ;;  %v10234_v19 = vmul.u32.u64.low %v10196_v16, %v2918_v46  ;;  %v10235_v8 = vmul.u32.u64.high %v10196_v16, %v2918_v46, %v10234_v19 }
 0x1d2   : > { %v1294_v6 = vsel %vm1209_vm4, %v1293_v45, %v1269_v33  ;;  %v4844_v42 = vshrl.u32 %v4843_v55, 23  ;;  %vm6376_vm5 = vcmp.lt.s32.totalorder %v6375_v14, 2  ;;  %v2910_v37 = vsel %vm2904_vm2, %v2907_v15, %v2909_v50 }
 0x1d3   : > { %v8210_v27 = vadd.s32 4294967294, %v1275_v9  ;;  %v10240_v38 = vrot.slane %v10181_v20, %v9077_v21  ;;  %vm6377_vm6 = vcmp.eq.s32.totalorder %v6375_v14, 0  ;;  %vm6380_vm7 = vcmp.eq.s32.totalorder %v6375_v14, 2 }
 0x1d4   : > { %v2929_v41 = vadd.s32 1, %v10220_v57  ;;  %v8348_v28 = vadd.s32 4294967169, %v4844_v42  ;;  %v1263_v33 = vadd.s32 %v10147_v53, %v10144_v4  ;;  %v1296_v10 = vsel %vm10226_vm3, 0, %v1294_v6 }
 0x1d5   : > { %v8729_v31 = vpop.eup %8728  ;;  %vm8211_vm8 = vcmp.lt.s32.totalorder %v8210_v27, 0  ;;  %v4840_v32 = vand.u32 2147483647, %v10203_v40  ;;  %v2926_v20 = vmul.u32 %v10196_v16, %v2910_v37  ;;  %vm2928_vm9 = vc.u32 %v10235_v8, %v10219_v35 }
 0x1d6   : > { %v8731_v59 = vpop.eup %8730  ;;  %v6381_v34 = vxor.u32 2147483648, %v8729_v31  ;;  %v1278_v26 = vsel %vm8211_vm8, 0, %v8210_v27  ;;  %v6491_v24 = vand.u32 2139095040, %v10240_v38  ;;  %v2930_v63 = vsel %vm2928_vm9, %v2929_v41, %v10220_v57 }
 0x1d7   : > { %v6378_v25 = vxor.u32 2147483648, %v8731_v59  ;;  %v1279_v52 = vsub.s32 32, %v1278_v26  ;;  %v1283_v22 = vsub.s32 4294967266, %v1278_v26  ;;  %v1280_v53 = vshll.u32 %v10209_v47, %v1278_v26 }
 0x1d8   : > { %v6382_v4 = vsel %vm6380_vm7, %v6381_v34, %v8731_v59  ;;  %v4850_v49 = vadd.s32 1, %v8348_v28  ;;  %v2931_v16 = vadd.s32 %v2930_v63, %v2926_v20  ;;  %vm6374_vm10 = vweird.f32 %v9895_v7 }
 0x1d9   : > { %v6379_v39 = vsel %vm6377_vm6, %v8729_v31, %v6378_v25  ;;  %v1281_v23 = vshrl.u32 %v1263_v33, %v1279_v52  ;;  %v1284_v18 = vadd.s32 127, %v1283_v22  ;;  %v1300_v47 = vadd.s32 3, %v1296_v10 }
 0x1da   : > { %v6383_v36 = vsel %vm6376_vm5, %v6379_v39, %v6382_v4  ;;  %vm4851_vm11 = vcmp.gt.s32.totalorder %v4850_v49, 0  ;;  %v2932_v51 = vadd.s32 536870912, %v2931_v16  ;;  %v4847_v61 = vand.u32 8388607, %v4840_v32 }
 0x1db   : > { %v6384_v5 = vsel %vm6374_vm10, nan, %v6383_v36  ;;  %v1282_v45 = vor.u32 %v1281_v23, %v1280_v53  ;;  %v1285_v43 = vshll.u32 %v1284_v18, 23  ;;  %v4852_v15 = vsel %vm4851_vm11, %v4850_v49, 0 }
 0x1dc   : > { %7526 = vst.msk [vmem:[#allocation2 + $0x78] sm:$0xf] %vm7504_vm0, %v6384_v5  ;;  %v6488_v50 = vand.u32 2147483647, %v10240_v38  ;;  %v10262_v57 = vshrl.u32 %v2932_v51, 30  ;;  %v6492_v7 = vshrl.u32 %v6491_v24, 23  ;;  %v10266_v19 = vrot.slane %v480_v30, %v9077_v21 }
 0x1dd   : > { %v1286_v46 = vor.u32 4788187, %v1285_v43  ;;  %v4854_v14 = vand.u32 31, %v4852_v15  ;;  %v1289_v9 = vcvt.s32.f32 %v1282_v45  ;;  %v10268_v42 = vand.u32 3, %v1300_v47 }
 0x1de   : > { %v2934_v6 = vshll.u32 %v10262_v57, 30  ;;  %v4848_v27 = vor.u32 8388608, %v4847_v61  ;;  %v10272_v41 = vand.u32 8388607, %v6488_v50  ;;  %v2927_v31 = vadd.s32 %v10219_v35, %v10235_v8 }
 0x1df   : > { %v1287_v55 = vand.u32 2147483647, %v1286_v46  ;;  %v4855_v37 = vsub.s32 32, %v4854_v14  ;;  %v8412_v10 = vadd.s32 4294967169, %v6492_v7  ;;  %v4853_v59 = vshrl.u32 %v4852_v15, 5 }
 0x1e0   : > { %v10276_v33 = vsub.s32 %v2931_v16, %v2934_v6  ;;  %v4857_v34 = vshll.u32 %v8889_v54, %v4854_v14  ;;  %v4860_v22 = vshll.u32 %v8890_v56, %v4854_v14  ;;  %v4863_v35 = vshll.u32 %v8891_v58, %v4854_v14 }
 0x1e1   : > { %v1290_v28 = vmul.f32 %v1289_v9, %v1287_v55  ;;  %v4858_v26 = vshrl.u32 %v8890_v56, %v4855_v37  ;;  %v4861_v20 = vshrl.u32 %v8891_v58, %v4855_v37  ;;  %v4864_v24 = vshrl.u32 %v8892_v60, %v4855_v37 }
 0x1e2   : > { %v2937_v52 = vsub.s32 0, %v10276_v33  ;;  %v4866_v8 = vshll.u32 %v8892_v60, %v4854_v14  ;;  %v4867_v53 = vshrl.u32 %v8893_v62, %v4855_v37  ;;  %v4869_v23 = vshll.u32 %v8893_v62, %v4854_v14 }
 0x1e3   : > { %v1291_v25 = vxor.u32 2147483648, %v1290_v28  ;;  %v4859_v4 = vor.u32 %v4858_v26, %v4857_v34  ;;  %v4862_v39 = vor.u32 %v4861_v20, %v4860_v22  ;;  %v4865_v16 = vor.u32 %v4864_v24, %v4863_v35 }
 0x1e4   : > { %v8273_v49 = vmin.u32 %v2937_v52, %v10276_v33  ;;  %v4868_v36 = vor.u32 %v4867_v53, %v4866_v8  ;;  %v4870_v5 = vshrl.u32 %v8894_v11, %v4855_v37  ;;  %v10295_v43 = vshll.u32 %v4848_v27, 8 }
 0x1e5   : > { %v1292_v63 = vsel %vm1209_vm4, %v1291_v25, %v1290_v28  ;;  %v6498_v51 = vadd.s32 1, %v8412_v10  ;;  %v4856_v47 = vshrl.u32 %v8889_v54, %v4855_v37  ;;  %vm4872_vm12 = vcmp.lt.s32.totalorder %v4853_v59, 1 }
 0x1e6   : > { %v1295_v18 = vsel %vm10226_vm3, %v10022_v17, %v1292_v63  ;;  %v2939_v45 = vclz %v8273_v49  ;;  %v4871_v61 = vor.u32 %v4870_v5, %v4869_v23  ;;  %vm2873_vm13 = vcmp.lt.s32.totalorder %v10045_v29, 0 }
 0x1e7   : > { %8732 = vcosq.f32 %v1295_v18  ;;  %vm4874_vm14 = vcmp.lt.s32.totalorder %v4853_v59, 3  ;;  %vm4875_vm15 = vcmp.lt.s32.totalorder %v4853_v59, 4  ;;  %v4880_v44 = vsel %vm4872_vm12, %v4859_v4, %v4862_v39 }
 0x1e8   : > { %8734 = vsinq.f32 %v1295_v18  ;;  %v8274_v15 = vadd.s32 4294967294, %v2939_v45  ;;  %v4877_v30 = vsel %vm4875_vm15, %v4865_v16, 2102212464  ;;  %v4881_v46 = vsel %vm4875_vm15, %v4868_v36, 920167782 }
 0x1e9   : > { %v4884_v7 = vsel %vm4872_vm12, %v4862_v39, %v4865_v16  ;;  %v4885_v14 = vsel %vm4875_vm15, %v4871_v61, 1326507024  ;;  %vm4873_vm2 = vcmp.lt.s32.totalorder %v4853_v59, 2  ;;  %v4882_v55 = vsel %vm4874_vm14, %v4865_v16, %v4881_v46 }
 0x1ea   : > { %vm8275_vm1 = vcmp.lt.s32.totalorder %v8274_v15, 0  ;;  %v4886_v9 = vsel %vm4874_vm14, %v4868_v36, %v4885_v14  ;;  %vm1303_vm3 = vcmp.eq.s32.totalorder %v10268_v42, 0  ;;  %v2957_v27 = vsub.s32 4, %v10262_v57 }
 0x1eb   : > { %v2942_v6 = vsel %vm8275_vm1, 0, %v8274_v15  ;;  %v4883_v37 = vsel %vm4873_vm2, %v4880_v44, %v4882_v55  ;;  %v4887_v28 = vsel %vm4873_vm2, %v4884_v7, %v4886_v9  ;;  %vm1302_vm4 = vcmp.lt.s32.totalorder %v10268_v42, 2 }
 0x1ec   : > { %vm10310_vm5 = vcmp.le.f32.partialorder %v2871_v48, 0.7853982  ;;  %v2943_v34 = vsub.s32 32, %v2942_v6  ;;  %v2947_v26 = vsub.s32 4294967266, %v2942_v6  ;;  %v4876_v20 = vsel %vm4872_vm12, %v4856_v47, %v4859_v4 }
 0x1ed   : > { %v4878_v25 = vsel %vm4874_vm14, %v4862_v39, %v4877_v30  ;;  %vm1299_vm6 = vweird.f32 %v10022_v17  ;;  %v10318_v52 = vmul.u32.u64.low %v10295_v43, %v4887_v28  ;;  %v10319_v22 = vmul.u32.u64.high %v10295_v43, %v4887_v28, %v10318_v52 }
 0x1ee   : > { %v10322_v24 = vmul.u32.u64.low %v10295_v43, %v4883_v37  ;;  %v10323_v35 = vmul.u32.u64.high %v10295_v43, %v4883_v37, %v10322_v24  ;;  %v2944_v48 = vshll.u32 %v10276_v33, %v2942_v6  ;;  %v2945_v8 = vshrl.u32 %v2927_v31, %v2943_v34 }
 0x1ef   : > { %v2948_v53 = vadd.s32 127, %v2947_v26  ;;  %vm6499_vm7 = vcmp.gt.s32.totalorder %v6498_v51, 0  ;;  %v4879_v4 = vsel %vm4873_vm2, %v4876_v20, %v4878_v25  ;;  %v6496_v63 = vor.u32 8388608, %v10272_v41 }
 0x1f0   : > { %v6500_v49 = vsel %vm6499_vm7, %v6498_v51, 0  ;;  %v573_v39 = vmul.f32 %v10266_v19, %v9188_v12  ;;  %vm1306_vm8 = vcmp.eq.s32.totalorder %v10268_v42, 2  ;;  %v2946_v18 = vor.u32 %v2945_v8, %v2944_v48 }
 0x1f1   : > { %v8733_v23 = vpop.eup %8732  ;;  %v2949_v16 = vshll.u32 %v2948_v53, 23  ;;  %v6502_v36 = vand.u32 31, %v6500_v49  ;;  %v2958_v31 = vsel %vm2873_vm13, %v2957_v27, %v10262_v57  ;;  %vm4897_vm9 = vc.u32 %v10319_v22, %v10322_v24 }
 0x1f2   : > { %v8735_v5 = vpop.eup %8734  ;;  %v1307_v45 = vxor.u32 2147483648, %v8733_v23  ;;  %v4898_v41 = vadd.s32 1, %v10323_v35  ;;  %v4895_v51 = vmul.u32 %v10295_v43, %v4879_v4  ;;  %v10340_v44 = vshll.u32 %v6496_v63, 8 }
 0x1f3   : > { %v1304_v33 = vxor.u32 2147483648, %v8735_v5  ;;  %v2950_v59 = vor.u32 4788187, %v2949_v16  ;;  %v6503_v47 = vsub.s32 32, %v6502_v36  ;;  %v10343_v30 = vrot.slane %v573_v39, %v9077_v21 }
 0x1f4   : > { %v1308_v61 = vsel %vm1306_vm8, %v1307_v45, %v8735_v5  ;;  %v4899_v15 = vsel %vm4897_vm9, %v4898_v41, %v10323_v35  ;;  %v2953_v7 = vcvt.s32.f32 %v2946_v18  ;;  %v2960_v43 = vsel %vm10310_vm5, 0, %v2958_v31 }
 0x1f5   : > { %v1305_v57 = vsel %vm1303_vm3, %v8733_v23, %v1304_v33  ;;  %v2951_v46 = vand.u32 2147483647, %v2950_v59  ;;  %v4900_v14 = vadd.s32 %v4899_v15, %v4895_v51  ;;  %v6506_v9 = vshrl.u32 %v8890_v56, %v6503_v47 }
 0x1f6   : > { %v1309_v55 = vsel %vm1302_vm4, %v1305_v57, %v1308_v61  ;;  %v6509_v6 = vshrl.u32 %v8891_v58, %v6503_v47  ;;  %v6512_v34 = vshrl.u32 %v8892_v60, %v6503_v47  ;;  %v6501_v26 = vshrl.u32 %v6500_v49, 5 }
 0x1f7   : > { %v1310_v27 = vsel %vm1299_vm6, nan, %v1309_v55  ;;  %v2954_v37 = vmul.f32 %v2953_v7, %v2951_v46  ;;  %v4901_v28 = vadd.s32 536870912, %v4900_v14  ;;  %v6505_v42 = vshll.u32 %v8889_v54, %v6502_v36 }
 0x1f8   : > { %7509 = vst.msk [vmem:[#allocation2 + $0x10] sm:$0xf] %vm7504_vm0, %v1310_v27  ;;  %v6508_v20 = vshll.u32 %v8890_v56, %v6502_v36  ;;  %v6515_v25 = vshrl.u32 %v8893_v62, %v6503_v47  ;;  %v6511_v48 = vshll.u32 %v8891_v58, %v6502_v36  ;;  %v6514_v17 = vshll.u32 %v8892_v60, %v6502_v36 }
 0x1f9   : > { %v2955_v52 = vxor.u32 2147483648, %v2954_v37  ;;  %v4902_v35 = vshrl.u32 %v4901_v28, 30  ;;  %v6507_v8 = vor.u32 %v6506_v9, %v6505_v42  ;;  %v6517_v4 = vshll.u32 %v8893_v62, %v6502_v36 }
 0x1fa   : > { %v6510_v53 = vor.u32 %v6509_v6, %v6508_v20  ;;  %v6518_v63 = vshrl.u32 %v8894_v11, %v6503_v47  ;;  %vm4842_vm10 = vcmp.lt.s32.totalorder %v10203_v40, 0  ;;  %v6513_v23 = vor.u32 %v6512_v34, %v6511_v48 }
 0x1fb   : > { %v2956_v49 = vsel %vm2873_vm13, %v2955_v52, %v2954_v37  ;;  %v4903_v39 = vshll.u32 %v4902_v35, 30  ;;  %v6516_v18 = vor.u32 %v6515_v25, %v6514_v17  ;;  %v2964_v5 = vadd.s32 3, %v2960_v43 }
 0x1fc   : > { %v2959_v16 = vsel %vm10310_vm5, %v10045_v29, %v2956_v49  ;;  %v6519_v45 = vor.u32 %v6518_v63, %v6517_v4  ;;  %v589_v31 = vmul.f32 %v10266_v19, %v9190_v13  ;;  %v6504_v41 = vshrl.u32 %v8889_v54, %v6503_v47 }
 0x1fd   : > { %8736 = vcosq.f32 %v2959_v16  ;;  %v10372_v36 = vsub.s32 %v4900_v14, %v4903_v39  ;;  %v1418_v33 = vand.u32 2139095040, %v10343_v30  ;;  %vm10378_vm11 = vcmp.le.f32.partialorder %v4840_v32, 0.7853982 }
 0x1fe   : > { %8738 = vsinq.f32 %v2959_v16  ;;  %vm6520_vm12 = vcmp.lt.s32.totalorder %v6501_v26, 1  ;;  %vm6522_vm13 = vcmp.lt.s32.totalorder %v6501_v26, 3  ;;  %vm6523_vm14 = vcmp.lt.s32.totalorder %v6501_v26, 4 }
 0x1ff   : > { %v4906_v10 = vsub.s32 0, %v10372_v36  ;;  %v6525_v19 = vsel %vm6523_vm14, %v6513_v23, 2102212464  ;;  %v6528_v51 = vsel %vm6520_vm12, %v6507_v8, %v6510_v53  ;;  %v6529_v61 = vsel %vm6523_vm14, %v6516_v18, 920167782 }
 0x200   : > { %v4926_v15 = vsub.s32 4, %v4902_v35  ;;  %v6530_v47 = vsel %vm6522_vm13, %v6513_v23, %v6529_v61  ;;  %v6532_v57 = vsel %vm6520_vm12, %v6510_v53, %v6513_v23  ;;  %v6533_v46 = vsel %vm6523_vm14, %v6519_v45, 1326507024 }
 0x201   : > { %v2965_v7 = vand.u32 3, %v2964_v5  ;;  %v8349_v14 = vmin.u32 %v4906_v10, %v10372_v36  ;;  %vm6521_vm15 = vcmp.lt.s32.totalorder %v6501_v26, 2  ;;  %v6524_v32 = vsel %vm6520_vm12, %v6504_v41, %v6507_v8 }
 0x202   : > { %v6526_v55 = vsel %vm6522_vm13, %v6510_v53, %v6525_v19  ;;  %v6531_v43 = vsel %vm6521_vm15, %v6528_v51, %v6530_v47  ;;  %v6534_v9 = vsel %vm6522_vm13, %v6516_v18, %v6533_v46  ;;  %v1419_v6 = vshrl.u32 %v1418_v33, 23 }
 0x203   : > { %v4908_v27 = vclz %v8349_v14  ;;  %v6535_v37 = vsel %vm6521_vm15, %v6532_v57, %v6534_v9  ;;  %v10388_v28 = vmul.u32.u64.low %v10340_v44, %v6531_v43  ;;  %v10389_v34 = vmul.u32.u64.high %v10340_v44, %v6531_v43, %v10388_v28 }
 0x204   : > { %vm2963_vm1 = vweird.f32 %v10045_v29  ;;  %v4927_v42 = vsel %vm4842_vm10, %v4926_v15, %v4902_v35  ;;  %v10395_v20 = vmul.u32.u64.low %v10340_v44, %v6535_v37  ;;  %v10396_v25 = vmul.u32.u64.high %v10340_v44, %v6535_v37, %v10395_v20 }
 0x205   : > { %v8216_v52 = vadd.s32 4294967169, %v1419_v6  ;;  %vm2966_vm2 = vcmp.lt.s32.totalorder %v2965_v7, 2  ;;  %v8350_v26 = vadd.s32 4294967294, %v4908_v27  ;;  %v6527_v48 = vsel %vm6521_vm15, %v6524_v32, %v6526_v55 }
 0x206   : > { %v1415_v17 = vand.u32 2147483647, %v10343_v30  ;;  %vm2967_vm3 = vcmp.eq.s32.totalorder %v2965_v7, 0  ;;  %vm2970_vm4 = vcmp.eq.s32.totalorder %v2965_v7, 2  ;;  %v10400_v8 = vrot.slane %v589_v31, %v9077_v21 }
 0x207   : > { %v1425_v53 = vadd.s32 1, %v8216_v52  ;;  %v8737_v4 = vpop.eup %8736  ;;  %v4896_v35 = vadd.s32 %v10322_v24, %v10319_v22  ;;  %vm8351_vm5 = vcmp.lt.s32.totalorder %v8350_v26, 0  ;;  %v4929_v63 = vsel %vm10378_vm11, 0, %v4927_v42 }
 0x208   : > { %v6546_v49 = vadd.s32 1, %v10389_v34  ;;  %v8739_v39 = vpop.eup %8738  ;;  %v2971_v23 = vxor.u32 2147483648, %v8737_v4  ;;  %v4911_v18 = vsel %vm8351_vm5, 0, %v8350_v26  ;;  %v6543_v16 = vmul.u32 %v10340_v44, %v6527_v48 }
 0x209   : > { %vm6545_vm6 = vc.u32 %v10396_v25, %v10388_v28  ;;  %v2968_v5 = vxor.u32 2147483648, %v8739_v39  ;;  %v4912_v45 = vsub.s32 32, %v4911_v18  ;;  %v4916_v31 = vsub.s32 4294967266, %v4911_v18 }
 0x20a   : > { %v1422_v41 = vand.u32 8388607, %v1415_v17  ;;  %v2972_v22 = vsel %vm2970_vm4, %v2971_v23, %v8739_v39  ;;  %v4913_v24 = vshll.u32 %v10372_v36, %v4911_v18  ;;  %v6547_v33 = vsel %vm6545_vm6, %v6546_v49, %v10389_v34 }
 0x20b   : > { %vm1426_vm7 = vcmp.gt.s32.totalorder %v1425_v53, 0  ;;  %v2969_v10 = vsel %vm2967_vm3, %v8737_v4, %v2968_v5  ;;  %v4914_v19 = vshrl.u32 %v4896_v35, %v4912_v45  ;;  %v4917_v51 = vadd.s32 127, %v4916_v31 }
 0x20c   : > { %v6548_v44 = vadd.s32 %v6547_v33, %v6543_v16  ;;  %v2973_v61 = vsel %vm2966_vm2, %v2969_v10, %v2972_v22  ;;  %v1427_v15 = vsel %vm1426_vm7, %v1425_v53, 0  ;;  %v3079_v47 = vand.u32 2147483647, %v10400_v8 }
 0x20d   : > { %v3082_v57 = vand.u32 2139095040, %v10400_v8  ;;  %v2974_v46 = vsel %vm2963_vm1, nan, %v2973_v61  ;;  %v4915_v14 = vor.u32 %v4914_v19, %v4913_v24  ;;  %v4918_v36 = vshll.u32 %v4917_v51, 23 }
 0x20e   : > { %v6549_v32 = vadd.s32 536870912, %v6548_v44  ;;  %7525 = vst.msk [vmem:[#allocation2 + $0x74] sm:$0xf] %vm7504_vm0, %v2974_v46  ;;  %v1429_v55 = vand.u32 31, %v1427_v15  ;;  %v10421_v9 = vand.u32 3, %v4929_v63  ;;  %v10426_v7 = vadd.s32 %v10388_v28, %v10396_v25 }
 0x20f   : > { %v4919_v43 = vor.u32 4788187, %v4918_v36  ;;  %v1423_v27 = vor.u32 8388608, %v1422_v41  ;;  %v10430_v29 = vand.u32 8388607, %v3079_v47  ;;  %v4922_v42 = vcvt.s32.f32 %v4915_v14 }
 0x210   : > { %v10423_v6 = vshrl.u32 %v6549_v32, 30  ;;  %v1430_v37 = vsub.s32 32, %v1429_v55  ;;  %v3083_v52 = vshrl.u32 %v3082_v57, 23  ;;  %v1432_v26 = vshll.u32 %v8889_v54, %v1429_v55 }
 0x211   : > { %v4920_v34 = vand.u32 2147483647, %v4919_v43  ;;  %v1435_v35 = vshll.u32 %v8890_v56, %v1429_v55  ;;  %v1428_v49 = vshrl.u32 %v1427_v15, 5  ;;  %v1438_v39 = vshll.u32 %v8891_v58, %v1429_v55 }
 0x212   : > { %v6551_v20 = vshll.u32 %v10423_v6, 30  ;;  %v1433_v48 = vshrl.u32 %v8890_v56, %v1430_v37  ;;  %v1436_v53 = vshrl.u32 %v8891_v58, %v1430_v37  ;;  %v1439_v28 = vshrl.u32 %v8892_v60, %v1430_v37 }
 0x213   : > { %v4923_v25 = vmul.f32 %v4922_v42, %v4920_v34  ;;  %v1442_v63 = vshrl.u32 %v8893_v62, %v1430_v37  ;;  %v1441_v23 = vshll.u32 %v8892_v60, %v1429_v55  ;;  %v10443_v18 = vshll.u32 %v1423_v27, 8 }
 0x214   : > { %v10437_v4 = vsub.s32 %v6548_v44, %v6551_v20  ;;  %v1434_v45 = vor.u32 %v1433_v48, %v1432_v26  ;;  %v1437_v31 = vor.u32 %v1436_v53, %v1435_v35  ;;  %v1440_v41 = vor.u32 %v1439_v28, %v1438_v39 }
 0x215   : > { %v4924_v16 = vxor.u32 2147483648, %v4923_v25  ;;  %v1443_v22 = vor.u32 %v1442_v63, %v1441_v23  ;;  %v1444_v24 = vshll.u32 %v8893_v62, %v1429_v55  ;;  %v1445_v33 = vshrl.u32 %v8894_v11, %v1430_v37  ;;  %v507_v23 = vpop.permute.xlu1 %506 }
 0x216   : > { %v6554_v5 = vsub.s32 0, %v10437_v4  ;;  %v1431_v51 = vshrl.u32 %v8889_v54, %v1430_v37  ;;  %v8280_v44 = vadd.s32 4294967169, %v3083_v52  ;;  %vm1447_vm8 = vcmp.lt.s32.totalorder %v1428_v49, 1 }
 0x217   : > { %v4925_v10 = vsel %vm4842_vm10, %v4924_v16, %v4923_v25  ;;  %v1446_v15 = vor.u32 %v1445_v33, %v1444_v24  ;;  %vm1448_vm9 = vcmp.lt.s32.totalorder %v1428_v49, 2  ;;  %vm6490_vm12 = vcmp.lt.s32.totalorder %v10240_v38, 0 }
 0x218   : > { %v8413_v19 = vmin.u32 %v6554_v5, %v10437_v4  ;;  %v4928_v61 = vsel %vm10378_vm11, %v10203_v40, %v4925_v10  ;;  %vm1449_vm13 = vcmp.lt.s32.totalorder %v1428_v49, 3  ;;  %vm1450_vm14 = vcmp.lt.s32.totalorder %v1428_v49, 4 }
 0x219   : > { %8740 = vcosq.f32 %v4928_v61  ;;  %v1452_v46 = vsel %vm1450_vm14, %v1440_v41, 2102212464  ;;  %v1455_v14 = vsel %vm1447_vm8, %v1434_v45, %v1437_v31  ;;  %v1456_v36 = vsel %vm1450_vm14, %v1443_v22, 920167782 }
 0x21a   : > { %v6556_v57 = vclz %v8413_v19  ;;  %8742 = vsinq.f32 %v4928_v61  ;;  %v1451_v55 = vsel %vm1447_vm8, %v1431_v51, %v1434_v45  ;;  %v1457_v43 = vsel %vm1449_vm13, %v1440_v41, %v1456_v36 }
 0x21b   : > { %v1459_v27 = vsel %vm1447_vm8, %v1437_v31, %v1440_v41  ;;  %v1453_v59 = vsel %vm1449_vm13, %v1437_v31, %v1452_v46  ;;  %v1458_v37 = vsel %vm1448_vm9, %v1455_v14, %v1457_v43  ;;  %v1460_v34 = vsel %vm1450_vm14, %v1446_v15, 1326507024 }
 0x21c   : > { %v8414_v32 = vadd.s32 4294967294, %v6556_v57  ;;  %v3089_v42 = vadd.s32 1, %v8280_v44  ;;  %vm4938_vm10 = vcmp.eq.s32.totalorder %v10421_v9, 2  ;;  %v1461_v20 = vsel %vm1449_vm13, %v1443_v22, %v1460_v34 }
 0x21d   : > { %v10462_v52 = vmul.u32.u64.low %v10443_v18, %v1458_v37  ;;  %v10463_v26 = vmul.u32.u64.high %v10443_v18, %v1458_v37, %v10462_v52  ;;  %vm4935_vm15 = vcmp.eq.s32.totalorder %v10421_v9, 0  ;;  %v6574_v53 = vsub.s32 4, %v10423_v6 }
 0x21e   : > { %vm8415_vm11 = vcmp.lt.s32.totalorder %v8414_v32, 0  ;;  %v1462_v28 = vsel %vm1448_vm9, %v1459_v27, %v1461_v20  ;;  %vm3090_vm1 = vcmp.gt.s32.totalorder %v3089_v42, 0  ;;  %vm4934_vm2 = vcmp.lt.s32.totalorder %v10421_v9, 2 }
 0x21f   : > { %v6559_v48 = vsel %vm8415_vm11, 0, %v8414_v32  ;;  %v1454_v63 = vsel %vm1448_vm9, %v1451_v55, %v1453_v59  ;;  %v3091_v39 = vsel %vm3090_vm1, %v3089_v42, 0  ;;  %vm4932_vm3 = vweird.f32 %v10203_v40 }
 0x220   : > { %v6560_v25 = vsub.s32 32, %v6559_v48  ;;  %v6564_v35 = vsub.s32 4294967266, %v6559_v48  ;;  %v10473_v16 = vmul.u32.u64.low %v10443_v18, %v1462_v28  ;;  %v10474_v5 = vmul.u32.u64.high %v10443_v18, %v1462_v28, %v10473_v16 }
 0x221   : > { %v3087_v45 = vor.u32 8388608, %v10430_v29  ;;  %v3093_v31 = vand.u32 31, %v3091_v39  ;;  %v6561_v41 = vshll.u32 %v10437_v4, %v6559_v48  ;;  %v1473_v33 = vadd.s32 1, %v10463_v26 }
 0x222   : > { %v6562_v22 = vshrl.u32 %v10426_v7, %v6560_v25  ;;  %v6565_v24 = vadd.s32 127, %v6564_v35  ;;  %v10483_v49 = vsel %vm6490_vm12, %v6574_v53, %v10423_v6  ;;  %v1470_v10 = vmul.u32 %v10443_v18, %v1454_v63 }
 0x223   : > { %v3094_v19 = vsub.s32 32, %v3093_v31  ;;  %v10487_v51 = vrot.slane %v507_v23, %v9077_v21  ;;  %v8741_v29 = vpop.eup %8740  ;;  %v10489_v4 = vshrl.u32 %v3091_v39, 5  ;;  %v3096_v7 = vshll.u32 %v8889_v54, %v3093_v31 }
 0x224   : > { %v6563_v44 = vor.u32 %v6562_v22, %v6561_v41  ;;  %v6566_v61 = vshll.u32 %v6565_v24, 23  ;;  %v8743_v15 = vpop.eup %8742  ;;  %v4939_v57 = vxor.u32 2147483648, %v8741_v29  ;;  %vm1472_vm4 = vc.u32 %v10474_v5, %v10462_v52 }
 0x225   : > { %v3099_v6 = vshll.u32 %v8890_v56, %v3093_v31  ;;  %v3105_v18 = vshll.u32 %v8892_v60, %v3093_v31  ;;  %v4936_v46 = vxor.u32 2147483648, %v8743_v15  ;;  %v1474_v32 = vsel %vm1472_vm4, %v1473_v33, %v10463_v26 }
 0x226   : > { %v6567_v14 = vor.u32 4788187, %v6566_v61  ;;  %v6570_v36 = vcvt.s32.f32 %v6563_v44  ;;  %v4940_v55 = vsel %vm4938_vm10, %v4939_v57, %v8743_v15  ;;  %v1475_v43 = vadd.s32 %v1474_v32, %v1470_v10 }
 0x227   : > { %v3097_v27 = vshrl.u32 %v8890_v56, %v3094_v19  ;;  %v3100_v59 = vshrl.u32 %v8891_v58, %v3094_v19  ;;  %v4937_v37 = vsel %vm4935_vm15, %v8741_v29, %v4936_v46  ;;  %v3103_v42 = vshrl.u32 %v8892_v60, %v3094_v19 }
 0x228   : > { %v6568_v34 = vand.u32 2147483647, %v6567_v14  ;;  %v3106_v20 = vshrl.u32 %v8893_v62, %v3094_v19  ;;  %v4941_v48 = vsel %vm4934_vm2, %v4937_v37, %v4940_v55  ;;  %v1476_v26 = vadd.s32 536870912, %v1475_v43 }
 0x229   : > { %v3098_v53 = vor.u32 %v3097_v27, %v3096_v7  ;;  %v3102_v28 = vshll.u32 %v8891_v58, %v3093_v31  ;;  %v4942_v25 = vsel %vm4932_vm3, nan, %v4941_v48  ;;  %v3101_v63 = vor.u32 %v3100_v59, %v3099_v6 }
 0x22a   : > { %v6571_v35 = vmul.f32 %v6570_v36, %v6568_v34  ;;  %v3107_v39 = vor.u32 %v3106_v20, %v3105_v18  ;;  %vm10512_vm5 = vcmp.le.f32.partialorder %v6488_v50, 0.7853982  ;;  %7512 = vst.msk [vmem:[#allocation2 + $0x1c] sm:$0xf] %vm7504_vm0, %v4942_v25  ;;  %v1477_v9 = vshrl.u32 %v1476_v26, 30 }
 0x22b   : > { %v3109_v16 = vshrl.u32 %v8894_v11, %v3094_v19  ;;  %v10518_v41 = vshll.u32 %v3087_v45, 8  ;;  %v6577_v40 = vsel %vm10512_vm5, 0, %v10483_v49  ;;  %v3104_v24 = vor.u32 %v3103_v42, %v3102_v28 }
 0x22c   : > { %v6572_v22 = vxor.u32 2147483648, %v6571_v35  ;;  %v3108_v33 = vshll.u32 %v8893_v62, %v3093_v31  ;;  %v1478_v10 = vshll.u32 %v1477_v9, 30  ;;  %vm3111_vm6 = vcmp.lt.s32.totalorder %v10489_v4, 1 }
 0x22d   : > { %vm3114_vm7 = vcmp.lt.s32.totalorder %v10489_v4, 4  ;;  %v576_v50 = vmul.f32 %v10487_v51, %v9188_v12  ;;  %v3119_v44 = vsel %vm3111_vm6, %v3098_v53, %v3101_v63  ;;  %v3095_v7 = vshrl.u32 %v8889_v54, %v3094_v19 }
 0x22e   : > { %v6573_v45 = vsel %vm6490_vm12, %v6572_v22, %v6571_v35  ;;  %v3110_v29 = vor.u32 %v3109_v16, %v3108_v33  ;;  %v3120_v49 = vsel %vm3114_vm7, %v3107_v39, 920167782  ;;  %v10537_v61 = vsub.s32 %v1475_v43, %v1478_v10 }
 0x22f   : > { %v6576_v31 = vsel %vm10512_vm5, %v10240_v38, %v6573_v45  ;;  %vm3113_vm8 = vcmp.lt.s32.totalorder %v10489_v4, 3  ;;  %vm3112_vm9 = vcmp.lt.s32.totalorder %v10489_v4, 2  ;;  %v3116_v15 = vsel %vm3114_vm7, %v3104_v24, 2102212464 }
 0x230   : > { %8744 = vcosq.f32 %v6576_v31  ;;  %v3121_v57 = vsel %vm3113_vm8, %v3104_v24, %v3120_v49  ;;  %v1481_v6 = vsub.s32 0, %v10537_v61  ;;  %v3123_v19 = vsel %vm3111_vm6, %v3101_v63, %v3104_v24 }
 0x231   : > { %8746 = vsinq.f32 %v6576_v31  ;;  %v3122_v18 = vsel %vm3112_vm9, %v3119_v44, %v3121_v57  ;;  %v1501_v46 = vsub.s32 4, %v1477_v9  ;;  %v3124_v14 = vsel %vm3114_vm7, %v3110_v29, 1326507024 }
 0x232   : > { %v10554_v36 = vmul.u32.u64.low %v10518_v41, %v3122_v18  ;;  %v10555_v32 = vmul.u32.u64.high %v10518_v41, %v3122_v18, %v10554_v36  ;;  %v6581_v55 = vand.u32 3, %v6577_v40  ;;  %v8217_v43 = vmin.u32 %v1481_v6, %v10537_v61 }
 0x233   : > { %v3125_v27 = vsel %vm3113_vm8, %v3107_v39, %v3124_v14  ;;  %v592_v59 = vmul.f32 %v10487_v51, %v9190_v13  ;;  %v3115_v37 = vsel %vm3111_vm6, %v3095_v7, %v3098_v53  ;;  %v3117_v34 = vsel %vm3113_vm8, %v3101_v63, %v3116_v15 }
 0x234   : > { %v3126_v42 = vsel %vm3112_vm9, %v3123_v19, %v3125_v27  ;;  %v10570_v20 = vrot.slane %v576_v50, %v9077_v21  ;;  %vm1417_vm12 = vcmp.lt.s32.totalorder %v10343_v30, 0  ;;  %v1483_v48 = vclz %v8217_v43  ;;  %v498_v27 = vpop.permute.xlu0 %497 }
 0x235   : > { %v1502_v26 = vsel %vm1417_vm12, %v1501_v46, %v1477_v9  ;;  %v10576_v51 = vmul.u32.u64.low %v10518_v41, %v3126_v42  ;;  %v10577_v28 = vmul.u32.u64.high %v10518_v41, %v3126_v42, %v10576_v51  ;;  %vm6580_vm13 = vweird.f32 %v10240_v38 }
 0x236   : > { %v8218_v53 = vadd.s32 4294967294, %v1483_v48  ;;  %v3118_v25 = vsel %vm3112_vm9, %v3115_v37, %v3117_v34  ;;  %v10583_v35 = vrot.slane %v592_v59, %v9077_v21  ;;  %v5049_v63 = vand.u32 2139095040, %v10570_v20 }
 0x237   : > { %vm6583_vm14 = vcmp.eq.s32.totalorder %v6581_v55, 0  ;;  %vm6586_vm10 = vcmp.eq.s32.totalorder %v6581_v55, 2  ;;  %vm10588_vm11 = vcmp.le.f32.partialorder %v1415_v17, 0.7853982  ;;  %v3137_v23 = vadd.s32 1, %v10555_v32 }
 0x238   : > { %v1471_v9 = vadd.s32 %v10462_v52, %v10474_v5  ;;  %vm8219_vm15 = vcmp.lt.s32.totalorder %v8218_v53, 0  ;;  %v1504_v4 = vsel %vm10588_vm11, 0, %v1502_v26  ;;  %v5050_v16 = vshrl.u32 %v5049_v63, 23 }
 0x239   : > { %v1486_v40 = vsel %vm8219_vm15, 0, %v8218_v53  ;;  %v3134_v24 = vmul.u32 %v10518_v41, %v3118_v25  ;;  %vm3136_vm1 = vc.u32 %v10577_v28, %v10554_v36  ;;  %v5046_v17 = vand.u32 2147483647, %v10570_v20 }
 0x23a   : > { %v8745_v22 = vpop.eup %8744  ;;  %v1487_v50 = vsub.s32 32, %v1486_v40  ;;  %v1491_v45 = vsub.s32 4294967266, %v1486_v40  ;;  %v6697_v52 = vand.u32 2139095040, %v10583_v35  ;;  %v1488_v29 = vshll.u32 %v10537_v61, %v1486_v40 }
 0x23b   : > { %v8747_v33 = vpop.eup %8746  ;;  %v6587_v10 = vxor.u32 2147483648, %v8745_v22  ;;  %v3138_v44 = vsel %vm3136_vm1, %v3137_v23, %v10555_v32  ;;  %v8356_v49 = vadd.s32 4294967169, %v5050_v16  ;;  %vm6582_vm2 = vcmp.lt.s32.totalorder %v6581_v55, 2 }
 0x23c   : > { %v6584_v5 = vxor.u32 2147483648, %v8747_v33  ;;  %v1489_v41 = vshrl.u32 %v1471_v9, %v1487_v50  ;;  %v1492_v7 = vadd.s32 127, %v1491_v45  ;;  %v3139_v15 = vadd.s32 %v3138_v44, %v3134_v24 }
 0x23d   : > { %v6588_v31 = vsel %vm6586_vm10, %v6587_v10, %v8747_v33  ;;  %v1508_v6 = vadd.s32 3, %v1504_v4  ;;  %v5056_v18 = vadd.s32 1, %v8356_v49  ;;  %v5053_v32 = vand.u32 8388607, %v5046_v17 }
 0x23e   : > { %v6585_v57 = vsel %vm6583_vm14, %v8745_v22, %v6584_v5  ;;  %v1490_v46 = vor.u32 %v1489_v41, %v1488_v29  ;;  %v1493_v14 = vshll.u32 %v1492_v7, 23  ;;  %v3140_v43 = vadd.s32 536870912, %v3139_v15 }
 0x23f   : > { %v6589_v19 = vsel %vm6582_vm2, %v6585_v57, %v6588_v31  ;;  %vm5057_vm3 = vcmp.gt.s32.totalorder %v5056_v18, 0  ;;  %v6698_v34 = vshrl.u32 %v6697_v52, 23  ;;  %v10611_v42 = vand.u32 3, %v1508_v6 }
 0x240   : > { %v6590_v61 = vsel %vm6580_vm13, nan, %v6589_v19  ;;  %v1494_v59 = vor.u32 4788187, %v1493_v14  ;;  %v3141_v37 = vshrl.u32 %v3140_v43, 30  ;;  %v5058_v55 = vsel %vm5057_vm3, %v5056_v18, 0 }
 0x241   : > { %7528 = vst.msk [vmem:[#allocation2 + $0x80] sm:$0xf] %vm7504_vm0, %v6590_v61  ;;  %v5060_v48 = vand.u32 31, %v5058_v55  ;;  %v1497_v51 = vcvt.s32.f32 %v1490_v46  ;;  %vm3081_vm4 = vcmp.lt.s32.totalorder %v10400_v8, 0  ;;  %v10615_v53 = vrot.slane %v498_v27, %v9077_v21 }
 0x242   : > { %v1495_v26 = vand.u32 2147483647, %v1494_v59  ;;  %v3142_v38 = vshll.u32 %v3141_v37, 30  ;;  %v3135_v25 = vadd.s32 %v10554_v36, %v10577_v28  ;;  %v5054_v63 = vor.u32 8388608, %v5053_v32 }
 0x243   : > { %v5061_v23 = vsub.s32 32, %v5060_v48  ;;  %v6694_v9 = vand.u32 2147483647, %v10583_v35  ;;  %v5059_v22 = vshrl.u32 %v5058_v55, 5  ;;  %v8420_v40 = vadd.s32 4294967169, %v6698_v34 }
 0x244   : > { %v1498_v4 = vmul.f32 %v1497_v51, %v1495_v26  ;;  %v10620_v16 = vsub.s32 %v3139_v15, %v3142_v38  ;;  %v3165_v24 = vsub.s32 4, %v3141_v37  ;;  %v5063_v33 = vshll.u32 %v8889_v54, %v5060_v48 }
 0x245   : > { %v5064_v10 = vshrl.u32 %v8890_v56, %v5061_v23  ;;  %v5067_v50 = vshrl.u32 %v8891_v58, %v5061_v23  ;;  %v5066_v36 = vshll.u32 %v8890_v56, %v5060_v48  ;;  %v5070_v28 = vshrl.u32 %v8892_v60, %v5061_v23 }
 0x246   : > { %v1499_v45 = vxor.u32 2147483648, %v1498_v4  ;;  %v3145_v52 = vsub.s32 0, %v10620_v16  ;;  %v5069_v29 = vshll.u32 %v8891_v58, %v5060_v48  ;;  %v5072_v44 = vshll.u32 %v8892_v60, %v5060_v48 }
 0x247   : > { %v5065_v5 = vor.u32 %v5064_v10, %v5063_v33  ;;  %v5073_v49 = vshrl.u32 %v8893_v62, %v5061_v23  ;;  %v5068_v7 = vor.u32 %v5067_v50, %v5066_v36  ;;  %v5075_v15 = vshll.u32 %v8893_v62, %v5060_v48 }
 0x248   : > { %v1500_v31 = vsel %vm1417_vm12, %v1499_v45, %v1498_v4  ;;  %v8281_v41 = vmin.u32 %v3145_v52, %v10620_v16  ;;  %v5071_v6 = vor.u32 %v5070_v28, %v5069_v29  ;;  %v5076_v19 = vshrl.u32 %v8894_v11, %v5061_v23 }
 0x249   : > { %v1503_v57 = vsel %vm10588_vm11, %v10343_v30, %v1500_v31  ;;  %v5074_v18 = vor.u32 %v5073_v49, %v5072_v44  ;;  %v5094_v14 = vshll.u32 %v5054_v63, 8  ;;  %v6704_v43 = vadd.s32 1, %v8420_v40 }
 0x24a   : > { %8748 = vcosq.f32 %v1503_v57  ;;  %v3147_v46 = vclz %v8281_v41  ;;  %v3166_v61 = vsel %vm3081_vm4, %v3165_v24, %v3141_v37  ;;  %v5062_v32 = vshrl.u32 %v8889_v54, %v5061_v23 }
 0x24b   : > { %8750 = vsinq.f32 %v1503_v57  ;;  %v5077_v27 = vor.u32 %v5076_v19, %v5075_v15  ;;  %vm10644_vm5 = vcmp.le.f32.partialorder %v3079_v47, 0.7853982  ;;  %vm5078_vm6 = vcmp.lt.s32.totalorder %v5059_v22, 1 }
 0x24c   : > { %v8282_v59 = vadd.s32 4294967294, %v3147_v46  ;;  %vm5080_vm7 = vcmp.lt.s32.totalorder %v5059_v22, 3  ;;  %vm5081_vm8 = vcmp.lt.s32.totalorder %v5059_v22, 4  ;;  %v5086_v34 = vsel %vm5078_vm6, %v5065_v5, %v5068_v7 }
 0x24d   : > { %v5083_v55 = vsel %vm5081_vm8, %v5071_v6, 2102212464  ;;  %v5087_v48 = vsel %vm5081_vm8, %v5074_v18, 920167782  ;;  %v5090_v26 = vsel %vm5078_vm6, %v5068_v7, %v5071_v6  ;;  %vm5079_vm12 = vcmp.lt.s32.totalorder %v5059_v22, 2 }
 0x24e   : > { %vm8283_vm9 = vcmp.lt.s32.totalorder %v8282_v59, 0  ;;  %v5088_v37 = vsel %vm5080_vm7, %v5071_v6, %v5087_v48  ;;  %v5091_v51 = vsel %vm5081_vm8, %v5077_v27, 1326507024  ;;  %v5082_v63 = vsel %vm5078_vm6, %v5062_v32, %v5065_v5 }
 0x24f   : > { %v3150_v38 = vsel %vm8283_vm9, 0, %v8282_v59  ;;  %v5089_v47 = vsel %vm5079_vm12, %v5086_v34, %v5088_v37  ;;  %v5092_v23 = vsel %vm5080_vm7, %v5074_v18, %v5091_v51  ;;  %v5084_v24 = vsel %vm5080_vm7, %v5068_v7, %v5083_v55 }
 0x250   : > { %v3151_v4 = vsub.s32 32, %v3150_v38  ;;  %v3155_v40 = vsub.s32 4294967266, %v3150_v38  ;;  %v5093_v33 = vsel %vm5079_vm12, %v5090_v26, %v5092_v23  ;;  %vm1507_vm13 = vweird.f32 %v10343_v30 }
 0x251   : > { %v10654_v10 = vmul.u32.u64.low %v5094_v14, %v5093_v33  ;;  %v10655_v50 = vmul.u32.u64.high %v5094_v14, %v5093_v33, %v10654_v10  ;;  %v10657_v45 = vmul.u32.u64.low %v5094_v14, %v5089_v47  ;;  %v10658_v52 = vmul.u32.u64.high %v5094_v14, %v5089_v47, %v10657_v45 }
 0x252   : > { %v3152_v36 = vshll.u32 %v10620_v16, %v3150_v38  ;;  %v3153_v28 = vshrl.u32 %v3135_v25, %v3151_v4  ;;  %v3156_v5 = vadd.s32 127, %v3155_v40  ;;  %vm6705_vm14 = vcmp.gt.s32.totalorder %v6704_v43, 0 }
 0x253   : > { %vm1510_vm10 = vcmp.lt.s32.totalorder %v10611_v42, 2  ;;  %v5085_v29 = vsel %vm5079_vm12, %v5082_v63, %v5084_v24  ;;  %v6701_v44 = vand.u32 8388607, %v6694_v9  ;;  %v6706_v49 = vsel %vm6705_vm14, %v6704_v43, 0 }
 0x254   : > { %v8749_v31 = vpop.eup %8748  ;;  %vm1514_vm11 = vcmp.eq.s32.totalorder %v10611_v42, 2  ;;  %v3154_v41 = vor.u32 %v3153_v28, %v3152_v36  ;;  %v3157_v7 = vshll.u32 %v3156_v5, 23  ;;  %v6708_v15 = vand.u32 31, %v6706_v49 }
 0x255   : > { %v8751_v57 = vpop.eup %8750  ;;  %v1515_v6 = vxor.u32 2147483648, %v8749_v31  ;;  %v3168_v25 = vsel %vm10644_vm5, 0, %v3166_v61  ;;  %vm5103_vm15 = vc.u32 %v10655_v50, %v10657_v45  ;;  %v5104_v16 = vadd.s32 1, %v10658_v52 }
 0x256   : > { %v1512_v22 = vxor.u32 2147483648, %v8751_v57  ;;  %v3158_v18 = vor.u32 4788187, %v3157_v7  ;;  %v5101_v19 = vmul.u32 %v5094_v14, %v5085_v29  ;;  %v6709_v46 = vsub.s32 32, %v6708_v15 }
 0x257   : > { %vm1511_vm1 = vcmp.eq.s32.totalorder %v10611_v42, 0  ;;  %v1516_v43 = vsel %vm1514_vm11, %v1515_v6, %v8751_v57  ;;  %v5105_v32 = vsel %vm5103_vm15, %v5104_v16, %v10658_v52  ;;  %v6702_v27 = vor.u32 8388608, %v6701_v44 }
 0x258   : > { %v1513_v59 = vsel %vm1511_vm1, %v8749_v31, %v1512_v22  ;;  %v3159_v55 = vand.u32 2147483647, %v3158_v18  ;;  %v3161_v34 = vcvt.s32.f32 %v3154_v41  ;;  %v5106_v48 = vadd.s32 %v5105_v32, %v5101_v19 }
 0x259   : > { %v1517_v61 = vsel %vm1510_vm10, %v1513_v59, %v1516_v43  ;;  %v3172_v26 = vadd.s32 3, %v3168_v25  ;;  %v6712_v37 = vshrl.u32 %v8890_v56, %v6709_v46  ;;  %v6715_v51 = vshrl.u32 %v8891_v58, %v6709_v46 }
 0x25a   : > { %v1518_v14 = vsel %vm1507_vm13, nan, %v1517_v61  ;;  %v3162_v38 = vmul.f32 %v3161_v34, %v3159_v55  ;;  %v5107_v63 = vadd.s32 536870912, %v5106_v48  ;;  %v6718_v47 = vshrl.u32 %v8892_v60, %v6709_v46 }
 0x25b   : > { %7511 = vst.msk [vmem:[#allocation2 + $0x18] sm:$0xf] %vm7504_vm0, %v1518_v14  ;;  %v6707_v23 = vshrl.u32 %v6706_v49, 5  ;;  %v6711_v4 = vshll.u32 %v8889_v54, %v6708_v15  ;;  %v6717_v42 = vshll.u32 %v8891_v58, %v6708_v15  ;;  %v6721_v40 = vshrl.u32 %v8893_v62, %v6709_v46 }
 0x25c   : > { %v3163_v24 = vxor.u32 2147483648, %v3162_v38  ;;  %v5108_v33 = vshrl.u32 %v5107_v63, 30  ;;  %v6714_v10 = vshll.u32 %v8890_v56, %v6708_v15  ;;  %v6720_v30 = vshll.u32 %v8892_v60, %v6708_v15 }
 0x25d   : > { %v6713_v52 = vor.u32 %v6712_v37, %v6711_v4  ;;  %v6719_v36 = vor.u32 %v6718_v47, %v6717_v42  ;;  %v6723_v28 = vshll.u32 %v8893_v62, %v6708_v15  ;;  %v6724_v5 = vshrl.u32 %v8894_v11, %v6709_v46 }
 0x25e   : > { %v3164_v29 = vsel %vm3081_vm4, %v3163_v24, %v3162_v38  ;;  %v5109_v44 = vshll.u32 %v5108_v33, 30  ;;  %v6716_v49 = vor.u32 %v6715_v51, %v6714_v10  ;;  %v6722_v31 = vor.u32 %v6721_v40, %v6720_v30 }
 0x25f   : > { %v3167_v41 = vsel %vm10644_vm5, %v10400_v8, %v3164_v29  ;;  %v10694_v7 = vand.u32 3, %v3172_v26  ;;  %v6725_v57 = vor.u32 %v6724_v5, %v6723_v28  ;;  %v10696_v6 = vshll.u32 %v6702_v27, 8 }
 0x260   : > { %8752 = vcosq.f32 %v3167_v41  ;;  %vm5048_vm2 = vcmp.lt.s32.totalorder %v10570_v20, 0  ;;  %v10699_v15 = vsub.s32 %v5106_v48, %v5109_v44  ;;  %vm6729_vm3 = vcmp.lt.s32.totalorder %v6707_v23, 4 }
 0x261   : > { %v575_v25 = vmul.f32 %v10615_v53, %v9188_v12  ;;  %8754 = vsinq.f32 %v3167_v41  ;;  %v6710_v16 = vshrl.u32 %v8889_v54, %v6709_v46  ;;  %vm6726_vm4 = vcmp.lt.s32.totalorder %v6707_v23, 1 }
 0x262   : > { %v6731_v39 = vsel %vm6729_vm3, %v6719_v36, 2102212464  ;;  %v5112_v22 = vsub.s32 0, %v10699_v15  ;;  %vm6728_vm5 = vcmp.lt.s32.totalorder %v6707_v23, 3  ;;  %v6734_v18 = vsel %vm6726_vm4, %v6713_v52, %v6716_v49 }
 0x263   : > { %v6735_v19 = vsel %vm6729_vm3, %v6722_v31, 920167782  ;;  %v6738_v32 = vsel %vm6726_vm4, %v6716_v49, %v6719_v36  ;;  %v6739_v27 = vsel %vm6729_vm3, %v6725_v57, 1326507024  ;;  %v591_v59 = vmul.f32 %v10615_v53, %v9190_v13 }
 0x264   : > { %v6736_v43 = vsel %vm6728_vm5, %v6719_v36, %v6735_v19  ;;  %v8357_v55 = vmin.u32 %v5112_v22, %v10699_v15  ;;  %vm6727_vm6 = vcmp.lt.s32.totalorder %v6707_v23, 2  ;;  %v6730_v34 = vsel %vm6726_vm4, %v6710_v16, %v6713_v52 }
 0x265   : > { %v6732_v48 = vsel %vm6728_vm5, %v6716_v49, %v6731_v39  ;;  %v5132_v61 = vsub.s32 4, %v5108_v33  ;;  %v6737_v46 = vsel %vm6727_vm6, %v6734_v18, %v6736_v43  ;;  %v6740_v26 = vsel %vm6728_vm5, %v6722_v31, %v6739_v27 }
 0x266   : > { %v10709_v37 = vrot.slane %v575_v25, %v9077_v21  ;;  %v5114_v51 = vclz %v8357_v55  ;;  %v6741_v14 = vsel %vm6727_vm6, %v6738_v32, %v6740_v26  ;;  %v6733_v47 = vsel %vm6727_vm6, %v6730_v34, %v6732_v48  ;;  %v525_v48 = vpop.permute.xlu1 %524 }
 0x267   : > { %v10712_v38 = vmul.u32.u64.low %v10696_v6, %v6737_v46  ;;  %v10713_v63 = vmul.u32.u64.high %v10696_v6, %v6737_v46, %v10712_v38  ;;  %v10716_v53 = vmul.u32.u64.low %v10696_v6, %v6741_v14  ;;  %v10717_v4 = vmul.u32.u64.high %v10696_v6, %v6741_v14, %v10716_v53 }
 0x268   : > { %v1623_v23 = vand.u32 2147483647, %v10709_v37  ;;  %vm3174_vm7 = vcmp.lt.s32.totalorder %v10694_v7, 2  ;;  %v8358_v42 = vadd.s32 4294967294, %v5114_v51  ;;  %v10722_v40 = vrot.slane %v591_v59, %v9077_v21 }
 0x269   : > { %v1626_v24 = vand.u32 2139095040, %v10709_v37  ;;  %vm3175_vm8 = vcmp.eq.s32.totalorder %v10694_v7, 0  ;;  %vm3178_vm9 = vcmp.eq.s32.totalorder %v10694_v7, 2  ;;  %v5102_v10 = vadd.s32 %v10657_v45, %v10655_v50 }
 0x26a   : > { %v5133_v30 = vsel %vm5048_vm2, %v5132_v61, %v5108_v33  ;;  %v8753_v52 = vpop.eup %8752  ;;  %vm8359_vm12 = vcmp.lt.s32.totalorder %v8358_v42, 0  ;;  %v6749_v36 = vmul.u32 %v10696_v6, %v6733_v47  ;;  %v6752_v28 = vadd.s32 1, %v10713_v63 }
 0x26b   : > { %v1627_v5 = vshrl.u32 %v1626_v24, 23  ;;  %v8755_v29 = vpop.eup %8754  ;;  %v3179_v44 = vxor.u32 2147483648, %v8753_v52  ;;  %v5117_v49 = vsel %vm8359_vm12, 0, %v8358_v42  ;;  %vm6751_vm13 = vc.u32 %v10717_v4, %v10712_v38 }
 0x26c   : > { %v1630_v31 = vand.u32 8388607, %v1623_v23  ;;  %v3176_v41 = vxor.u32 2147483648, %v8755_v29  ;;  %v5118_v50 = vsub.s32 32, %v5117_v49  ;;  %v5122_v45 = vsub.s32 4294967266, %v5117_v49 }
 0x26d   : > { %v3290_v33 = vand.u32 2139095040, %v10722_v40  ;;  %v3180_v57 = vsel %vm3178_vm9, %v3179_v44, %v8755_v29  ;;  %v5119_v6 = vshll.u32 %v10699_v15, %v5117_v49  ;;  %v6753_v25 = vsel %vm6751_vm13, %v6752_v28, %v10713_v63 }
 0x26e   : > { %v8224_v16 = vadd.s32 4294967169, %v1627_v5  ;;  %v3177_v39 = vsel %vm3175_vm8, %v8753_v52, %v3176_v41  ;;  %v5120_v22 = vshrl.u32 %v5102_v10, %v5118_v50  ;;  %v5123_v18 = vadd.s32 127, %v5122_v45 }
 0x26f   : > { %v6754_v19 = vadd.s32 %v6753_v25, %v6749_v36  ;;  %vm3171_vm14 = vweird.f32 %v10400_v8  ;;  %v3181_v43 = vsel %vm3174_vm7, %v3177_v39, %v3180_v57  ;;  %vm10748_vm10 = vcmp.le.f32.partialorder %v5046_v17, 0.7853982 }
 0x270   : > { %v1633_v15 = vadd.s32 1, %v8224_v16  ;;  %v3182_v27 = vsel %vm3171_vm14, nan, %v3181_v43  ;;  %v5121_v59 = vor.u32 %v5120_v22, %v5119_v6  ;;  %v5124_v55 = vshll.u32 %v5123_v18, 23 }
 0x271   : > { %v6755_v34 = vadd.s32 536870912, %v6754_v19  ;;  %7527 = vst.msk [vmem:[#allocation2 + $0x7c] sm:$0xf] %vm7504_vm0, %v3182_v27  ;;  %v5135_v8 = vsel %vm10748_vm10, 0, %v5133_v30  ;;  %v1631_v61 = vor.u32 8388608, %v1630_v31  ;;  %v3291_v51 = vshrl.u32 %v3290_v33, 23 }
 0x272   : > { %vm1634_vm11 = vcmp.gt.s32.totalorder %v1633_v15, 0  ;;  %v3287_v7 = vand.u32 2147483647, %v10722_v40  ;;  %v5125_v46 = vor.u32 4788187, %v5124_v55  ;;  %v10757_v63 = vrot.slane %v525_v48, %v9077_v21 }
 0x273   : > { %v6756_v17 = vshrl.u32 %v6755_v34, 30  ;;  %v1635_v26 = vsel %vm1634_vm11, %v1633_v15, 0  ;;  %v5128_v53 = vcvt.s32.f32 %v5121_v59  ;;  %vm6696_vm15 = vcmp.lt.s32.totalorder %v10583_v35, 0 }
 0x274   : > { %v1637_v14 = vand.u32 31, %v1635_v26  ;;  %v5126_v47 = vand.u32 2147483647, %v5125_v46  ;;  %v10760_v24 = vand.u32 3, %v5135_v8  ;;  %v6750_v10 = vadd.s32 %v10712_v38, %v10717_v4 }
 0x275   : > { %v6757_v42 = vshll.u32 %v6756_v17, 30  ;;  %v10763_v52 = vshll.u32 %v1631_v61, 8  ;;  %v8288_v5 = vadd.s32 4294967169, %v3291_v51  ;;  %v10769_v29 = vand.u32 8388607, %v3287_v7 }
 0x276   : > { %v1638_v30 = vsub.s32 32, %v1637_v14  ;;  %v5129_v36 = vmul.f32 %v5128_v53, %v5126_v47  ;;  %v6780_v44 = vsub.s32 4, %v6756_v17  ;;  %v1636_v49 = vshrl.u32 %v1635_v26, 5 }
 0x277   : > { %v10765_v28 = vsub.s32 %v6754_v19, %v6757_v42  ;;  %v1640_v4 = vshll.u32 %v8889_v54, %v1637_v14  ;;  %v1643_v33 = vshll.u32 %v8890_v56, %v1637_v14  ;;  %v1646_v57 = vshll.u32 %v8891_v58, %v1637_v14 }
 0x278   : > { %v1641_v31 = vshrl.u32 %v8890_v56, %v1638_v30  ;;  %v1644_v41 = vshrl.u32 %v8891_v58, %v1638_v30  ;;  %v5130_v50 = vxor.u32 2147483648, %v5129_v36  ;;  %v1647_v45 = vshrl.u32 %v8892_v60, %v1638_v30 }
 0x279   : > { %v6760_v38 = vsub.s32 0, %v10765_v28  ;;  %v1649_v6 = vshll.u32 %v8892_v60, %v1637_v14  ;;  %v1650_v25 = vshrl.u32 %v8893_v62, %v1638_v30  ;;  %v3297_v18 = vadd.s32 1, %v8288_v5 }
 0x27a   : > { %v5131_v16 = vsel %vm5048_vm2, %v5130_v50, %v5129_v36  ;;  %v1642_v22 = vor.u32 %v1641_v31, %v1640_v4  ;;  %v1645_v43 = vor.u32 %v1644_v41, %v1643_v33  ;;  %v1648_v15 = vor.u32 %v1647_v45, %v1646_v57 }
 0x27b   : > { %v8421_v39 = vmin.u32 %v6760_v38, %v10765_v28  ;;  %v5134_v19 = vsel %vm10748_vm10, %v10570_v20, %v5131_v16  ;;  %v1651_v27 = vor.u32 %v1650_v25, %v1649_v6  ;;  %v1652_v55 = vshll.u32 %v8893_v62, %v1637_v14 }
 0x27c   : > { %8756 = vcosq.f32 %v5134_v19  ;;  %v1653_v34 = vshrl.u32 %v8894_v11, %v1638_v30  ;;  %vm10790_vm1 = vcmp.le.f32.partialorder %v6694_v9, 0.7853982  ;;  %v6781_v32 = vsel %vm6696_vm15, %v6780_v44, %v6756_v17 }
 0x27d   : > { %v6762_v59 = vclz %v8421_v39  ;;  %8758 = vsinq.f32 %v5134_v19  ;;  %v1639_v8 = vshrl.u32 %v8889_v54, %v1638_v30  ;;  %vm1655_vm2 = vcmp.lt.s32.totalorder %v1636_v49, 1 }
 0x27e   : > { %v1654_v46 = vor.u32 %v1653_v34, %v1652_v55  ;;  %vm1657_vm3 = vcmp.lt.s32.totalorder %v1636_v49, 3  ;;  %vm1658_vm4 = vcmp.lt.s32.totalorder %v1636_v49, 4  ;;  %v1663_v51 = vsel %vm1655_vm2, %v1642_v22, %v1645_v43 }
 0x27f   : > { %v8422_v61 = vadd.s32 4294967294, %v6762_v59  ;;  %v1660_v26 = vsel %vm1658_vm4, %v1648_v15, 2102212464  ;;  %v1664_v14 = vsel %vm1658_vm4, %v1651_v27, 920167782  ;;  %v1667_v47 = vsel %vm1655_vm2, %v1645_v43, %v1648_v15 }
 0x280   : > { %vm1656_vm6 = vcmp.lt.s32.totalorder %v1636_v49, 2  ;;  %v1665_v9 = vsel %vm1657_vm3, %v1648_v15, %v1664_v14  ;;  %v1668_v53 = vsel %vm1658_vm4, %v1654_v46, 1326507024  ;;  %vm5141_vm7 = vcmp.eq.s32.totalorder %v10760_v24, 0 }
 0x281   : > { %vm8423_vm5 = vcmp.lt.s32.totalorder %v8422_v61, 0  ;;  %v1659_v17 = vsel %vm1655_vm2, %v1639_v8, %v1642_v22  ;;  %v1666_v30 = vsel %vm1656_vm6, %v1663_v51, %v1665_v9  ;;  %v1669_v36 = vsel %vm1657_vm3, %v1651_v27, %v1668_v53 }
 0x282   : > { %v6765_v42 = vsel %vm8423_vm5, 0, %v8422_v61  ;;  %vm5140_vm8 = vcmp.lt.s32.totalorder %v10760_v24, 2  ;;  %v1661_v31 = vsel %vm1657_vm3, %v1645_v43, %v1660_v26  ;;  %v1670_v41 = vsel %vm1656_vm6, %v1667_v47, %v1669_v36 }
 0x283   : > { %v6766_v5 = vsub.s32 32, %v6765_v42  ;;  %v6770_v44 = vsub.s32 4294967266, %v6765_v42  ;;  %vm5138_vm9 = vweird.f32 %v10570_v20  ;;  %v6767_v33 = vshll.u32 %v10765_v28, %v6765_v42 }
 0x284   : > { %v10806_v50 = vmul.u32.u64.low %v10763_v52, %v1670_v41  ;;  %v10807_v38 = vmul.u32.u64.high %v10763_v52, %v1670_v41, %v10806_v50  ;;  %v10810_v4 = vmul.u32.u64.low %v10763_v52, %v1666_v30  ;;  %v10811_v45 = vmul.u32.u64.high %v10763_v52, %v1666_v30, %v10810_v4 }
 0x285   : > { %v6768_v57 = vshrl.u32 %v6750_v10, %v6766_v5  ;;  %v6771_v6 = vadd.s32 127, %v6770_v44  ;;  %vm3298_vm12 = vcmp.gt.s32.totalorder %v3297_v18, 0  ;;  %vm5144_vm13 = vcmp.eq.s32.totalorder %v10760_v24, 2 }
 0x286   : > { %v1662_v25 = vsel %vm1656_vm6, %v1659_v17, %v1661_v31  ;;  %v3295_v16 = vor.u32 8388608, %v10769_v29  ;;  %v3299_v39 = vsel %vm3298_vm12, %v3297_v18, 0  ;;  %v8757_v22 = vpop.eup %8756  ;;  %v6783_v15 = vsel %vm10790_vm1, 0, %v6781_v32 }
 0x287   : > { %v6769_v19 = vor.u32 %v6768_v57, %v6767_v33  ;;  %v6772_v43 = vshll.u32 %v6771_v6, 23  ;;  %v3301_v27 = vand.u32 31, %v3299_v39  ;;  %v8759_v59 = vpop.eup %8758  ;;  %v5145_v55 = vxor.u32 2147483648, %v8757_v22 }
 0x288   : > { %vm1680_vm14 = vc.u32 %v10807_v38, %v10810_v4  ;;  %v1681_v10 = vadd.s32 1, %v10811_v45  ;;  %v578_v28 = vmul.f32 %v10757_v63, %v9188_v12  ;;  %v5142_v49 = vxor.u32 2147483648, %v8759_v59 }
 0x289   : > { %v6773_v29 = vor.u32 4788187, %v6772_v43  ;;  %v1678_v18 = vmul.u32 %v10763_v52, %v1662_v25  ;;  %v3302_v34 = vsub.s32 32, %v3301_v27  ;;  %v5146_v8 = vsel %vm5144_vm13, %v5145_v55, %v8759_v59 }
 0x28a   : > { %v10828_v32 = vand.u32 3, %v6783_v15  ;;  %v1682_v61 = vsel %vm1680_vm14, %v1681_v10, %v10811_v45  ;;  %v10831_v46 = vshll.u32 %v3295_v16, 8  ;;  %v5143_v26 = vsel %vm5141_vm7, %v8757_v22, %v5142_v49 }
 0x28b   : > { %v6774_v51 = vand.u32 2147483647, %v6773_v29  ;;  %v6776_v14 = vcvt.s32.f32 %v6769_v19  ;;  %v1683_v47 = vadd.s32 %v1682_v61, %v1678_v18  ;;  %v5147_v9 = vsel %vm5140_vm8, %v5143_v26, %v5146_v8 }
 0x28c   : > { %v3304_v52 = vshll.u32 %v8889_v54, %v3301_v27  ;;  %v3305_v53 = vshrl.u32 %v8890_v56, %v3302_v34  ;;  %v3308_v42 = vshrl.u32 %v8891_v58, %v3302_v34  ;;  %v5148_v17 = vsel %vm5138_vm9, nan, %v5147_v9 }
 0x28d   : > { %v6777_v30 = vmul.f32 %v6776_v14, %v6774_v51  ;;  %v1684_v36 = vadd.s32 536870912, %v1683_v47  ;;  %v3311_v5 = vshrl.u32 %v8892_v60, %v3302_v34  ;;  %7514 = vst.msk [vmem:[#allocation2 + $0x24] sm:$0xf] %vm7504_vm0, %v5148_v17  ;;  %v3300_v44 = vshrl.u32 %v3299_v39, 5 }
 0x28e   : > { %v3307_v31 = vshll.u32 %v8890_v56, %v3301_v27  ;;  %v3310_v24 = vshll.u32 %v8891_v58, %v3301_v27  ;;  %v3314_v41 = vshrl.u32 %v8893_v62, %v3302_v34  ;;  %v3306_v33 = vor.u32 %v3305_v53, %v3304_v52 }
 0x28f   : > { %v6778_v50 = vxor.u32 2147483648, %v6777_v30  ;;  %v1685_v45 = vshrl.u32 %v1684_v36, 30  ;;  %v3313_v57 = vshll.u32 %v8892_v60, %v3301_v27  ;;  %v3316_v25 = vshll.u32 %v8893_v62, %v3301_v27 }
 0x290   : > { %v3309_v20 = vor.u32 %v3308_v42, %v3307_v31  ;;  %v3312_v6 = vor.u32 %v3311_v5, %v3310_v24  ;;  %v3317_v16 = vshrl.u32 %v8894_v11, %v3302_v34  ;;  %v594_v43 = vmul.f32 %v10757_v63, %v9190_v13 }
 0x291   : > { %v6779_v39 = vsel %vm6696_vm15, %v6778_v50, %v6777_v30  ;;  %v1686_v22 = vshll.u32 %v1685_v45, 30  ;;  %v3315_v19 = vor.u32 %v3314_v41, %v3313_v57  ;;  %v3303_v59 = vshrl.u32 %v8889_v54, %v3302_v34 }
 0x292   : > { %v6782_v15 = vsel %vm10790_vm1, %v10583_v35, %v6779_v39  ;;  %v3318_v55 = vor.u32 %v3317_v16, %v3316_v25  ;;  %v10859_v10 = vrot.slane %v578_v28, %v9077_v21  ;;  %vm3319_vm10 = vcmp.lt.s32.totalorder %v3300_v44, 1 }
 0x293   : > { %8760 = vcosq.f32 %v6782_v15  ;;  %v10861_v27 = vsub.s32 %v1683_v47, %v1686_v22  ;;  %vm3322_vm11 = vcmp.lt.s32.totalorder %v3300_v44, 4  ;;  %vm3320_vm15 = vcmp.lt.s32.totalorder %v3300_v44, 2 }
 0x294   : > { %8762 = vsinq.f32 %v6782_v15  ;;  %v3324_v49 = vsel %vm3322_vm11, %v3312_v6, 2102212464  ;;  %v3327_v29 = vsel %vm3319_vm10, %v3306_v33, %v3309_v20  ;;  %v1709_v18 = vsub.s32 4, %v1685_v45 }
 0x295   : > { %v1689_v63 = vsub.s32 0, %v10861_v27  ;;  %vm3321_vm2 = vcmp.lt.s32.totalorder %v3300_v44, 3  ;;  %v3328_v48 = vsel %vm3322_vm11, %v3315_v19, 920167782  ;;  %v3323_v8 = vsel %vm3319_vm10, %v3303_v59, %v3306_v33 }
 0x296   : > { %v3329_v34 = vsel %vm3321_vm2, %v3312_v6, %v3328_v48  ;;  %v3331_v61 = vsel %vm3319_vm10, %v3309_v20, %v3312_v6  ;;  %v3332_v26 = vsel %vm3322_vm11, %v3318_v55, 1326507024  ;;  %v3325_v51 = vsel %vm3321_vm2, %v3309_v20, %v3324_v49 }
 0x297   : > { %v8225_v28 = vmin.u32 %v1689_v63, %v10861_v27  ;;  %v3330_v14 = vsel %vm3320_vm15, %v3327_v29, %v3329_v34  ;;  %v3333_v47 = vsel %vm3321_vm2, %v3315_v19, %v3332_v26  ;;  %vm10873_vm1 = vcmp.le.f32.partialorder %v1623_v23, 0.7853982 }
 0x298   : > { %v3334_v9 = vsel %vm3320_vm15, %v3331_v61, %v3333_v47  ;;  %v10868_v52 = vmul.u32.u64.low %v10831_v46, %v3330_v14  ;;  %v10869_v53 = vmul.u32.u64.high %v10831_v46, %v3330_v14, %v10868_v52  ;;  %vm1625_vm3 = vcmp.lt.s32.totalorder %v10709_v37, 0 }
 0x299   : > { %v1691_v17 = vclz %v8225_v28  ;;  %v1710_v30 = vsel %vm1625_vm3, %v1709_v18, %v1685_v45  ;;  %v3326_v36 = vsel %vm3320_vm15, %v3323_v8, %v3325_v51  ;;  %vm6788_vm4 = vcmp.lt.s32.totalorder %v10828_v32, 2  ;;  %v516_v28 = vpop.permute.xlu0 %515 }
 0x29a   : > { %v10882_v5 = vmul.u32.u64.low %v10831_v46, %v3334_v9  ;;  %v10883_v31 = vmul.u32.u64.high %v10831_v46, %v3334_v9, %v10882_v5  ;;  %v10887_v23 = vrot.slane %v594_v43, %v9077_v21  ;;  %v5255_v41 = vand.u32 2139095040, %v10859_v10 }
 0x29b   : > { %v8226_v24 = vadd.s32 4294967294, %v1691_v17  ;;  %vm6789_vm5 = vcmp.eq.s32.totalorder %v10828_v32, 0  ;;  %vm6792_vm6 = vcmp.eq.s32.totalorder %v10828_v32, 2  ;;  %v1679_v44 = vadd.s32 %v10810_v4, %v10807_v38 }
 0x29c   : > { %v3345_v50 = vadd.s32 1, %v10869_v53  ;;  %v1712_v33 = vsel %vm10873_vm1, 0, %v1710_v30  ;;  %v3342_v57 = vmul.u32 %v10831_v46, %v3326_v36  ;;  %v5256_v20 = vshrl.u32 %v5255_v41, 23 }
 0x29d   : > { %v8761_v45 = vpop.eup %8760  ;;  %vm8227_vm7 = vcmp.lt.s32.totalorder %v8226_v24, 0  ;;  %vm3344_vm8 = vc.u32 %v10883_v31, %v10868_v52  ;;  %v5252_v39 = vand.u32 2147483647, %v10859_v10  ;;  %v6903_v4 = vand.u32 2139095040, %v10887_v23 }
 0x29e   : > { %v8763_v6 = vpop.eup %8762  ;;  %v6793_v25 = vxor.u32 2147483648, %v8761_v45  ;;  %v1694_v16 = vsel %vm8227_vm7, 0, %v8226_v24  ;;  %v3346_v46 = vsel %vm3344_vm8, %v3345_v50, %v10869_v53  ;;  %v8364_v59 = vadd.s32 4294967169, %v5256_v20 }
 0x29f   : > { %v6790_v22 = vxor.u32 2147483648, %v8763_v6  ;;  %v1695_v19 = vsub.s32 32, %v1694_v16  ;;  %v1699_v38 = vsub.s32 4294967266, %v1694_v16  ;;  %v1696_v15 = vshll.u32 %v10861_v27, %v1694_v16 }
 0x2a0   : > { %v6794_v43 = vsel %vm6792_vm6, %v6793_v25, %v8763_v6  ;;  %v3347_v63 = vadd.s32 %v3346_v46, %v3342_v57  ;;  %vm6786_vm9 = vweird.f32 %v10583_v35  ;;  %v1716_v48 = vadd.s32 3, %v1712_v33 }
 0x2a1   : > { %v6791_v55 = vsel %vm6789_vm5, %v8761_v45, %v6790_v22  ;;  %v1697_v49 = vshrl.u32 %v1679_v44, %v1695_v19  ;;  %v1700_v29 = vadd.s32 127, %v1699_v38  ;;  %v5262_v8 = vadd.s32 1, %v8364_v59 }
 0x2a2   : > { %v6795_v18 = vsel %vm6788_vm4, %v6791_v55, %v6794_v43  ;;  %v3348_v27 = vadd.s32 536870912, %v3347_v63  ;;  %v5259_v51 = vand.u32 8388607, %v5252_v39  ;;  %v6904_v35 = vshrl.u32 %v6903_v4, 23 }
 0x2a3   : > { %v6796_v34 = vsel %vm6786_vm9, nan, %v6795_v18  ;;  %v1698_v61 = vor.u32 %v1697_v49, %v1696_v15  ;;  %v1701_v26 = vshll.u32 %v1700_v29, 23  ;;  %vm5263_vm12 = vcmp.gt.s32.totalorder %v5262_v8, 0 }
 0x2a4   : > { %7530 = vst.msk [vmem:[#allocation2 + $0x88] sm:$0xf] %vm7504_vm0, %v6796_v34  ;;  %v3349_v47 = vshrl.u32 %v3348_v27, 30  ;;  %v5264_v9 = vsel %vm5263_vm12, %v5262_v8, 0  ;;  %v10914_v32 = vrot.slane %v516_v28, %v9077_v21  ;;  %v10916_v36 = vand.u32 3, %v1716_v48 }
 0x2a5   : > { %v1702_v14 = vor.u32 4788187, %v1701_v26  ;;  %v5266_v53 = vand.u32 31, %v5264_v9  ;;  %v1705_v30 = vcvt.s32.f32 %v1698_v61  ;;  %vm3289_vm13 = vcmp.lt.s32.totalorder %v10722_v40, 0 }
 0x2a6   : > { %v3350_v5 = vshll.u32 %v3349_v47, 30  ;;  %v3343_v24 = vadd.s32 %v10868_v52, %v10883_v31  ;;  %v5260_v41 = vor.u32 8388608, %v5259_v51  ;;  %v6900_v50 = vand.u32 2147483647, %v10887_v23 }
 0x2a7   : > { %v1703_v17 = vand.u32 2147483647, %v1702_v14  ;;  %v5267_v44 = vsub.s32 32, %v5266_v53  ;;  %v5265_v57 = vshrl.u32 %v5264_v9, 5  ;;  %v8428_v20 = vadd.s32 4294967169, %v6904_v35 }
 0x2a8   : > { %v10921_v33 = vsub.s32 %v3347_v63, %v3350_v5  ;;  %v3373_v6 = vsub.s32 4, %v3349_v47  ;;  %v5269_v25 = vshll.u32 %v8889_v54, %v5266_v53  ;;  %v5272_v52 = vshll.u32 %v8890_v56, %v5266_v53 }
 0x2a9   : > { %v1706_v45 = vmul.f32 %v1705_v30, %v1703_v17  ;;  %v5270_v16 = vshrl.u32 %v8890_v56, %v5267_v44  ;;  %v5273_v22 = vshrl.u32 %v8891_v58, %v5267_v44  ;;  %v5276_v31 = vshrl.u32 %v8892_v60, %v5267_v44 }
 0x2aa   : > { %v3353_v38 = vsub.s32 0, %v10921_v33  ;;  %v5275_v43 = vshll.u32 %v8891_v58, %v5266_v53  ;;  %v5278_v15 = vshll.u32 %v8892_v60, %v5266_v53  ;;  %v5279_v46 = vshrl.u32 %v8893_v62, %v5267_v44 }
 0x2ab   : > { %v1707_v19 = vxor.u32 2147483648, %v1706_v45  ;;  %v5271_v4 = vor.u32 %v5270_v16, %v5269_v25  ;;  %v5274_v49 = vor.u32 %v5273_v22, %v5272_v52  ;;  %v5281_v29 = vshll.u32 %v8893_v62, %v5266_v53 }
 0x2ac   : > { %v8289_v55 = vmin.u32 %v3353_v38, %v10921_v33  ;;  %v5277_v18 = vor.u32 %v5276_v31, %v5275_v43  ;;  %v5280_v48 = vor.u32 %v5279_v46, %v5278_v15  ;;  %v5282_v8 = vshrl.u32 %v8894_v11, %v5267_v44 }
 0x2ad   : > { %v1708_v59 = vsel %vm1625_vm3, %v1707_v19, %v1706_v45  ;;  %v10940_v61 = vshll.u32 %v5260_v41, 8  ;;  %v6910_v26 = vadd.s32 1, %v8428_v20  ;;  %v3374_v27 = vsel %vm3289_vm13, %v3373_v6, %v3349_v47 }
 0x2ae   : > { %v1711_v63 = vsel %vm10873_vm1, %v10709_v37, %v1708_v59  ;;  %v3355_v34 = vclz %v8289_v55  ;;  %v5268_v28 = vshrl.u32 %v8889_v54, %v5267_v44  ;;  %v5283_v51 = vor.u32 %v5282_v8, %v5281_v29 }
 0x2af   : > { %8764 = vcosq.f32 %v1711_v63  ;;  %vm10947_vm14 = vcmp.le.f32.partialorder %v3287_v7, 0.7853982  ;;  %vm5284_vm10 = vcmp.lt.s32.totalorder %v5265_v57, 1  ;;  %vm5286_vm11 = vcmp.lt.s32.totalorder %v5265_v57, 3 }
 0x2b0   : > { %8766 = vsinq.f32 %v1711_v63  ;;  %v8290_v14 = vadd.s32 4294967294, %v3355_v34  ;;  %vm5287_vm15 = vcmp.lt.s32.totalorder %v5265_v57, 4  ;;  %v5292_v35 = vsel %vm5284_vm10, %v5271_v4, %v5274_v49 }
 0x2b1   : > { %v5289_v9 = vsel %vm5287_vm15, %v5277_v18, 2102212464  ;;  %v5293_v53 = vsel %vm5287_vm15, %v5280_v48, 920167782  ;;  %v5296_v17 = vsel %vm5284_vm10, %v5274_v49, %v5277_v18  ;;  %vm5285_vm1 = vcmp.lt.s32.totalorder %v5265_v57, 2 }
 0x2b2   : > { %vm8291_vm2 = vcmp.lt.s32.totalorder %v8290_v14, 0  ;;  %v5294_v47 = vsel %vm5286_vm11, %v5277_v18, %v5293_v53  ;;  %v5297_v30 = vsel %vm5287_vm15, %v5283_v51, 1326507024  ;;  %v5288_v41 = vsel %vm5284_vm10, %v5268_v28, %v5271_v4 }
 0x2b3   : > { %v3358_v5 = vsel %vm8291_vm2, 0, %v8290_v14  ;;  %v5295_v7 = vsel %vm5285_vm1, %v5292_v35, %v5294_v47  ;;  %v5298_v44 = vsel %vm5286_vm11, %v5280_v48, %v5297_v30  ;;  %vm1718_vm3 = vcmp.lt.s32.totalorder %v10916_v36, 2 }
 0x2b4   : > { %v3359_v45 = vsub.s32 32, %v3358_v5  ;;  %v3363_v20 = vsub.s32 4294967266, %v3358_v5  ;;  %v5290_v6 = vsel %vm5286_vm11, %v5274_v49, %v5289_v9  ;;  %v5299_v25 = vsel %vm5285_vm1, %v5296_v17, %v5298_v44 }
 0x2b5   : > { %vm1715_vm4 = vweird.f32 %v10709_v37  ;;  %v10959_v16 = vmul.u32.u64.low %v10940_v61, %v5299_v25  ;;  %v10960_v22 = vmul.u32.u64.high %v10940_v61, %v5299_v25, %v10959_v16  ;;  %v3360_v52 = vshll.u32 %v10921_v33, %v3358_v5 }
 0x2b6   : > { %v10963_v19 = vmul.u32.u64.low %v10940_v61, %v5295_v7  ;;  %v10964_v38 = vmul.u32.u64.high %v10940_v61, %v5295_v7, %v10963_v19  ;;  %v3361_v31 = vshrl.u32 %v3343_v24, %v3359_v45  ;;  %v3364_v4 = vadd.s32 127, %v3363_v20 }
 0x2b7   : > { %vm6911_vm5 = vcmp.gt.s32.totalorder %v6910_v26, 0  ;;  %vm1719_vm6 = vcmp.eq.s32.totalorder %v10916_v36, 0  ;;  %v5291_v43 = vsel %vm5285_vm1, %v5288_v41, %v5290_v6  ;;  %v6907_v15 = vand.u32 8388607, %v6900_v50 }
 0x2b8   : > { %v6912_v46 = vsel %vm6911_vm5, %v6910_v26, 0  ;;  %vm1722_vm7 = vcmp.eq.s32.totalorder %v10916_v36, 2  ;;  %v3362_v55 = vor.u32 %v3361_v31, %v3360_v52  ;;  %v3365_v49 = vshll.u32 %v3364_v4, 23 }
 0x2b9   : > { %v8765_v59 = vpop.eup %8764  ;;  %v6914_v29 = vand.u32 31, %v6912_v46  ;;  %v3376_v24 = vsel %vm10947_vm14, 0, %v3374_v27  ;;  %vm5309_vm8 = vc.u32 %v10960_v22, %v10963_v19  ;;  %v5310_v33 = vadd.s32 1, %v10964_v38 }
 0x2ba   : > { %v8767_v63 = vpop.eup %8766  ;;  %v1723_v18 = vxor.u32 2147483648, %v8765_v59  ;;  %v3366_v48 = vor.u32 4788187, %v3365_v49  ;;  %v5307_v8 = vmul.u32 %v10940_v61, %v5291_v43  ;;  %v6908_v51 = vor.u32 8388608, %v6907_v15 }
 0x2bb   : > { %v1720_v57 = vxor.u32 2147483648, %v8767_v63  ;;  %v6915_v34 = vsub.s32 32, %v6914_v29  ;;  %v5311_v28 = vsel %vm5309_vm8, %v5310_v33, %v10964_v38  ;;  %v577_v14 = vmul.f32 %v10914_v32, %v9188_v12 }
 0x2bc   : > { %v1724_v26 = vsel %vm1722_vm7, %v1723_v18, %v8767_v63  ;;  %v3367_v9 = vand.u32 2147483647, %v3366_v48  ;;  %v3369_v35 = vcvt.s32.f32 %v3362_v55  ;;  %v5312_v53 = vadd.s32 %v5311_v28, %v5307_v8 }
 0x2bd   : > { %v1721_v27 = vsel %vm1719_vm6, %v8765_v59, %v1720_v57  ;;  %v3380_v47 = vadd.s32 3, %v3376_v24  ;;  %v6918_v61 = vshrl.u32 %v8890_v56, %v6915_v34  ;;  %v6921_v30 = vshrl.u32 %v8891_v58, %v6915_v34 }
 0x2be   : > { %v1725_v17 = vsel %vm1718_vm3, %v1721_v27, %v1724_v26  ;;  %v3370_v41 = vmul.f32 %v3369_v35, %v3367_v9  ;;  %v5313_v7 = vadd.s32 536870912, %v5312_v53  ;;  %v6924_v44 = vshrl.u32 %v8892_v60, %v6915_v34 }
 0x2bf   : > { %v1726_v5 = vsel %vm1715_vm4, nan, %v1725_v17  ;;  %v6913_v45 = vshrl.u32 %v6912_v46, 5  ;;  %v6917_v20 = vshll.u32 %v8889_v54, %v6914_v29  ;;  %v6923_v36 = vshll.u32 %v8891_v58, %v6914_v29 }
 0x2c0   : > { %7513 = vst.msk [vmem:[#allocation2 + $0x20] sm:$0xf] %vm7504_vm0, %v1726_v5  ;;  %v6927_v6 = vshrl.u32 %v8893_v62, %v6915_v34  ;;  %v3371_v25 = vxor.u32 2147483648, %v3370_v41  ;;  %v5314_v16 = vshrl.u32 %v5313_v7, 30  ;;  %v6920_v38 = vshll.u32 %v8890_v56, %v6914_v29 }
 0x2c1   : > { %v6926_v37 = vshll.u32 %v8892_v60, %v6914_v29  ;;  %v6919_v52 = vor.u32 %v6918_v61, %v6917_v20  ;;  %v6925_v31 = vor.u32 %v6924_v44, %v6923_v36  ;;  %v6929_v4 = vshll.u32 %v8893_v62, %v6914_v29 }
 0x2c2   : > { %v6930_v43 = vshrl.u32 %v8894_v11, %v6915_v34  ;;  %v3372_v15 = vsel %vm3289_vm13, %v3371_v25, %v3370_v41  ;;  %v5315_v46 = vshll.u32 %v5314_v16, 30  ;;  %v6922_v59 = vor.u32 %v6921_v30, %v6920_v38 }
 0x2c3   : > { %v6928_v55 = vor.u32 %v6927_v6, %v6926_v37  ;;  %v3375_v49 = vsel %vm10947_vm14, %v10722_v40, %v3372_v15  ;;  %v11004_v63 = vand.u32 3, %v3380_v47  ;;  %v11006_v24 = vshll.u32 %v6908_v51, 8 }
 0x2c4   : > { %v6931_v18 = vor.u32 %v6930_v43, %v6929_v4  ;;  %8768 = vcosq.f32 %v3375_v49  ;;  %v11008_v33 = vsub.s32 %v5312_v53, %v5315_v46  ;;  %vm6935_vm9 = vcmp.lt.s32.totalorder %v6913_v45, 4 }
 0x2c5   : > { %v593_v29 = vmul.f32 %v10914_v32, %v9190_v13  ;;  %8770 = vsinq.f32 %v3375_v49  ;;  %v6916_v57 = vshrl.u32 %v8889_v54, %v6915_v34  ;;  %vm6932_vm12 = vcmp.lt.s32.totalorder %v6913_v45, 1 }
 0x2c6   : > { %v6937_v48 = vsel %vm6935_vm9, %v6925_v31, 2102212464  ;;  %v5318_v42 = vsub.s32 0, %v11008_v33  ;;  %vm6934_vm13 = vcmp.lt.s32.totalorder %v6913_v45, 3  ;;  %v6940_v8 = vsel %vm6932_vm12, %v6919_v52, %v6922_v59 }
 0x2c7   : > { %v6941_v26 = vsel %vm6935_vm9, %v6928_v55, 920167782  ;;  %v6944_v51 = vsel %vm6932_vm12, %v6922_v59, %v6925_v31  ;;  %v6945_v27 = vsel %vm6935_vm9, %v6931_v18, 1326507024  ;;  %v11015_v9 = vrot.slane %v577_v14, %v9077_v21 }
 0x2c8   : > { %v6942_v28 = vsel %vm6934_vm13, %v6925_v31, %v6941_v26  ;;  %v8365_v35 = vmin.u32 %v5318_v42, %v11008_v33  ;;  %vm6933_vm14 = vcmp.lt.s32.totalorder %v6913_v45, 2  ;;  %v6936_v32 = vsel %vm6932_vm12, %v6916_v57, %v6919_v52 }
 0x2c9   : > { %v6938_v53 = vsel %vm6934_vm13, %v6922_v59, %v6937_v48  ;;  %vm5254_vm10 = vcmp.lt.s32.totalorder %v10859_v10, 0  ;;  %v5338_v34 = vsub.s32 4, %v5314_v16  ;;  %v6943_v17 = vsel %vm6933_vm14, %v6940_v8, %v6942_v28 }
 0x2ca   : > { %v6946_v47 = vsel %vm6934_vm13, %v6928_v55, %v6945_v27  ;;  %v5320_v61 = vclz %v8365_v35  ;;  %v11020_v5 = vmul.u32.u64.low %v11006_v24, %v6943_v17  ;;  %v11021_v41 = vmul.u32.u64.high %v11006_v24, %v6943_v17, %v11020_v5 }
 0x2cb   : > { %v6947_v30 = vsel %vm6933_vm14, %v6944_v51, %v6946_v47  ;;  %v6939_v7 = vsel %vm6933_vm14, %v6936_v32, %v6938_v53  ;;  %v1831_v45 = vand.u32 2147483647, %v11015_v9  ;;  %vm3382_vm11 = vcmp.lt.s32.totalorder %v11004_v63, 2 }
 0x2cc   : > { %v11024_v14 = vmul.u32.u64.low %v11006_v24, %v6947_v30  ;;  %v11025_v44 = vmul.u32.u64.high %v11006_v24, %v6947_v30, %v11024_v14  ;;  %v8366_v20 = vadd.s32 4294967294, %v5320_v61  ;;  %v11030_v36 = vrot.slane %v593_v29, %v9077_v21  ;;  %v543_v30 = vpop.permute.xlu1 %542 }
 0x2cd   : > { %v1834_v6 = vand.u32 2139095040, %v11015_v9  ;;  %vm3383_vm15 = vcmp.eq.s32.totalorder %v11004_v63, 0  ;;  %vm3386_vm2 = vcmp.eq.s32.totalorder %v11004_v63, 2  ;;  %v5308_v25 = vadd.s32 %v10963_v19, %v10960_v22 }
 0x2ce   : > { %v5339_v38 = vsel %vm5254_vm10, %v5338_v34, %v5314_v16  ;;  %v8769_v37 = vpop.eup %8768  ;;  %vm8367_vm1 = vcmp.lt.s32.totalorder %v8366_v20, 0  ;;  %v6955_v52 = vmul.u32 %v11006_v24, %v6939_v7  ;;  %v6958_v31 = vadd.s32 1, %v11021_v41 }
 0x2cf   : > { %v1835_v4 = vshrl.u32 %v1834_v6, 23  ;;  %v8771_v43 = vpop.eup %8770  ;;  %v3387_v15 = vxor.u32 2147483648, %v8769_v37  ;;  %v5323_v46 = vsel %vm8367_vm1, 0, %v8366_v20  ;;  %vm6957_vm3 = vc.u32 %v11025_v44, %v11020_v5 }
 0x2d0   : > { %v1838_v59 = vand.u32 8388607, %v1831_v45  ;;  %v3384_v55 = vxor.u32 2147483648, %v8771_v43  ;;  %v5324_v22 = vsub.s32 32, %v5323_v46  ;;  %v5328_v19 = vsub.s32 4294967266, %v5323_v46 }
 0x2d1   : > { %v3498_v16 = vand.u32 2139095040, %v11030_v36  ;;  %v3388_v49 = vsel %vm3386_vm2, %v3387_v15, %v8771_v43  ;;  %v5325_v18 = vshll.u32 %v11008_v33, %v5323_v46  ;;  %v6959_v24 = vsel %vm6957_vm3, %v6958_v31, %v11021_v41 }
 0x2d2   : > { %v8232_v29 = vadd.s32 4294967169, %v1835_v4  ;;  %v3385_v57 = vsel %vm3383_vm15, %v8769_v37, %v3384_v55  ;;  %v5326_v48 = vshrl.u32 %v5308_v25, %v5324_v22  ;;  %v5329_v42 = vadd.s32 127, %v5328_v19 }
 0x2d3   : > { %v6960_v8 = vadd.s32 %v6959_v24, %v6955_v52  ;;  %vm3379_vm4 = vweird.f32 %v10722_v40  ;;  %v3389_v26 = vsel %vm3382_vm11, %v3385_v57, %v3388_v49  ;;  %vm11056_vm5 = vcmp.le.f32.partialorder %v5252_v39, 0.7853982 }
 0x2d4   : > { %v1841_v33 = vadd.s32 1, %v8232_v29  ;;  %v3390_v51 = vsel %vm3379_vm4, nan, %v3389_v26  ;;  %v5327_v27 = vor.u32 %v5326_v48, %v5325_v18  ;;  %v5330_v35 = vshll.u32 %v5329_v42, 23 }
 0x2d5   : > { %v6961_v32 = vadd.s32 536870912, %v6960_v8  ;;  %7529 = vst.msk [vmem:[#allocation2 + $0x84] sm:$0xf] %vm7504_vm0, %v3390_v51  ;;  %v5341_v53 = vsel %vm11056_vm5, 0, %v5339_v38  ;;  %v1839_v40 = vor.u32 8388608, %v1838_v59  ;;  %v3499_v63 = vshrl.u32 %v3498_v16, 23 }
 0x2d6   : > { %vm1842_vm6 = vcmp.gt.s32.totalorder %v1841_v33, 0  ;;  %v5331_v34 = vor.u32 4788187, %v5330_v35  ;;  %v3495_v39 = vand.u32 2147483647, %v11030_v36  ;;  %v5334_v7 = vcvt.s32.f32 %v5327_v27 }
 0x2d7   : > { %v6962_v17 = vshrl.u32 %v6961_v32, 30  ;;  %v1843_v47 = vsel %vm1842_vm6, %v1841_v33, 0  ;;  %v11064_v14 = vand.u32 3, %v5341_v53  ;;  %vm6902_vm7 = vcmp.lt.s32.totalorder %v10887_v23, 0 }
 0x2d8   : > { %v1845_v61 = vand.u32 31, %v1843_v47  ;;  %v5332_v41 = vand.u32 2147483647, %v5331_v34  ;;  %v11068_v6 = vadd.s32 %v11020_v5, %v11025_v44  ;;  %v11070_v38 = vshll.u32 %v1839_v40, 8 }
 0x2d9   : > { %v6963_v20 = vshll.u32 %v6962_v17, 30  ;;  %v8296_v37 = vadd.s32 4294967169, %v3499_v63  ;;  %v11076_v4 = vand.u32 8388607, %v3495_v39  ;;  %v11079_v43 = vrot.slane %v543_v30, %v9077_v21 }
 0x2da   : > { %v1846_v25 = vsub.s32 32, %v1845_v61  ;;  %v5335_v52 = vmul.f32 %v5334_v7, %v5332_v41  ;;  %v6986_v15 = vsub.s32 4, %v6962_v17  ;;  %v1844_v46 = vshrl.u32 %v1843_v47, 5 }
 0x2db   : > { %v11072_v31 = vsub.s32 %v6960_v8, %v6963_v20  ;;  %v1848_v22 = vshll.u32 %v8889_v54, %v1845_v61  ;;  %v1851_v16 = vshll.u32 %v8890_v56, %v1845_v61  ;;  %v1854_v49 = vshll.u32 %v8891_v58, %v1845_v61 }
 0x2dc   : > { %v1849_v59 = vshrl.u32 %v8890_v56, %v1846_v25  ;;  %v1852_v5 = vshrl.u32 %v8891_v58, %v1846_v25  ;;  %v5336_v44 = vxor.u32 2147483648, %v5335_v52  ;;  %v1855_v19 = vshrl.u32 %v8892_v60, %v1846_v25 }
 0x2dd   : > { %v6966_v55 = vsub.s32 0, %v11072_v31  ;;  %v1857_v18 = vshll.u32 %v8892_v60, %v1845_v61  ;;  %v1858_v24 = vshrl.u32 %v8893_v62, %v1846_v25  ;;  %v3505_v42 = vadd.s32 1, %v8296_v37 }
 0x2de   : > { %v5337_v29 = vsel %vm5254_vm10, %v5336_v44, %v5335_v52  ;;  %v1850_v48 = vor.u32 %v1849_v59, %v1848_v22  ;;  %v1853_v26 = vor.u32 %v1852_v5, %v1851_v16  ;;  %v1856_v33 = vor.u32 %v1855_v19, %v1854_v49 }
 0x2df   : > { %v8429_v57 = vmin.u32 %v6966_v55, %v11072_v31  ;;  %v5340_v8 = vsel %vm11056_vm5, %v10859_v10, %v5337_v29  ;;  %v1859_v51 = vor.u32 %v1858_v24, %v1857_v18  ;;  %v1860_v35 = vshll.u32 %v8893_v62, %v1845_v61 }
 0x2e0   : > { %8772 = vcosq.f32 %v5340_v8  ;;  %v1861_v32 = vshrl.u32 %v8894_v11, %v1846_v25  ;;  %vm11100_vm8 = vcmp.le.f32.partialorder %v6900_v50, 0.7853982  ;;  %v6987_v28 = vsel %vm6902_vm7, %v6986_v15, %v6962_v17 }
 0x2e1   : > { %v6968_v27 = vclz %v8429_v57  ;;  %8774 = vsinq.f32 %v5340_v8  ;;  %v1847_v40 = vshrl.u32 %v8889_v54, %v1846_v25  ;;  %vm1863_vm9 = vcmp.lt.s32.totalorder %v1844_v46, 1 }
 0x2e2   : > { %v1862_v34 = vor.u32 %v1861_v32, %v1860_v35  ;;  %vm1865_vm12 = vcmp.lt.s32.totalorder %v1844_v46, 3  ;;  %vm1866_vm13 = vcmp.lt.s32.totalorder %v1844_v46, 4  ;;  %v1871_v61 = vsel %vm1863_vm9, %v1850_v48, %v1853_v26 }
 0x2e3   : > { %v8430_v63 = vadd.s32 4294967294, %v6968_v27  ;;  %v1868_v47 = vsel %vm1866_vm13, %v1856_v33, 2102212464  ;;  %v1872_v30 = vsel %vm1866_vm13, %v1859_v51, 920167782  ;;  %v1875_v41 = vsel %vm1863_vm9, %v1853_v26, %v1856_v33 }
 0x2e4   : > { %vm1864_vm10 = vcmp.lt.s32.totalorder %v1844_v46, 2  ;;  %v1873_v50 = vsel %vm1865_vm12, %v1856_v33, %v1872_v30  ;;  %v1876_v7 = vsel %vm1866_vm13, %v1862_v34, 1326507024  ;;  %vm5347_vm11 = vcmp.eq.s32.totalorder %v11064_v14, 0 }
 0x2e5   : > { %vm8431_vm14 = vcmp.lt.s32.totalorder %v8430_v63, 0  ;;  %v1867_v17 = vsel %vm1863_vm9, %v1847_v40, %v1850_v48  ;;  %v1874_v25 = vsel %vm1864_vm10, %v1871_v61, %v1873_v50  ;;  %v1877_v37 = vsel %vm1865_vm12, %v1859_v51, %v1876_v7 }
 0x2e6   : > { %v6971_v20 = vsel %vm8431_vm14, 0, %v8430_v63  ;;  %vm5346_vm15 = vcmp.lt.s32.totalorder %v11064_v14, 2  ;;  %v1869_v59 = vsel %vm1865_vm12, %v1853_v26, %v1868_v47  ;;  %v1878_v5 = vsel %vm1864_vm10, %v1875_v41, %v1877_v37 }
 0x2e7   : > { %v6972_v52 = vsub.s32 32, %v6971_v20  ;;  %v6976_v15 = vsub.s32 4294967266, %v6971_v20  ;;  %vm5344_vm2 = vweird.f32 %v10859_v10  ;;  %v6973_v16 = vshll.u32 %v11072_v31, %v6971_v20 }
 0x2e8   : > { %v11116_v44 = vmul.u32.u64.low %v11070_v38, %v1878_v5  ;;  %v11117_v55 = vmul.u32.u64.high %v11070_v38, %v1878_v5, %v11116_v44  ;;  %v11120_v22 = vmul.u32.u64.low %v11070_v38, %v1874_v25  ;;  %v11121_v19 = vmul.u32.u64.high %v11070_v38, %v1874_v25, %v11120_v22 }
 0x2e9   : > { %v6974_v49 = vshrl.u32 %v11068_v6, %v6972_v52  ;;  %v6977_v18 = vadd.s32 127, %v6976_v15  ;;  %vm3506_vm1 = vcmp.gt.s32.totalorder %v3505_v42, 0  ;;  %vm5350_vm3 = vcmp.eq.s32.totalorder %v11064_v14, 2 }
 0x2ea   : > { %v1870_v24 = vsel %vm1864_vm10, %v1867_v17, %v1869_v59  ;;  %v3503_v29 = vor.u32 8388608, %v11076_v4  ;;  %v3507_v57 = vsel %vm3506_vm1, %v3505_v42, 0  ;;  %v8773_v48 = vpop.eup %8772  ;;  %v6989_v33 = vsel %vm11100_vm8, 0, %v6987_v28 }
 0x2eb   : > { %v6975_v8 = vor.u32 %v6974_v49, %v6973_v16  ;;  %v6978_v26 = vshll.u32 %v6977_v18, 23  ;;  %v3509_v51 = vand.u32 31, %v3507_v57  ;;  %v8775_v27 = vpop.eup %8774  ;;  %v5351_v31 = vxor.u32 2147483648, %v8773_v48 }
 0x2ec   : > { %vm1888_vm4 = vc.u32 %v11117_v55, %v11120_v22  ;;  %v1889_v6 = vadd.s32 1, %v11121_v19  ;;  %v580_v46 = vmul.f32 %v11079_v43, %v9188_v12  ;;  %v5348_v35 = vxor.u32 2147483648, %v8775_v27 }
 0x2ed   : > { %v6979_v4 = vor.u32 4788187, %v6978_v26  ;;  %v1886_v42 = vmul.u32 %v11070_v38, %v1870_v24  ;;  %v3510_v32 = vsub.s32 32, %v3509_v51  ;;  %v5352_v40 = vsel %vm5350_vm3, %v5351_v31, %v8775_v27 }
 0x2ee   : > { %v11139_v28 = vand.u32 3, %v6989_v33  ;;  %v1890_v63 = vsel %vm1888_vm4, %v1889_v6, %v11121_v19  ;;  %v11142_v34 = vshll.u32 %v3503_v29, 8  ;;  %v5349_v47 = vsel %vm5347_vm11, %v8773_v48, %v5348_v35 }
 0x2ef   : > { %v6980_v61 = vand.u32 2147483647, %v6979_v4  ;;  %v6982_v30 = vcvt.s32.f32 %v6975_v8  ;;  %v1891_v41 = vadd.s32 %v1890_v63, %v1886_v42  ;;  %v5353_v50 = vsel %vm5346_vm15, %v5349_v47, %v5352_v40 }
 0x2f0   : > { %v3512_v38 = vshll.u32 %v8889_v54, %v3509_v51  ;;  %v3513_v7 = vshrl.u32 %v8890_v56, %v3510_v32  ;;  %v3516_v20 = vshrl.u32 %v8891_v58, %v3510_v32  ;;  %v5354_v17 = vsel %vm5344_vm2, nan, %v5353_v50 }
 0x2f1   : > { %v6983_v25 = vmul.f32 %v6982_v30, %v6980_v61  ;;  %v1892_v37 = vadd.s32 536870912, %v1891_v41  ;;  %v3519_v52 = vshrl.u32 %v8892_v60, %v3510_v32  ;;  %7516 = vst.msk [vmem:[#allocation2 + $0x2c] sm:$0xf] %vm7504_vm0, %v5354_v17  ;;  %v3508_v15 = vshrl.u32 %v3507_v57, 5 }
 0x2f2   : > { %v3515_v59 = vshll.u32 %v8890_v56, %v3509_v51  ;;  %v3518_v14 = vshll.u32 %v8891_v58, %v3509_v51  ;;  %v3522_v5 = vshrl.u32 %v8893_v62, %v3510_v32  ;;  %v3514_v16 = vor.u32 %v3513_v7, %v3512_v38 }
 0x2f3   : > { %v6984_v44 = vxor.u32 2147483648, %v6983_v25  ;;  %v1893_v19 = vshrl.u32 %v1892_v37, 30  ;;  %v3521_v49 = vshll.u32 %v8892_v60, %v3509_v51  ;;  %v3524_v24 = vshll.u32 %v8893_v62, %v3509_v51 }
 0x2f4   : > { %v3517_v10 = vor.u32 %v3516_v20, %v3515_v59  ;;  %v3520_v18 = vor.u32 %v3519_v52, %v3518_v14  ;;  %v3525_v29 = vshrl.u32 %v8894_v11, %v3510_v32  ;;  %v596_v26 = vmul.f32 %v11079_v43, %v9190_v13 }
 0x2f5   : > { %v6985_v57 = vsel %vm6902_vm7, %v6984_v44, %v6983_v25  ;;  %v1894_v48 = vshll.u32 %v1893_v19, 30  ;;  %v3523_v8 = vor.u32 %v3522_v5, %v3521_v49  ;;  %v3511_v27 = vshrl.u32 %v8889_v54, %v3510_v32 }
 0x2f6   : > { %v6988_v33 = vsel %vm11100_vm8, %v10887_v23, %v6985_v57  ;;  %v3526_v31 = vor.u32 %v3525_v29, %v3524_v24  ;;  %v11170_v6 = vrot.slane %v580_v46, %v9077_v21  ;;  %vm3527_vm5 = vcmp.lt.s32.totalorder %v3508_v15, 1 }
 0x2f7   : > { %8776 = vcosq.f32 %v6988_v33  ;;  %v11172_v51 = vsub.s32 %v1891_v41, %v1894_v48  ;;  %vm3530_vm6 = vcmp.lt.s32.totalorder %v3508_v15, 4  ;;  %vm3528_vm7 = vcmp.lt.s32.totalorder %v3508_v15, 2 }
 0x2f8   : > { %8778 = vsinq.f32 %v6988_v33  ;;  %v3532_v35 = vsel %vm3530_vm6, %v3520_v18, 2102212464  ;;  %v3535_v4 = vsel %vm3527_vm5, %v3514_v16, %v3517_v10  ;;  %v1917_v42 = vsub.s32 4, %v1893_v19 }
 0x2f9   : > { %v1897_v43 = vsub.s32 0, %v11172_v51  ;;  %vm3529_vm9 = vcmp.lt.s32.totalorder %v3508_v15, 3  ;;  %v3536_v53 = vsel %vm3530_vm6, %v3523_v8, 920167782  ;;  %v3531_v40 = vsel %vm3527_vm5, %v3511_v27, %v3514_v16 }
 0x2fa   : > { %v3537_v32 = vsel %vm3529_vm9, %v3520_v18, %v3536_v53  ;;  %v3539_v63 = vsel %vm3527_vm5, %v3517_v10, %v3520_v18  ;;  %v3540_v47 = vsel %vm3530_vm6, %v3526_v31, 1326507024  ;;  %v3533_v61 = vsel %vm3529_vm9, %v3517_v10, %v3532_v35 }
 0x2fb   : > { %v8233_v46 = vmin.u32 %v1897_v43, %v11172_v51  ;;  %v3538_v30 = vsel %vm3528_vm7, %v3535_v4, %v3537_v32  ;;  %v3541_v41 = vsel %vm3529_vm9, %v3523_v8, %v3540_v47  ;;  %vm11184_vm8 = vcmp.le.f32.partialorder %v1831_v45, 0.7853982 }
 0x2fc   : > { %v3542_v50 = vsel %vm3528_vm7, %v3539_v63, %v3541_v41  ;;  %v11179_v38 = vmul.u32.u64.low %v11142_v34, %v3538_v30  ;;  %v11180_v7 = vmul.u32.u64.high %v11142_v34, %v3538_v30, %v11179_v38  ;;  %vm1833_vm12 = vcmp.lt.s32.totalorder %v11015_v9, 0 }
 0x2fd   : > { %v1899_v17 = vclz %v8233_v46  ;;  %v1918_v25 = vsel %vm1833_vm12, %v1917_v42, %v1893_v19  ;;  %v3534_v37 = vsel %vm3528_vm7, %v3531_v40, %v3533_v61  ;;  %vm6994_vm13 = vcmp.lt.s32.totalorder %v11139_v28, 2  ;;  %v534_v46 = vpop.permute.xlu0 %533 }
 0x2fe   : > { %v11193_v52 = vmul.u32.u64.low %v11142_v34, %v3542_v50  ;;  %v11194_v59 = vmul.u32.u64.high %v11142_v34, %v3542_v50, %v11193_v52  ;;  %v11198_v45 = vrot.slane %v596_v26, %v9077_v21  ;;  %v5461_v5 = vand.u32 2139095040, %v11170_v6 }
 0x2ff   : > { %v8234_v14 = vadd.s32 4294967294, %v1899_v17  ;;  %vm6995_vm14 = vcmp.eq.s32.totalorder %v11139_v28, 0  ;;  %vm6998_vm10 = vcmp.eq.s32.totalorder %v11139_v28, 2  ;;  %v1887_v15 = vadd.s32 %v11120_v22, %v11117_v55 }
 0x300   : > { %v3553_v44 = vadd.s32 1, %v11180_v7  ;;  %v1920_v16 = vsel %vm11184_vm8, 0, %v1918_v25  ;;  %v3550_v49 = vmul.u32 %v11142_v34, %v3534_v37  ;;  %v5462_v10 = vshrl.u32 %v5461_v5, 23 }
 0x301   : > { %v8777_v19 = vpop.eup %8776  ;;  %vm8235_vm11 = vcmp.lt.s32.totalorder %v8234_v14, 0  ;;  %vm3552_vm15 = vc.u32 %v11194_v59, %v11179_v38  ;;  %v5458_v57 = vand.u32 2147483647, %v11170_v6  ;;  %v7109_v22 = vand.u32 2139095040, %v11198_v45 }
 0x302   : > { %v8779_v18 = vpop.eup %8778  ;;  %v6999_v24 = vxor.u32 2147483648, %v8777_v19  ;;  %v1902_v29 = vsel %vm8235_vm11, 0, %v8234_v14  ;;  %v3554_v34 = vsel %vm3552_vm15, %v3553_v44, %v11180_v7  ;;  %v8372_v27 = vadd.s32 4294967169, %v5462_v10 }
 0x303   : > { %v6996_v48 = vxor.u32 2147483648, %v8779_v18  ;;  %v1903_v8 = vsub.s32 32, %v1902_v29  ;;  %v1907_v55 = vsub.s32 4294967266, %v1902_v29  ;;  %v1904_v33 = vshll.u32 %v11172_v51, %v1902_v29 }
 0x304   : > { %v7000_v26 = vsel %vm6998_vm10, %v6999_v24, %v8779_v18  ;;  %v3555_v43 = vadd.s32 %v3554_v34, %v3550_v49  ;;  %vm6992_vm2 = vweird.f32 %v10887_v23  ;;  %v1924_v53 = vadd.s32 3, %v1920_v16 }
 0x305   : > { %v6997_v31 = vsel %vm6995_vm14, %v8777_v19, %v6996_v48  ;;  %v1905_v35 = vshrl.u32 %v1887_v15, %v1903_v8  ;;  %v1908_v4 = vadd.s32 127, %v1907_v55  ;;  %v5468_v40 = vadd.s32 1, %v8372_v27 }
 0x306   : > { %v7001_v42 = vsel %vm6994_vm13, %v6997_v31, %v7000_v26  ;;  %v3556_v51 = vadd.s32 536870912, %v3555_v43  ;;  %v5465_v61 = vand.u32 8388607, %v5458_v57  ;;  %v7110_v23 = vshrl.u32 %v7109_v22, 23 }
 0x307   : > { %v7002_v32 = vsel %vm6992_vm2, nan, %v7001_v42  ;;  %v1906_v63 = vor.u32 %v1905_v35, %v1904_v33  ;;  %v1909_v47 = vshll.u32 %v1908_v4, 23  ;;  %vm5469_vm1 = vcmp.gt.s32.totalorder %v5468_v40, 0 }
 0x308   : > { %7532 = vst.msk [vmem:[#allocation2 + $0x90] sm:$0xf] %vm7504_vm0, %v7002_v32  ;;  %v3557_v41 = vshrl.u32 %v3556_v51, 30  ;;  %v5470_v50 = vsel %vm5469_vm1, %v5468_v40, 0  ;;  %v11225_v28 = vrot.slane %v534_v46, %v9077_v21  ;;  %v11227_v37 = vand.u32 3, %v1924_v53 }
 0x309   : > { %v1910_v30 = vor.u32 4788187, %v1909_v47  ;;  %v5472_v7 = vand.u32 31, %v5470_v50  ;;  %v1913_v25 = vcvt.s32.f32 %v1906_v63  ;;  %vm3497_vm3 = vcmp.lt.s32.totalorder %v11030_v36, 0 }
 0x30a   : > { %v3558_v52 = vshll.u32 %v3557_v41, 30  ;;  %v3551_v14 = vadd.s32 %v11179_v38, %v11194_v59  ;;  %v5466_v5 = vor.u32 8388608, %v5465_v61  ;;  %v7106_v44 = vand.u32 2147483647, %v11198_v45 }
 0x30b   : > { %v1911_v17 = vand.u32 2147483647, %v1910_v30  ;;  %v5473_v15 = vsub.s32 32, %v5472_v7  ;;  %v5471_v49 = vshrl.u32 %v5470_v50, 5  ;;  %v8436_v10 = vadd.s32 4294967169, %v7110_v23 }
 0x30c   : > { %v11232_v16 = vsub.s32 %v3555_v43, %v3558_v52  ;;  %v3581_v18 = vsub.s32 4, %v3557_v41  ;;  %v5475_v24 = vshll.u32 %v8889_v54, %v5472_v7  ;;  %v5478_v38 = vshll.u32 %v8890_v56, %v5472_v7 }
 0x30d   : > { %v1914_v19 = vmul.f32 %v1913_v25, %v1911_v17  ;;  %v5476_v29 = vshrl.u32 %v8890_v56, %v5473_v15  ;;  %v5479_v48 = vshrl.u32 %v8891_v58, %v5473_v15  ;;  %v5482_v59 = vshrl.u32 %v8892_v60, %v5473_v15 }
 0x30e   : > { %v3561_v55 = vsub.s32 0, %v11232_v16  ;;  %v5481_v26 = vshll.u32 %v8891_v58, %v5472_v7  ;;  %v5484_v33 = vshll.u32 %v8892_v60, %v5472_v7  ;;  %v5485_v34 = vshrl.u32 %v8893_v62, %v5473_v15 }
 0x30f   : > { %v1915_v8 = vxor.u32 2147483648, %v1914_v19  ;;  %v5477_v22 = vor.u32 %v5476_v29, %v5475_v24  ;;  %v5480_v35 = vor.u32 %v5479_v48, %v5478_v38  ;;  %v5487_v4 = vshll.u32 %v8893_v62, %v5472_v7 }
 0x310   : > { %v8297_v31 = vmin.u32 %v3561_v55, %v11232_v16  ;;  %v5483_v42 = vor.u32 %v5482_v59, %v5481_v26  ;;  %v5486_v53 = vor.u32 %v5485_v34, %v5484_v33  ;;  %v5488_v40 = vshrl.u32 %v8894_v11, %v5473_v15 }
 0x311   : > { %v1916_v27 = vsel %vm1833_vm12, %v1915_v8, %v1914_v19  ;;  %v11251_v63 = vshll.u32 %v5466_v5, 8  ;;  %v7116_v47 = vadd.s32 1, %v8436_v10  ;;  %v3582_v51 = vsel %vm3497_vm3, %v3581_v18, %v3557_v41 }
 0x312   : > { %v1919_v43 = vsel %vm11184_vm8, %v11015_v9, %v1916_v27  ;;  %v3563_v32 = vclz %v8297_v31  ;;  %v5474_v46 = vshrl.u32 %v8889_v54, %v5473_v15  ;;  %v5489_v61 = vor.u32 %v5488_v40, %v5487_v4 }
 0x313   : > { %8780 = vcosq.f32 %v1919_v43  ;;  %vm11258_vm4 = vcmp.le.f32.partialorder %v3495_v39, 0.7853982  ;;  %vm5490_vm5 = vcmp.lt.s32.totalorder %v5471_v49, 1  ;;  %vm5492_vm6 = vcmp.lt.s32.totalorder %v5471_v49, 3 }
 0x314   : > { %8782 = vsinq.f32 %v1919_v43  ;;  %v8298_v30 = vadd.s32 4294967294, %v3563_v32  ;;  %vm5493_vm7 = vcmp.lt.s32.totalorder %v5471_v49, 4  ;;  %v5498_v23 = vsel %vm5490_vm5, %v5477_v22, %v5480_v35 }
 0x315   : > { %v5495_v50 = vsel %vm5493_vm7, %v5483_v42, 2102212464  ;;  %v5499_v7 = vsel %vm5493_vm7, %v5486_v53, 920167782  ;;  %v5502_v17 = vsel %vm5490_vm5, %v5480_v35, %v5483_v42  ;;  %vm5491_vm8 = vcmp.lt.s32.totalorder %v5471_v49, 2 }
 0x316   : > { %vm8299_vm9 = vcmp.lt.s32.totalorder %v8298_v30, 0  ;;  %v5500_v41 = vsel %vm5492_vm6, %v5483_v42, %v5499_v7  ;;  %v5503_v25 = vsel %vm5493_vm7, %v5489_v61, 1326507024  ;;  %v5494_v5 = vsel %vm5490_vm5, %v5474_v46, %v5477_v22 }
 0x317   : > { %v3566_v52 = vsel %vm8299_vm9, 0, %v8298_v30  ;;  %v5501_v39 = vsel %vm5491_vm8, %v5498_v23, %v5500_v41  ;;  %v5504_v15 = vsel %vm5492_vm6, %v5486_v53, %v5503_v25  ;;  %vm1926_vm12 = vcmp.lt.s32.totalorder %v11227_v37, 2 }
 0x318   : > { %v3567_v19 = vsub.s32 32, %v3566_v52  ;;  %v3571_v10 = vsub.s32 4294967266, %v3566_v52  ;;  %v5496_v18 = vsel %vm5492_vm6, %v5480_v35, %v5495_v50  ;;  %v5505_v24 = vsel %vm5491_vm8, %v5502_v17, %v5504_v15 }
 0x319   : > { %vm1923_vm13 = vweird.f32 %v11015_v9  ;;  %v11270_v29 = vmul.u32.u64.low %v11251_v63, %v5505_v24  ;;  %v11271_v48 = vmul.u32.u64.high %v11251_v63, %v5505_v24, %v11270_v29  ;;  %v3568_v38 = vshll.u32 %v11232_v16, %v3566_v52 }
 0x31a   : > { %v11274_v8 = vmul.u32.u64.low %v11251_v63, %v5501_v39  ;;  %v11275_v55 = vmul.u32.u64.high %v11251_v63, %v5501_v39, %v11274_v8  ;;  %v3569_v59 = vshrl.u32 %v3551_v14, %v3567_v19  ;;  %v3572_v22 = vadd.s32 127, %v3571_v10 }
 0x31b   : > { %vm7117_vm14 = vcmp.gt.s32.totalorder %v7116_v47, 0  ;;  %vm1927_vm10 = vcmp.eq.s32.totalorder %v11227_v37, 0  ;;  %v5497_v26 = vsel %vm5491_vm8, %v5494_v5, %v5496_v18  ;;  %v7113_v33 = vand.u32 8388607, %v7106_v44 }
 0x31c   : > { %v7118_v34 = vsel %vm7117_vm14, %v7116_v47, 0  ;;  %vm1930_vm11 = vcmp.eq.s32.totalorder %v11227_v37, 2  ;;  %v3570_v31 = vor.u32 %v3569_v59, %v3568_v38  ;;  %v3573_v35 = vshll.u32 %v3572_v22, 23 }
 0x31d   : > { %v8781_v27 = vpop.eup %8780  ;;  %v7120_v4 = vand.u32 31, %v7118_v34  ;;  %v3584_v14 = vsel %vm11258_vm4, 0, %v3582_v51  ;;  %vm5515_vm15 = vc.u32 %v11271_v48, %v11274_v8  ;;  %v5516_v16 = vadd.s32 1, %v11275_v55 }
 0x31e   : > { %v8783_v43 = vpop.eup %8782  ;;  %v1931_v42 = vxor.u32 2147483648, %v8781_v27  ;;  %v3574_v53 = vor.u32 4788187, %v3573_v35  ;;  %v5513_v40 = vmul.u32 %v11251_v63, %v5497_v26  ;;  %v7114_v61 = vor.u32 8388608, %v7113_v33 }
 0x31f   : > { %v1928_v49 = vxor.u32 2147483648, %v8783_v43  ;;  %v7121_v32 = vsub.s32 32, %v7120_v4  ;;  %v5517_v46 = vsel %vm5515_vm15, %v5516_v16, %v11275_v55  ;;  %v579_v30 = vmul.f32 %v11225_v28, %v9188_v12 }
 0x320   : > { %v1932_v47 = vsel %vm1930_vm11, %v1931_v42, %v8783_v43  ;;  %v3575_v50 = vand.u32 2147483647, %v3574_v53  ;;  %v3577_v23 = vcvt.s32.f32 %v3570_v31  ;;  %v5518_v7 = vadd.s32 %v5517_v46, %v5513_v40 }
 0x321   : > { %v1929_v51 = vsel %vm1927_vm10, %v8781_v27, %v1928_v49  ;;  %v3588_v41 = vadd.s32 3, %v3584_v14  ;;  %v7124_v63 = vshrl.u32 %v8890_v56, %v7121_v32  ;;  %v7127_v25 = vshrl.u32 %v8891_v58, %v7121_v32  ;;  %v11323_v49 = vpop.permute.xlu0 %551 }
 0x322   : > { %v1933_v17 = vsel %vm1926_vm12, %v1929_v51, %v1932_v47  ;;  %v3578_v5 = vmul.f32 %v3577_v23, %v3575_v50  ;;  %v5519_v39 = vadd.s32 536870912, %v5518_v7  ;;  %v7130_v15 = vshrl.u32 %v8892_v60, %v7121_v32 }
 0x323   : > { %v1934_v52 = vsel %vm1923_vm13, nan, %v1933_v17  ;;  %v7119_v19 = vshrl.u32 %v7118_v34, 5  ;;  %v7123_v10 = vshll.u32 %v8889_v54, %v7120_v4  ;;  %v7129_v37 = vshll.u32 %v8891_v58, %v7120_v4 }
 0x324   : > { %7515 = vst.msk [vmem:[#allocation2 + $0x28] sm:$0xf] %vm7504_vm0, %v1934_v52  ;;  %v7133_v18 = vshrl.u32 %v8893_v62, %v7121_v32  ;;  %v3579_v24 = vxor.u32 2147483648, %v3578_v5  ;;  %v5520_v29 = vshrl.u32 %v5519_v39, 30  ;;  %v7126_v55 = vshll.u32 %v8890_v56, %v7120_v4 }
 0x325   : > { %v7132_v9 = vshll.u32 %v8892_v60, %v7120_v4  ;;  %v7125_v38 = vor.u32 %v7124_v63, %v7123_v10  ;;  %v7131_v59 = vor.u32 %v7130_v15, %v7129_v37  ;;  %v7135_v22 = vshll.u32 %v8893_v62, %v7120_v4  ;;  %v7454_v15 = vpop.permute.xlu0 %7453 }
 0x326   : > { %v7136_v26 = vshrl.u32 %v8894_v11, %v7121_v32  ;;  %v3580_v33 = vsel %vm3497_vm3, %v3579_v24, %v3578_v5  ;;  %v5521_v34 = vshll.u32 %v5520_v29, 30  ;;  %v7128_v27 = vor.u32 %v7127_v25, %v7126_v55  ;;  %7538 = vst.msk [vmem:[#allocation2 + $0x40] sm:$0xf] %vm7504_vm0, %v7454_v15  ;;  %7546 = vst.msk [vmem:[#allocation2 + $0xa4] sm:$0xf] %vm7504_vm0, %v7454_v15 }
 0x327   : > { %v7134_v31 = vor.u32 %v7133_v18, %v7132_v9  ;;  %v3583_v35 = vsel %vm11258_vm4, %v11030_v36, %v3580_v33  ;;  %v11315_v43 = vand.u32 3, %v3588_v41  ;;  %v11317_v14 = vshll.u32 %v7114_v61, 8 }
 0x328   : > { %v7137_v42 = vor.u32 %v7136_v26, %v7135_v22  ;;  %8784 = vcosq.f32 %v3583_v35  ;;  %v11319_v16 = vsub.s32 %v5518_v7, %v5521_v34  ;;  %vm7141_vm2 = vcmp.lt.s32.totalorder %v7119_v19, 4 }
 0x329   : > { %v595_v4 = vmul.f32 %v11225_v28, %v9190_v13  ;;  %8786 = vsinq.f32 %v3583_v35  ;;  %v7122_v53 = vshrl.u32 %v8889_v54, %v7121_v32  ;;  %vm7138_vm1 = vcmp.lt.s32.totalorder %v7119_v19, 1 }
 0x32a   : > { %v7143_v20 = vsel %vm7141_vm2, %v7131_v59, 2102212464  ;;  %v5524_v40 = vsub.s32 0, %v11319_v16  ;;  %vm7140_vm3 = vcmp.lt.s32.totalorder %v7119_v19, 3  ;;  %v7146_v47 = vsel %vm7138_vm1, %v7125_v38, %v7128_v27 }
 0x32b   : > { %v7147_v46 = vsel %vm7141_vm2, %v7134_v31, 920167782  ;;  %v7150_v51 = vsel %vm7138_vm1, %v7128_v27, %v7131_v59  ;;  %v7151_v50 = vsel %vm7141_vm2, %v7137_v42, 1326507024  ;;  %v11328_v23 = vrot.slane %v579_v30, %v9077_v21 }
 0x32c   : > { %v7148_v61 = vsel %vm7140_vm3, %v7131_v59, %v7147_v46  ;;  %v8373_v28 = vmin.u32 %v5524_v40, %v11319_v16  ;;  %vm7139_vm4 = vcmp.lt.s32.totalorder %v7119_v19, 2  ;;  %v7142_v7 = vsel %vm7138_vm1, %v7122_v53, %v7125_v38 }
 0x32d   : > { %v7144_v17 = vsel %vm7140_vm3, %v7128_v27, %v7143_v20  ;;  %vm5460_vm5 = vcmp.lt.s32.totalorder %v11170_v6, 0  ;;  %v5544_v32 = vsub.s32 4, %v5520_v29  ;;  %v7149_v41 = vsel %vm7139_vm4, %v7146_v47, %v7148_v61 }
 0x32e   : > { %v7152_v63 = vsel %vm7140_vm3, %v7134_v31, %v7151_v50  ;;  %v5526_v25 = vclz %v8373_v28  ;;  %v11333_v5 = vmul.u32.u64.low %v11317_v14, %v7149_v41  ;;  %v11334_v39 = vmul.u32.u64.high %v11317_v14, %v7149_v41, %v11333_v5 }
 0x32f   : > { %v7153_v52 = vsel %vm7139_vm4, %v7150_v51, %v7152_v63  ;;  %v7145_v30 = vsel %vm7139_vm4, %v7142_v7, %v7144_v17  ;;  %v2039_v19 = vand.u32 2147483647, %v11328_v23  ;;  %vm3590_vm6 = vcmp.lt.s32.totalorder %v11315_v43, 2 }
 0x330   : > { %v11338_v10 = vmul.u32.u64.low %v11317_v14, %v7153_v52  ;;  %v11339_v37 = vmul.u32.u64.high %v11317_v14, %v7153_v52, %v11338_v10  ;;  %v8374_v18 = vadd.s32 4294967294, %v5526_v25  ;;  %v11346_v24 = vrot.slane %v595_v4, %v9077_v21 }
 0x331   : > { %v2042_v55 = vand.u32 2139095040, %v11328_v23  ;;  %vm3591_vm7 = vcmp.eq.s32.totalorder %v11315_v43, 0  ;;  %vm3594_vm9 = vcmp.eq.s32.totalorder %v11315_v43, 2  ;;  %v5514_v9 = vadd.s32 %v11274_v8, %v11271_v48 }
 0x332   : > { %v5545_v38 = vsel %vm5460_vm5, %v5544_v32, %v5520_v29  ;;  %v8785_v59 = vpop.eup %8784  ;;  %vm8375_vm8 = vcmp.lt.s32.totalorder %v8374_v18, 0  ;;  %v7161_v22 = vmul.u32 %v11317_v14, %v7145_v30  ;;  %v7164_v26 = vadd.s32 1, %v11334_v39  ;;  %v561_v30 = vpop.permute.xlu1 %560 }
 0x333   : > { %v2043_v33 = vshrl.u32 %v2042_v55, 23  ;;  %v8787_v34 = vpop.eup %8786  ;;  %v3595_v27 = vxor.u32 2147483648, %v8785_v59  ;;  %v5529_v31 = vsel %vm8375_vm8, 0, %v8374_v18  ;;  %vm7163_vm12 = vc.u32 %v11339_v37, %v11333_v5 }
 0x334   : > { %v2046_v35 = vand.u32 8388607, %v2039_v19  ;;  %v3592_v48 = vxor.u32 2147483648, %v8787_v34  ;;  %v5530_v8 = vsub.s32 32, %v5529_v31  ;;  %v5534_v42 = vsub.s32 4294967266, %v5529_v31 }
 0x335   : > { %v3706_v29 = vand.u32 2139095040, %v11346_v24  ;;  %v3596_v14 = vsel %vm3594_vm9, %v3595_v27, %v8787_v34  ;;  %v5531_v4 = vshll.u32 %v11319_v16, %v5529_v31  ;;  %v7165_v53 = vsel %vm7163_vm12, %v7164_v26, %v11334_v39  ;;  %v11381_v39 = vpop.permute.xlu0 %7763 }
 0x336   : > { %v8240_v20 = vadd.s32 4294967169, %v2043_v33  ;;  %v3593_v40 = vsel %vm3591_vm7, %v8785_v59, %v3592_v48  ;;  %v5532_v47 = vshrl.u32 %v5514_v9, %v5530_v8  ;;  %v5535_v46 = vadd.s32 127, %v5534_v42 }
 0x337   : > { %v7166_v61 = vadd.s32 %v7165_v53, %v7161_v22  ;;  %vm3587_vm13 = vweird.f32 %v11030_v36  ;;  %v3597_v51 = vsel %vm3590_vm6, %v3593_v40, %v3596_v14  ;;  %vm11373_vm14 = vcmp.le.f32.partialorder %v5458_v57, 0.7853982 }
 0x338   : > { %v2049_v16 = vadd.s32 1, %v8240_v20  ;;  %v3598_v28 = vsel %vm3587_vm13, nan, %v3597_v51  ;;  %v5533_v7 = vor.u32 %v5532_v47, %v5531_v4  ;;  %v5536_v17 = vshll.u32 %v5535_v46, 23 }
 0x339   : > { %v7167_v32 = vadd.s32 536870912, %v7166_v61  ;;  %7531 = vst.msk [vmem:[#allocation2 + $0x8c] sm:$0xf] %vm7504_vm0, %v3598_v28  ;;  %v5547_v41 = vsel %vm11373_vm14, 0, %v5545_v38  ;;  %v2047_v36 = vor.u32 8388608, %v2046_v35  ;;  %v3707_v43 = vshrl.u32 %v3706_v29, 23  ;;  %v11408_v4 = vpop.permute.xlu0 %7771 }
 0x33a   : > { %vm2050_vm10 = vcmp.gt.s32.totalorder %v2049_v16, 0  ;;  %v5537_v63 = vor.u32 4788187, %v5536_v17  ;;  %v3703_v57 = vand.u32 2147483647, %v11346_v24  ;;  %v5540_v18 = vcvt.s32.f32 %v5533_v7 }
 0x33b   : > { %v7168_v25 = vshrl.u32 %v7167_v32, 30  ;;  %v2051_v52 = vsel %vm2050_vm10, %v2049_v16, 0  ;;  %v11383_v55 = vand.u32 3, %v5547_v41  ;;  %vm7108_vm11 = vcmp.lt.s32.totalorder %v11198_v45, 0 }
 0x33c   : > { %v2053_v15 = vand.u32 31, %v2051_v52  ;;  %v5538_v10 = vand.u32 2147483647, %v5537_v63  ;;  %v11388_v38 = vadd.s32 %v11333_v5, %v11339_v37  ;;  %v11390_v22 = vshll.u32 %v2047_v36, 8 }
 0x33d   : > { %v7169_v9 = vshll.u32 %v7168_v25, 30  ;;  %v8304_v26 = vadd.s32 4294967169, %v3707_v43  ;;  %v11396_v27 = vand.u32 8388607, %v3703_v57  ;;  %v11399_v31 = vrot.slane %v561_v30, %v9077_v21 }
 0x33e   : > { %v2054_v59 = vsub.s32 32, %v2053_v15  ;;  %v5541_v33 = vmul.f32 %v5540_v18, %v5538_v10  ;;  %v7192_v35 = vsub.s32 4, %v7168_v25  ;;  %v11401_v48 = vshrl.u32 %v2051_v52, 5 }
 0x33f   : > { %v11392_v34 = vsub.s32 %v7166_v61, %v7169_v9  ;;  %v2056_v29 = vshll.u32 %v8889_v54, %v2053_v15  ;;  %v2059_v53 = vshll.u32 %v8890_v56, %v2053_v15  ;;  %v2062_v20 = vshll.u32 %v8891_v58, %v2053_v15 }
 0x340   : > { %v2057_v5 = vshrl.u32 %v8890_v56, %v2054_v59  ;;  %v2060_v37 = vshrl.u32 %v8891_v58, %v2054_v59  ;;  %v5542_v8 = vxor.u32 2147483648, %v5541_v33  ;;  %v2063_v14 = vshrl.u32 %v8892_v60, %v2054_v59 }
 0x341   : > { %v7172_v42 = vsub.s32 0, %v11392_v34  ;;  %v2065_v40 = vshll.u32 %v8892_v60, %v2053_v15  ;;  %v2066_v47 = vshrl.u32 %v8893_v62, %v2054_v59  ;;  %v3713_v16 = vadd.s32 1, %v8304_v26 }
 0x342   : > { %v5543_v46 = vsel %vm5460_vm5, %v5542_v8, %v5541_v33  ;;  %v2058_v51 = vor.u32 %v2057_v5, %v2056_v29  ;;  %v2061_v7 = vor.u32 %v2060_v37, %v2059_v53  ;;  %v2064_v17 = vor.u32 %v2063_v14, %v2062_v20 }
 0x343   : > { %v8437_v61 = vmin.u32 %v7172_v42, %v11392_v34  ;;  %v5546_v28 = vsel %vm11373_vm14, %v11170_v6, %v5543_v46  ;;  %v2067_v32 = vor.u32 %v2066_v47, %v2065_v40  ;;  %v2068_v36 = vshll.u32 %v8893_v62, %v2053_v15  ;;  %v11434_v15 = vpop.permute.xlu0 %7779 }
 0x344   : > { %8788 = vcosq.f32 %v5546_v28  ;;  %v2069_v43 = vshrl.u32 %v8894_v11, %v2054_v59  ;;  %vm11424_vm15 = vcmp.le.f32.partialorder %v7106_v44, 0.7853982  ;;  %v7193_v50 = vsel %vm7108_vm11, %v7192_v35, %v7168_v25 }
 0x345   : > { %v7174_v41 = vclz %v8437_v61  ;;  %8790 = vsinq.f32 %v5546_v28  ;;  %v2055_v52 = vshrl.u32 %v8889_v54, %v2054_v59  ;;  %vm2071_vm2 = vcmp.lt.s32.totalorder %v11401_v48, 1 }
 0x346   : > { %v2070_v10 = vor.u32 %v2069_v43, %v2068_v36  ;;  %vm2073_vm1 = vcmp.lt.s32.totalorder %v11401_v48, 3  ;;  %vm2074_vm3 = vcmp.lt.s32.totalorder %v11401_v48, 4  ;;  %v2079_v44 = vsel %vm2071_vm2, %v2058_v51, %v2061_v7 }
 0x347   : > { %v8438_v30 = vadd.s32 4294967294, %v7174_v41  ;;  %v2076_v18 = vsel %vm2074_vm3, %v2064_v17, 2102212464  ;;  %v2080_v9 = vsel %vm2074_vm3, %v2067_v32, 920167782  ;;  %v2083_v25 = vsel %vm2071_vm2, %v2061_v7, %v2064_v17  ;;  %v11467_v28 = vpop.permute.xlu0 %7787 }
 0x348   : > { %vm2072_vm5 = vcmp.lt.s32.totalorder %v11401_v48, 2  ;;  %v2081_v59 = vsel %vm2073_vm1, %v2064_v17, %v2080_v9  ;;  %v2084_v26 = vsel %vm2074_vm3, %v2070_v10, 1326507024  ;;  %vm5553_vm6 = vcmp.eq.s32.totalorder %v11383_v55, 0 }
 0x349   : > { %vm8439_vm4 = vcmp.lt.s32.totalorder %v8438_v30, 0  ;;  %v2075_v35 = vsel %vm2071_vm2, %v2055_v52, %v2058_v51  ;;  %v2082_v5 = vsel %vm2072_vm5, %v2079_v44, %v2081_v59  ;;  %v2085_v37 = vsel %vm2073_vm1, %v2067_v32, %v2084_v26 }
 0x34a   : > { %v7177_v33 = vsel %vm8439_vm4, 0, %v8438_v30  ;;  %vm5552_vm7 = vcmp.lt.s32.totalorder %v11383_v55, 2  ;;  %v2077_v29 = vsel %vm2073_vm1, %v2061_v7, %v2076_v18  ;;  %v2086_v14 = vsel %vm2072_vm5, %v2083_v25, %v2085_v37 }
 0x34b   : > { %v7178_v8 = vsub.s32 32, %v7177_v33  ;;  %v7182_v42 = vsub.s32 4294967266, %v7177_v33  ;;  %vm5550_vm9 = vweird.f32 %v11170_v6  ;;  %v7179_v46 = vshll.u32 %v11392_v34, %v7177_v33  ;;  %v11490_v37 = vpop.permute.xlu0 %7795 }
 0x34c   : > { %v11457_v53 = vmul.u32.u64.low %v11390_v22, %v2086_v14  ;;  %v11458_v20 = vmul.u32.u64.high %v11390_v22, %v2086_v14, %v11457_v53  ;;  %v11461_v40 = vmul.u32.u64.low %v11390_v22, %v2082_v5  ;;  %v11462_v47 = vmul.u32.u64.high %v11390_v22, %v2082_v5, %v11461_v40 }
 0x34d   : > { %v7180_v61 = vshrl.u32 %v11388_v38, %v7178_v8  ;;  %v7183_v51 = vadd.s32 127, %v7182_v42  ;;  %vm3714_vm8 = vcmp.gt.s32.totalorder %v3713_v16, 0  ;;  %vm5556_vm12 = vcmp.eq.s32.totalorder %v11383_v55, 2 }
 0x34e   : > { %v2078_v7 = vsel %vm2072_vm5, %v2075_v35, %v2077_v29  ;;  %v3711_v17 = vor.u32 8388608, %v11396_v27  ;;  %v3715_v32 = vsel %vm3714_vm8, %v3713_v16, 0  ;;  %v8789_v41 = vpop.eup %8788  ;;  %v7195_v34 = vsel %vm11424_vm15, 0, %v7193_v50 }
 0x34f   : > { %v7181_v36 = vor.u32 %v7180_v61, %v7179_v46  ;;  %v7184_v43 = vshll.u32 %v7183_v51, 23  ;;  %v3717_v52 = vand.u32 31, %v3715_v32  ;;  %v8791_v38 = vpop.eup %8790  ;;  %v5557_v30 = vxor.u32 2147483648, %v8789_v41 }
 0x350   : > { %vm2096_vm13 = vc.u32 %v11458_v20, %v11461_v40  ;;  %v2097_v10 = vadd.s32 1, %v11462_v47  ;;  %v582_v48 = vmul.f32 %v11399_v31, %v9188_v12  ;;  %v5554_v18 = vxor.u32 2147483648, %v8791_v38 }
 0x351   : > { %v7185_v27 = vor.u32 4788187, %v7184_v43  ;;  %v2094_v16 = vmul.u32 %v11390_v22, %v2078_v7  ;;  %v3718_v44 = vsub.s32 32, %v3717_v52  ;;  %v5558_v9 = vsel %vm5556_vm12, %v5557_v30, %v8791_v38 }
 0x352   : > { %v11483_v50 = vand.u32 3, %v7195_v34  ;;  %v2098_v25 = vsel %vm2096_vm13, %v2097_v10, %v11462_v47  ;;  %v11486_v59 = vshll.u32 %v3711_v17, 8  ;;  %v5555_v26 = vsel %vm5553_vm6, %v8789_v41, %v5554_v18 }
 0x353   : > { %v7186_v33 = vand.u32 2147483647, %v7185_v27  ;;  %v7188_v35 = vcvt.s32.f32 %v7181_v36  ;;  %v2099_v5 = vadd.s32 %v2098_v25, %v2094_v16  ;;  %v5559_v22 = vsel %vm5552_vm7, %v5555_v26, %v5558_v9  ;;  %v11511_v16 = vpop.permute.xlu0 %7803 }
 0x354   : > { %v3720_v8 = vshll.u32 %v8889_v54, %v3717_v52  ;;  %v3721_v42 = vshrl.u32 %v8890_v56, %v3718_v44  ;;  %v3724_v29 = vshrl.u32 %v8891_v58, %v3718_v44  ;;  %v5560_v14 = vsel %vm5550_vm9, nan, %v5559_v22 }
 0x355   : > { %v7189_v53 = vmul.f32 %v7188_v35, %v7186_v33  ;;  %v2100_v47 = vadd.s32 536870912, %v2099_v5  ;;  %v3727_v46 = vshrl.u32 %v8892_v60, %v3718_v44  ;;  %7518 = vst.msk [vmem:[#allocation2 + $0x34] sm:$0xf] %vm7504_vm0, %v5560_v14  ;;  %v3716_v61 = vshrl.u32 %v3715_v32, 5 }
 0x356   : > { %v3723_v51 = vshll.u32 %v8890_v56, %v3717_v52  ;;  %v3726_v55 = vshll.u32 %v8891_v58, %v3717_v52  ;;  %v3730_v7 = vshrl.u32 %v8893_v62, %v3718_v44  ;;  %v3722_v36 = vor.u32 %v3721_v42, %v3720_v8 }
 0x357   : > { %v7190_v17 = vxor.u32 2147483648, %v7189_v53  ;;  %v2101_v41 = vshrl.u32 %v2100_v47, 30  ;;  %v3729_v43 = vshll.u32 %v8892_v60, %v3717_v52  ;;  %v3732_v38 = vshll.u32 %v8893_v62, %v3717_v52 }
 0x358   : > { %v3725_v6 = vor.u32 %v3724_v29, %v3723_v51  ;;  %v3728_v34 = vor.u32 %v3727_v46, %v3726_v55  ;;  %v3733_v30 = vshrl.u32 %v8894_v11, %v3718_v44  ;;  %v598_v27 = vmul.f32 %v11399_v31, %v9190_v13  ;;  %v11525_v46 = vpop.permute.xlu0 %7811 }
 0x359   : > { %v7191_v32 = vsel %vm7108_vm11, %v7190_v17, %v7189_v53  ;;  %v2102_v10 = vshll.u32 %v2101_v41, 30  ;;  %v3731_v18 = vor.u32 %v3730_v7, %v3729_v43  ;;  %v3719_v25 = vshrl.u32 %v8889_v54, %v3718_v44 }
 0x35a   : > { %v7194_v9 = vsel %vm11424_vm15, %v11198_v45, %v7191_v32  ;;  %v3734_v26 = vor.u32 %v3733_v30, %v3732_v38  ;;  %v11518_v52 = vrot.slane %v582_v48, %v9077_v21  ;;  %vm3735_vm14 = vcmp.lt.s32.totalorder %v3716_v61, 1 }
 0x35b   : > { %8792 = vcosq.f32 %v7194_v9  ;;  %v11520_v33 = vsub.s32 %v2099_v5, %v2102_v10  ;;  %vm3738_vm10 = vcmp.lt.s32.totalorder %v3716_v61, 4  ;;  %vm3736_vm11 = vcmp.lt.s32.totalorder %v3716_v61, 2 }
 0x35c   : > { %8794 = vsinq.f32 %v7194_v9  ;;  %v3740_v31 = vsel %vm3738_vm10, %v3728_v34, 2102212464  ;;  %v3743_v35 = vsel %vm3735_vm14, %v3722_v36, %v3725_v6  ;;  %v2125_v8 = vsub.s32 4, %v2101_v41 }
 0x35d   : > { %v2105_v22 = vsub.s32 0, %v11520_v33  ;;  %vm3737_vm2 = vcmp.lt.s32.totalorder %v3716_v61, 3  ;;  %v3744_v63 = vsel %vm3738_vm10, %v3731_v18, 920167782  ;;  %v3739_v42 = vsel %vm3735_vm14, %v3719_v25, %v3722_v36  ;;  %v11560_v25 = vpop.permute.xlu0 %7819 }
 0x35e   : > { %v3745_v44 = vsel %vm3737_vm2, %v3728_v34, %v3744_v63  ;;  %v3747_v29 = vsel %vm3735_vm14, %v3725_v6, %v3728_v34  ;;  %v3748_v14 = vsel %vm3738_vm10, %v3734_v26, 1326507024  ;;  %v3741_v53 = vsel %vm3737_vm2, %v3725_v6, %v3740_v31 }
 0x35f   : > { %v8241_v48 = vmin.u32 %v2105_v22, %v11520_v33  ;;  %v3746_v5 = vsel %vm3736_vm11, %v3743_v35, %v3745_v44  ;;  %v3749_v47 = vsel %vm3737_vm2, %v3731_v18, %v3748_v14  ;;  %vm11535_vm15 = vcmp.le.f32.partialorder %v2039_v19, 0.7853982 }
 0x360   : > { %v3750_v51 = vsel %vm3736_vm11, %v3747_v29, %v3749_v47  ;;  %v11529_v55 = vmul.u32.u64.low %v11486_v59, %v3746_v5  ;;  %v11530_v7 = vmul.u32.u64.high %v11486_v59, %v3746_v5, %v11529_v55  ;;  %vm2041_vm1 = vcmp.lt.s32.totalorder %v11328_v23, 0 }
 0x361   : > { %v2107_v36 = vclz %v8241_v48  ;;  %v2126_v43 = vsel %vm2041_vm1, %v2125_v8, %v2101_v41  ;;  %v3742_v6 = vsel %vm3736_vm11, %v3739_v42, %v3741_v53  ;;  %vm7200_vm3 = vcmp.lt.s32.totalorder %v11483_v50, 2  ;;  %v7461_v47 = vpop.permute.xlu0 %7460 }
 0x362   : > { %v11544_v34 = vmul.u32.u64.low %v11486_v59, %v3750_v51  ;;  %v11545_v38 = vmul.u32.u64.high %v11486_v59, %v3750_v51, %v11544_v34  ;;  %v11549_v19 = vrot.slane %v598_v27, %v9077_v21  ;;  %v5667_v32 = vand.u32 2139095040, %v11518_v52  ;;  %7539 = vst.msk [vmem:[#allocation2 + $0x44] sm:$0xf] %vm7504_vm0, %v7461_v47  ;;  %7547 = vst.msk [vmem:[#allocation2 + $0xa8] sm:$0xf] %vm7504_vm0, %v7461_v47 }
 0x363   : > { %v8242_v30 = vadd.s32 4294967294, %v2107_v36  ;;  %vm7201_vm4 = vcmp.eq.s32.totalorder %v11483_v50, 0  ;;  %vm7204_vm5 = vcmp.eq.s32.totalorder %v11483_v50, 2  ;;  %v2095_v61 = vadd.s32 %v11461_v40, %v11458_v20 }
 0x364   : > { %v3761_v41 = vadd.s32 1, %v11530_v7  ;;  %v2128_v18 = vsel %vm11535_vm15, 0, %v2126_v43  ;;  %v3758_v9 = vmul.u32 %v11486_v59, %v3742_v6  ;;  %v5668_v27 = vshrl.u32 %v5667_v32, 23 }
 0x365   : > { %v8793_v10 = vpop.eup %8792  ;;  %vm8243_vm6 = vcmp.lt.s32.totalorder %v8242_v30, 0  ;;  %vm3760_vm7 = vc.u32 %v11545_v38, %v11529_v55  ;;  %v5664_v20 = vand.u32 2147483647, %v11518_v52  ;;  %v7315_v63 = vand.u32 2139095040, %v11549_v19 }
 0x366   : > { %v8795_v26 = vpop.eup %8794  ;;  %v7205_v31 = vxor.u32 2147483648, %v8793_v10  ;;  %v2110_v35 = vsel %vm8243_vm6, 0, %v8242_v30  ;;  %v3762_v44 = vsel %vm3760_vm7, %v3761_v41, %v11530_v7  ;;  %v8380_v29 = vadd.s32 4294967169, %v5668_v27  ;;  %v7468_v41 = vpop.permute.xlu0 %7467 }
 0x367   : > { %v7202_v40 = vxor.u32 2147483648, %v8795_v26  ;;  %v2111_v22 = vsub.s32 32, %v2110_v35  ;;  %v2115_v8 = vsub.s32 4294967266, %v2110_v35  ;;  %v2112_v59 = vshll.u32 %v11520_v33, %v2110_v35  ;;  %7540 = vst.msk [vmem:[#allocation2 + $0x48] sm:$0xf] %vm7504_vm0, %v7468_v41 }
 0x368   : > { %v7206_v42 = vsel %vm7204_vm5, %v7205_v31, %v8795_v26  ;;  %v3763_v5 = vadd.s32 %v3762_v44, %v3758_v9  ;;  %vm7198_vm9 = vweird.f32 %v11198_v45  ;;  %v2132_v36 = vadd.s32 3, %v2128_v18  ;;  %7548 = vst.msk [vmem:[#allocation2 + $0xac] sm:$0xf] %vm7504_vm0, %v7468_v41 }
 0x369   : > { %v7203_v14 = vsel %vm7201_vm4, %v8793_v10, %v7202_v40  ;;  %v2113_v48 = vshrl.u32 %v2095_v61, %v2111_v22  ;;  %v2116_v53 = vadd.s32 127, %v2115_v8  ;;  %v5674_v43 = vadd.s32 1, %v8380_v29 }
 0x36a   : > { %v7207_v51 = vsel %vm7200_vm3, %v7203_v14, %v7206_v42  ;;  %v3764_v34 = vadd.s32 536870912, %v3763_v5  ;;  %v5671_v30 = vand.u32 8388607, %v5664_v20  ;;  %v7316_v61 = vshrl.u32 %v7315_v63, 23  ;;  %v7475_v44 = vpop.permute.xlu0 %7474 }
 0x36b   : > { %v7208_v33 = vsel %vm7198_vm9, nan, %v7207_v51  ;;  %v2114_v7 = vor.u32 %v2113_v48, %v2112_v59  ;;  %v2117_v6 = vshll.u32 %v2116_v53, 23  ;;  %vm5675_vm8 = vcmp.gt.s32.totalorder %v5674_v43, 0  ;;  %7541 = vst.msk [vmem:[#allocation2 + $0x4c] sm:$0xf] %vm7504_vm0, %v7475_v44 }
 0x36c   : > { %7534 = vst.msk [vmem:[#allocation2 + $0x98] sm:$0xf] %vm7504_vm0, %v7208_v33  ;;  %v3765_v32 = vshrl.u32 %v3764_v34, 30  ;;  %v5676_v50 = vsel %vm5675_vm8, %v5674_v43, 0  ;;  %v11582_v18 = vrot.slane %v11323_v49, %v9077_v21  ;;  %v11586_v26 = vand.u32 3, %v2132_v36 }
 0x36d   : > { %v2118_v45 = vor.u32 4788187, %v2117_v6  ;;  %v5678_v10 = vand.u32 31, %v5676_v50  ;;  %v2121_v27 = vcvt.s32.f32 %v2114_v7  ;;  %vm3705_vm12 = vcmp.lt.s32.totalorder %v11346_v24, 0  ;;  %7549 = vst.msk [vmem:[#allocation2 + $0xb0] sm:$0xf] %vm7504_vm0, %v7475_v44 }
 0x36e   : > { %v3766_v31 = vshll.u32 %v3765_v32, 30  ;;  %v11591_v35 = vadd.s32 %v11529_v55, %v11545_v38  ;;  %v5672_v40 = vor.u32 8388608, %v5671_v30  ;;  %v7312_v49 = vand.u32 2147483647, %v11549_v19 }
 0x36f   : > { %v2119_v9 = vand.u32 2147483647, %v2118_v45  ;;  %v5679_v22 = vsub.s32 32, %v5678_v10  ;;  %v11596_v42 = vshrl.u32 %v5676_v50, 5  ;;  %v8444_v59 = vadd.s32 4294967169, %v7316_v61  ;;  %v7482_v45 = vpop.permute.xlu0 %7481 }
 0x370   : > { %v11594_v63 = vsub.s32 %v3763_v5, %v3766_v31  ;;  %v3789_v29 = vsub.s32 4, %v3765_v32  ;;  %v5681_v14 = vshll.u32 %v8889_v54, %v5678_v10  ;;  %v5684_v5 = vshll.u32 %v8890_v56, %v5678_v10  ;;  %7542 = vst.msk [vmem:[#allocation2 + $0x50] sm:$0xf] %vm7504_vm0, %v7482_v45  ;;  %7550 = vst.msk [vmem:[#allocation2 + $0xb4] sm:$0xf] %vm7504_vm0, %v7482_v45 }
 0x371   : > { %v2122_v8 = vmul.f32 %v2121_v27, %v2119_v9  ;;  %v5682_v48 = vshrl.u32 %v8890_v56, %v5679_v22  ;;  %v5685_v53 = vshrl.u32 %v8891_v58, %v5679_v22  ;;  %v5688_v47 = vshrl.u32 %v8892_v60, %v5679_v22 }
 0x372   : > { %v3769_v38 = vsub.s32 0, %v11594_v63  ;;  %v5687_v36 = vshll.u32 %v8891_v58, %v5678_v10  ;;  %v5690_v43 = vshll.u32 %v8892_v60, %v5678_v10  ;;  %v5691_v33 = vshrl.u32 %v8893_v62, %v5679_v22 }
 0x373   : > { %v2123_v55 = vxor.u32 2147483648, %v2122_v8  ;;  %v5683_v51 = vor.u32 %v5682_v48, %v5681_v14  ;;  %v5686_v34 = vor.u32 %v5685_v53, %v5684_v5  ;;  %v5693_v30 = vshll.u32 %v8893_v62, %v5678_v10 }
 0x374   : > { %v8305_v6 = vmin.u32 %v3769_v38, %v11594_v63  ;;  %v5689_v61 = vor.u32 %v5688_v47, %v5687_v36  ;;  %v5692_v41 = vor.u32 %v5691_v33, %v5690_v43  ;;  %v5694_v9 = vshrl.u32 %v8894_v11, %v5679_v22 }
 0x375   : > { %v2124_v7 = vsel %vm2041_vm1, %v2123_v55, %v2122_v8  ;;  %v11619_v31 = vshll.u32 %v5672_v40, 8  ;;  %v7322_v8 = vadd.s32 1, %v8444_v59  ;;  %v11623_v10 = vsel %vm3705_vm12, %v3789_v29, %v3765_v32  ;;  %v7489_v40 = vpop.permute.xlu0 %7488 }
 0x376   : > { %v2127_v50 = vsel %vm11535_vm15, %v11328_v23, %v2124_v7  ;;  %v3771_v27 = vclz %v8305_v6  ;;  %v5680_v17 = vshrl.u32 %v8889_v54, %v5679_v22  ;;  %v5695_v44 = vor.u32 %v5694_v9, %v5693_v30  ;;  %7543 = vst.msk [vmem:[#allocation2 + $0x54] sm:$0xf] %vm7504_vm0, %v7489_v40  ;;  %7551 = vst.msk [vmem:[#allocation2 + $0xb8] sm:$0xf] %vm7504_vm0, %v7489_v40 }
 0x377   : > { %8796 = vcosq.f32 %v2127_v50  ;;  %vm11628_vm13 = vcmp.le.f32.partialorder %v3703_v57, 0.7853982  ;;  %vm5696_vm14 = vcmp.lt.s32.totalorder %v11596_v42, 1  ;;  %vm5698_vm10 = vcmp.lt.s32.totalorder %v11596_v42, 3 }
 0x378   : > { %8798 = vsinq.f32 %v2127_v50  ;;  %v8306_v48 = vadd.s32 4294967294, %v3771_v27  ;;  %vm5699_vm11 = vcmp.lt.s32.totalorder %v11596_v42, 4  ;;  %v5704_v32 = vsel %vm5696_vm14, %v5683_v51, %v5686_v34 }
 0x379   : > { %v5701_v59 = vsel %vm5699_vm11, %v5689_v61, 2102212464  ;;  %v5705_v29 = vsel %vm5699_vm11, %v5692_v41, 920167782  ;;  %v5708_v53 = vsel %vm5696_vm14, %v5686_v34, %v5689_v61  ;;  %vm5697_vm15 = vcmp.lt.s32.totalorder %v11596_v42, 2  ;;  %v7496_v6 = vpop.permute.xlu0 %7495 }
 0x37a   : > { %vm8307_vm2 = vcmp.lt.s32.totalorder %v8306_v48, 0  ;;  %v5706_v57 = vsel %vm5698_vm10, %v5689_v61, %v5705_v29  ;;  %v5709_v22 = vsel %vm5699_vm11, %v5695_v44, 1326507024  ;;  %v5700_v38 = vsel %vm5696_vm14, %v5680_v17, %v5683_v51  ;;  %7544 = vst.msk [vmem:[#allocation2 + $0x58] sm:$0xf] %vm7504_vm0, %v7496_v6 }
 0x37b   : > { %v3774_v55 = vsel %vm8307_vm2, 0, %v8306_v48  ;;  %v5707_v5 = vsel %vm5697_vm15, %v5704_v32, %v5706_v57  ;;  %v5710_v47 = vsel %vm5698_vm10, %v5692_v41, %v5709_v22  ;;  %vm2134_vm1 = vcmp.lt.s32.totalorder %v11586_v26, 2  ;;  %7552 = vst.msk [vmem:[#allocation2 + $0xbc] sm:$0xf] %vm7504_vm0, %v7496_v6 }
 0x37c   : > { %v3775_v36 = vsub.s32 32, %v3774_v55  ;;  %v3779_v43 = vsub.s32 4294967266, %v3774_v55  ;;  %v5702_v33 = vsel %vm5698_vm10, %v5686_v34, %v5701_v59  ;;  %v5711_v7 = vsel %vm5697_vm15, %v5708_v53, %v5710_v47 }
 0x37d   : > { %vm2131_vm3 = vweird.f32 %v11328_v23  ;;  %v11651_v51 = vmul.u32.u64.low %v11619_v31, %v5711_v7  ;;  %v11652_v30 = vmul.u32.u64.high %v11619_v31, %v5711_v7, %v11651_v51  ;;  %v3776_v34 = vshll.u32 %v11594_v63, %v3774_v55  ;;  %v7503_v63 = vpop.permute.xlu0 %7502 }
 0x37e   : > { %v11655_v45 = vmul.u32.u64.low %v11619_v31, %v5707_v5  ;;  %v11656_v50 = vmul.u32.u64.high %v11619_v31, %v5707_v5, %v11655_v45  ;;  %v3777_v61 = vshrl.u32 %v11591_v35, %v3775_v36  ;;  %v3780_v41 = vadd.s32 127, %v3779_v43  ;;  %7545 = vst.msk [vmem:[#allocation2 + $0x5c] sm:$0xf] %vm7504_vm0, %v7503_v63  ;;  %7553 = vst.msk [vmem:[#allocation2 + $0xc0] sm:$0xf] %vm7504_vm0, %v7503_v63 }
 0x37f   : > { %vm7323_vm4 = vcmp.gt.s32.totalorder %v7322_v8, 0  ;;  %vm2135_vm5 = vcmp.eq.s32.totalorder %v11586_v26, 0  ;;  %v5703_v9 = vsel %vm5697_vm15, %v5700_v38, %v5702_v33  ;;  %v7319_v27 = vand.u32 8388607, %v7312_v49 }
 0x380   : > { %v7324_v17 = vsel %vm7323_vm4, %v7322_v8, 0  ;;  %vm2138_vm6 = vcmp.eq.s32.totalorder %v11586_v26, 2  ;;  %v3778_v48 = vor.u32 %v3777_v61, %v3776_v34  ;;  %v3781_v40 = vshll.u32 %v3780_v41, 23 }
 0x381   : > { %v8797_v44 = vpop.eup %8796  ;;  %v7326_v59 = vand.u32 31, %v7324_v17  ;;  %v3792_v29 = vsel %vm11628_vm13, 0, %v11623_v10  ;;  %vm5721_vm7 = vc.u32 %v11652_v30, %v11655_v45  ;;  %v5722_v42 = vadd.s32 1, %v11656_v50 }
 0x382   : > { %v8799_v32 = vpop.eup %8798  ;;  %v2139_v35 = vxor.u32 2147483648, %v8797_v44  ;;  %v3782_v53 = vor.u32 4788187, %v3781_v40  ;;  %v5719_v57 = vmul.u32 %v11619_v31, %v5703_v9  ;;  %v7320_v10 = vor.u32 8388608, %v7319_v27 }
 0x383   : > { %v2136_v8 = vxor.u32 2147483648, %v8799_v32  ;;  %v7327_v22 = vsub.s32 32, %v7326_v59  ;;  %v5723_v38 = vsel %vm5721_vm7, %v5722_v42, %v11656_v50  ;;  %v581_v5 = vmul.f32 %v11582_v18, %v9188_v12 }
 0x384   : > { %v2140_v55 = vsel %vm2138_vm6, %v2139_v35, %v8799_v32  ;;  %v3783_v36 = vand.u32 2147483647, %v3782_v53  ;;  %v3785_v43 = vcvt.s32.f32 %v3778_v48  ;;  %v5724_v33 = vadd.s32 %v5723_v38, %v5719_v57 }
 0x385   : > { %v2137_v47 = vsel %vm2135_vm5, %v8797_v44, %v2136_v8  ;;  %v3796_v31 = vadd.s32 3, %v3792_v29  ;;  %v7330_v6 = vshrl.u32 %v8890_v56, %v7327_v22  ;;  %v7333_v51 = vshrl.u32 %v8891_v58, %v7327_v22 }
 0x386   : > { %v2141_v7 = vsel %vm2134_vm1, %v2137_v47, %v2140_v55  ;;  %v3786_v34 = vmul.f32 %v3785_v43, %v3783_v36  ;;  %v5725_v61 = vadd.s32 536870912, %v5724_v33  ;;  %v7336_v12 = vshrl.u32 %v8892_v60, %v7327_v22 }
 0x387   : > { %v2142_v50 = vsel %vm2131_vm3, nan, %v2141_v7  ;;  %v7325_v41 = vshrl.u32 %v7324_v17, 5  ;;  %v7329_v9 = vshll.u32 %v8889_v54, %v7326_v59  ;;  %v7335_v26 = vshll.u32 %v8891_v58, %v7326_v59 }
 0x388   : > { %7517 = vst.msk [vmem:[#allocation2 + $0x30] sm:$0xf] %vm7504_vm0, %v2142_v50  ;;  %v7339_v27 = vshrl.u32 %v8893_v62, %v7327_v22  ;;  %v3787_v44 = vxor.u32 2147483648, %v3786_v34  ;;  %v5726_v48 = vshrl.u32 %v5725_v61, 30  ;;  %v7332_v40 = vshll.u32 %v8890_v56, %v7326_v59 }
 0x389   : > { %v7338_v23 = vshll.u32 %v8892_v60, %v7326_v59  ;;  %v7331_v63 = vor.u32 %v7330_v6, %v7329_v9  ;;  %v7337_v32 = vor.u32 %v7336_v12, %v7335_v26  ;;  %v7341_v35 = vshll.u32 %v8893_v62, %v7326_v59 }
 0x38a   : > { %v7342_v29 = vshrl.u32 %v8894_v11, %v7327_v22  ;;  %v3788_v17 = vsel %vm3705_vm12, %v3787_v44, %v3786_v34  ;;  %v5727_v42 = vshll.u32 %v5726_v48, 30  ;;  %v7334_v8 = vor.u32 %v7333_v51, %v7332_v40 }
 0x38b   : > { %v7340_v53 = vor.u32 %v7339_v27, %v7338_v23  ;;  %v3791_v57 = vsel %vm11628_vm13, %v11346_v24, %v3788_v17  ;;  %v11705_v55 = vand.u32 3, %v3796_v31  ;;  %v11707_v47 = vshll.u32 %v7320_v10, 8 }
 0x38c   : > { %v7343_v38 = vor.u32 %v7342_v29, %v7341_v35  ;;  %8800 = vcosq.f32 %v3791_v57  ;;  %v11709_v36 = vsub.s32 %v5724_v33, %v5727_v42  ;;  %vm7347_vm9 = vcmp.lt.s32.totalorder %v7325_v41, 4 }
 0x38d   : > { %v597_v59 = vmul.f32 %v11582_v18, %v9190_v13  ;;  %8802 = vsinq.f32 %v3791_v57  ;;  %v7328_v43 = vshrl.u32 %v8889_v54, %v7327_v22  ;;  %vm7344_vm8 = vcmp.lt.s32.totalorder %v7325_v41, 1 }
 0x38e   : > { %v7349_v7 = vsel %vm7347_vm9, %v7337_v32, 2102212464  ;;  %v5730_v14 = vsub.s32 0, %v11709_v36  ;;  %vm7346_vm12 = vcmp.lt.s32.totalorder %v7325_v41, 3  ;;  %v7352_v31 = vsel %vm7344_vm8, %v7331_v63, %v7334_v8 }
 0x38f   : > { %v7353_v6 = vsel %vm7347_vm9, %v7340_v53, 920167782  ;;  %v7356_v10 = vsel %vm7344_vm8, %v7334_v8, %v7337_v32  ;;  %v7357_v50 = vsel %vm7347_vm9, %v7343_v38, 1326507024  ;;  %v11716_v33 = vrot.slane %v581_v5, %v9077_v21 }
 0x390   : > { %v7354_v51 = vsel %vm7346_vm12, %v7337_v32, %v7353_v6  ;;  %v8381_v34 = vmin.u32 %v5730_v14, %v11709_v36  ;;  %vm7345_vm13 = vcmp.lt.s32.totalorder %v7325_v41, 2  ;;  %v7348_v13 = vsel %vm7344_vm8, %v7328_v43, %v7331_v63 }
 0x391   : > { %v7350_v18 = vsel %vm7346_vm12, %v7334_v8, %v7349_v7  ;;  %v5750_v61 = vsub.s32 4, %v5726_v48  ;;  %v7355_v22 = vsel %vm7345_vm13, %v7352_v31, %v7354_v51  ;;  %v7358_v12 = vsel %vm7346_vm12, %v7340_v53, %v7357_v50 }
 0x392   : > { %v5732_v9 = vclz %v8381_v34  ;;  %v7359_v26 = vsel %vm7345_vm13, %v7356_v10, %v7358_v12  ;;  %v11720_v27 = vmul.u32.u64.low %v11707_v47, %v7355_v22  ;;  %v11721_v44 = vmul.u32.u64.high %v11707_v47, %v7355_v22, %v11720_v27 }
 0x393   : > { %vm3795_vm14 = vweird.f32 %v11346_v24  ;;  %vm5666_vm10 = vcmp.lt.s32.totalorder %v11518_v52, 0  ;;  %v7351_v5 = vsel %vm7345_vm13, %v7348_v13, %v7350_v18  ;;  %vm3798_vm11 = vcmp.lt.s32.totalorder %v11705_v55, 2 }
 0x394   : > { %v11726_v40 = vmul.u32.u64.low %v11707_v47, %v7359_v26  ;;  %v11727_v23 = vmul.u32.u64.high %v11707_v47, %v7359_v26, %v11726_v40  ;;  %v8382_v41 = vadd.s32 4294967294, %v5732_v9  ;;  %v11731_v63 = vrot.slane %v597_v59, %v9077_v21 }
 0x395   : > { %v2250_v32 = vand.u32 2139095040, %v11716_v33  ;;  %vm3799_vm2 = vcmp.eq.s32.totalorder %v11705_v55, 0  ;;  %vm3802_vm15 = vcmp.eq.s32.totalorder %v11705_v55, 2  ;;  %v5720_v35 = vadd.s32 %v11655_v45, %v11652_v30 }
 0x396   : > { %v5751_v29 = vsel %vm5666_vm10, %v5750_v61, %v5726_v48  ;;  %v8801_v17 = vpop.eup %8800  ;;  %vm8383_vm1 = vcmp.lt.s32.totalorder %v8382_v41, 0  ;;  %v7367_v42 = vmul.u32 %v11707_v47, %v7351_v5  ;;  %v7370_v8 = vadd.s32 1, %v11721_v44 }
 0x397   : > { %v2251_v21 = vshrl.u32 %v2250_v32, 23  ;;  %v8803_v53 = vpop.eup %8802  ;;  %v3803_v57 = vxor.u32 2147483648, %v8801_v17  ;;  %v5735_v38 = vsel %vm8383_vm1, 0, %v8382_v41  ;;  %vm7369_vm3 = vc.u32 %v11727_v23, %v11720_v27 }
 0x398   : > { %v2247_v59 = vand.u32 2147483647, %v11716_v33  ;;  %v3800_v43 = vxor.u32 2147483648, %v8803_v53  ;;  %v5736_v7 = vsub.s32 32, %v5735_v38  ;;  %v5740_v30 = vsub.s32 4294967266, %v5735_v38 }
 0x399   : > { %v3914_v45 = vand.u32 2139095040, %v11731_v63  ;;  %v3804_v48 = vsel %vm3802_vm15, %v3803_v57, %v8803_v53  ;;  %v5737_v47 = vshll.u32 %v11709_v36, %v5735_v38  ;;  %v7371_v14 = vsel %vm7369_vm3, %v7370_v8, %v11721_v44 }
 0x39a   : > { %v8248_v31 = vadd.s32 4294967169, %v2251_v21  ;;  %v3801_v6 = vsel %vm3799_vm2, %v8801_v17, %v3800_v43  ;;  %v5738_v51 = vshrl.u32 %v5720_v35, %v5736_v7  ;;  %v5741_v10 = vadd.s32 127, %v5740_v30 }
 0x39b   : > { %v7372_v50 = vadd.s32 %v7371_v14, %v7367_v42  ;;  %v3805_v34 = vsel %vm3798_vm11, %v3801_v6, %v3804_v48  ;;  %vm11755_vm4 = vcmp.le.f32.partialorder %v5664_v20, 0.7853982  ;;  %v2254_v36 = vand.u32 8388607, %v2247_v59 }
 0x39c   : > { %v2257_v18 = vadd.s32 1, %v8248_v31  ;;  %v3806_v61 = vsel %vm3795_vm14, nan, %v3805_v34  ;;  %v5739_v22 = vor.u32 %v5738_v51, %v5737_v47  ;;  %v5742_v12 = vshll.u32 %v5741_v10, 23 }
 0x39d   : > { %v7373_v9 = vadd.s32 536870912, %v7372_v50  ;;  %7533 = vst.msk [vmem:[#allocation2 + $0x94] sm:$0xf] %vm7504_vm0, %v3806_v61  ;;  %v5753_v55 = vsel %vm11755_vm4, 0, %v5751_v29  ;;  %v3915_v5 = vshrl.u32 %v3914_v45, 23  ;;  %v2255_v40 = vor.u32 8388608, %v2254_v36 }
 0x39e   : > { %vm2258_vm5 = vcmp.gt.s32.totalorder %v2257_v18, 0  ;;  %v5743_v20 = vor.u32 4788187, %v5742_v12  ;;  %v5746_v35 = vcvt.s32.f32 %v5739_v22  ;;  %v11769_v17 = vand.u32 3, %v5753_v55  ;;  %v11794_v12 = vpop.permute.xlu1 %7759 }
 0x39f   : > { %v11766_v26 = vshrl.u32 %v7373_v9, 30  ;;  %v2259_v44 = vsel %vm2258_vm5, %v2257_v18, 0  ;;  %v3911_v8 = vand.u32 2147483647, %v11731_v63  ;;  %v7368_v29 = vadd.s32 %v11720_v27, %v11727_v23 }
 0x3a0   : > { %v2261_v41 = vand.u32 31, %v2259_v44  ;;  %v5744_v32 = vand.u32 2147483647, %v5743_v20  ;;  %v8312_v57 = vadd.s32 4294967169, %v3915_v5  ;;  %v11775_v38 = vshrl.u32 %v2259_v44, 5 }
 0x3a1   : > { %v7375_v24 = vshll.u32 %v11766_v26, 30  ;;  %v11779_v30 = vshll.u32 %v2255_v40, 8  ;;  %vm7314_vm6 = vcmp.lt.s32.totalorder %v11549_v19, 0  ;;  %v7398_v44 = vsub.s32 4, %v11766_v26 }
 0x3a2   : > { %v2262_v42 = vsub.s32 32, %v2261_v41  ;;  %v5747_v21 = vmul.f32 %v5746_v35, %v5744_v32  ;;  %v2264_v47 = vshll.u32 %v8889_v54, %v2261_v41  ;;  %v2267_v27 = vshll.u32 %v8890_v56, %v2261_v41 }
 0x3a3   : > { %v11773_v53 = vsub.s32 %v7372_v50, %v7375_v24  ;;  %v2270_v23 = vshll.u32 %v8891_v58, %v2261_v41  ;;  %v2273_v31 = vshll.u32 %v8892_v60, %v2261_v41  ;;  %v3921_v34 = vadd.s32 1, %v8312_v57 }
 0x3a4   : > { %v2265_v43 = vshrl.u32 %v8890_v56, %v2262_v42  ;;  %v2268_v7 = vshrl.u32 %v8891_v58, %v2262_v42  ;;  %v5748_v45 = vxor.u32 2147483648, %v5747_v21  ;;  %v2271_v14 = vshrl.u32 %v8892_v60, %v2262_v42 }
 0x3a5   : > { %v7378_v48 = vsub.s32 0, %v11773_v53  ;;  %v2274_v6 = vshrl.u32 %v8893_v62, %v2262_v42  ;;  %v2276_v55 = vshll.u32 %v8893_v62, %v2261_v41  ;;  %v2277_v20 = vshrl.u32 %v8894_v11, %v2262_v42 }
 0x3a6   : > { %v5749_v51 = vsel %vm5666_vm10, %v5748_v45, %v5747_v21  ;;  %v2266_v50 = vor.u32 %v2265_v43, %v2264_v47  ;;  %v2269_v18 = vor.u32 %v2268_v7, %v2267_v27  ;;  %v2272_v61 = vor.u32 %v2271_v14, %v2270_v23  ;;  %v11817_v47 = vpop.permute.xlu1 %7767 }
 0x3a7   : > { %v8445_v10 = vmin.u32 %v7378_v48, %v11773_v53  ;;  %v5752_v36 = vsel %vm11755_vm4, %v11518_v52, %v5749_v51  ;;  %v2275_v22 = vor.u32 %v2274_v6, %v2273_v31  ;;  %v2263_v5 = vshrl.u32 %v8889_v54, %v2262_v42 }
 0x3a8   : > { %8804 = vcosq.f32 %v5752_v36  ;;  %vm2279_vm7 = vcmp.lt.s32.totalorder %v11775_v38, 1  ;;  %v2278_v40 = vor.u32 %v2277_v20, %v2276_v55  ;;  %vm2281_vm9 = vcmp.lt.s32.totalorder %v11775_v38, 3 }
 0x3a9   : > { %v7380_v9 = vclz %v8445_v10  ;;  %8806 = vsinq.f32 %v5752_v36  ;;  %vm2282_vm8 = vcmp.lt.s32.totalorder %v11775_v38, 4  ;;  %v2287_v35 = vsel %vm2279_vm7, %v2266_v50, %v2269_v18 }
 0x3aa   : > { %v2284_v32 = vsel %vm2282_vm8, %v2272_v61, 2102212464  ;;  %v2288_v41 = vsel %vm2282_vm8, %v2275_v22, 920167782  ;;  %v2291_v24 = vsel %vm2279_vm7, %v2269_v18, %v2272_v61  ;;  %vm11806_vm12 = vcmp.le.f32.partialorder %v7312_v49, 0.7853982 }
 0x3ab   : > { %v8446_v13 = vadd.s32 4294967294, %v7380_v9  ;;  %vm2280_vm14 = vcmp.lt.s32.totalorder %v11775_v38, 2  ;;  %v2289_v42 = vsel %vm2281_vm9, %v2272_v61, %v2288_v41  ;;  %v2292_v57 = vsel %vm2282_vm8, %v2278_v40, 1326507024 }
 0x3ac   : > { %v2283_v7 = vsel %vm2279_vm7, %v2263_v5, %v2266_v50  ;;  %v2290_v45 = vsel %vm2280_vm14, %v2287_v35, %v2289_v42  ;;  %v2293_v48 = vsel %vm2281_vm9, %v2275_v22, %v2292_v57  ;;  %vm5758_vm10 = vcmp.lt.s32.totalorder %v11769_v17, 2 }
 0x3ad   : > { %vm8447_vm13 = vcmp.lt.s32.totalorder %v8446_v13, 0  ;;  %v2285_v27 = vsel %vm2281_vm9, %v2269_v18, %v2284_v32  ;;  %v2294_v23 = vsel %vm2280_vm14, %v2291_v24, %v2293_v48  ;;  %vm5756_vm11 = vweird.f32 %v11518_v52  ;;  %v11847_v32 = vpop.permute.xlu1 %7775 }
 0x3ae   : > { %v7383_v43 = vsel %vm8447_vm13, 0, %v8446_v13  ;;  %v11826_v31 = vmul.u32.u64.low %v11779_v30, %v2294_v23  ;;  %v11827_v6 = vmul.u32.u64.high %v11779_v30, %v2294_v23, %v11826_v31  ;;  %vm3922_vm2 = vcmp.gt.s32.totalorder %v3921_v34, 0 }
 0x3af   : > { %v7384_v49 = vsub.s32 32, %v7383_v43  ;;  %v7388_v14 = vsub.s32 4294967266, %v7383_v43  ;;  %v11830_v51 = vmul.u32.u64.low %v11779_v30, %v2290_v45  ;;  %v11831_v10 = vmul.u32.u64.high %v11779_v30, %v2290_v45, %v11830_v51 }
 0x3b0   : > { %v7385_v50 = vshll.u32 %v11773_v53, %v7383_v43  ;;  %vm5759_vm15 = vcmp.eq.s32.totalorder %v11769_v17, 0  ;;  %v2286_v18 = vsel %vm2280_vm14, %v2283_v7, %v2285_v27  ;;  %v3918_v22 = vand.u32 8388607, %v3911_v8 }
 0x3b1   : > { %v7386_v36 = vshrl.u32 %v7368_v29, %v7384_v49  ;;  %v7389_v61 = vadd.s32 127, %v7388_v14  ;;  %v3923_v9 = vsel %vm3922_vm2, %v3921_v34, 0  ;;  %v7399_v13 = vsel %vm7314_vm6, %v7398_v44, %v11766_v26 }
 0x3b2   : > { %v8805_v55 = vpop.eup %8804  ;;  %v3925_v53 = vand.u32 31, %v3923_v9  ;;  %vm5762_vm1 = vcmp.eq.s32.totalorder %v11769_v17, 2  ;;  %vm2304_vm3 = vc.u32 %v11827_v6, %v11830_v51  ;;  %v2305_v38 = vadd.s32 1, %v11831_v10 }
 0x3b3   : > { %v7387_v20 = vor.u32 %v7386_v36, %v7385_v50  ;;  %v7390_v5 = vshll.u32 %v7389_v61, 23  ;;  %v8807_v29 = vpop.eup %8806  ;;  %v5763_v40 = vxor.u32 2147483648, %v8805_v55  ;;  %v2302_v41 = vmul.u32 %v11779_v30, %v2286_v18 }
 0x3b4   : > { %v5760_v34 = vxor.u32 2147483648, %v8807_v29  ;;  %v3926_v24 = vsub.s32 32, %v3925_v53  ;;  %v7401_v26 = vsel %vm11806_vm12, 0, %v7399_v13  ;;  %v2306_v44 = vsel %vm2304_vm3, %v2305_v38, %v11831_v10 }
 0x3b5   : > { %v7391_v35 = vor.u32 4788187, %v7390_v5  ;;  %v5764_v42 = vsel %vm5762_vm1, %v5763_v40, %v8807_v29  ;;  %v3919_v57 = vor.u32 8388608, %v3918_v22  ;;  %v7394_v45 = vcvt.s32.f32 %v7387_v20  ;;  %v11867_v22 = vpop.permute.xlu1 %7783 }
 0x3b6   : > { %v5761_v43 = vsel %vm5759_vm15, %v8805_v55, %v5760_v34  ;;  %v2307_v48 = vadd.s32 %v2306_v44, %v2302_v41  ;;  %v3928_v14 = vshll.u32 %v8889_v54, %v3925_v53  ;;  %v3929_v30 = vshrl.u32 %v8890_v56, %v3926_v24  ;;  %v7557_v44 = vld [vmem:[#allocation2] sm:$0xf] }
 0x3b7   : > { %v7392_v7 = vand.u32 2147483647, %v7391_v35  ;;  %v5765_v49 = vsel %vm5758_vm10, %v5761_v43, %v5764_v42  ;;  %v3932_v27 = vshrl.u32 %v8891_v58, %v3926_v24  ;;  %v3935_v50 = vshrl.u32 %v8892_v60, %v3926_v24 }
 0x3b8   : > { %v5766_v23 = vsel %vm5756_vm11, nan, %v5765_v49  ;;  %v2308_v10 = vadd.s32 536870912, %v2307_v48  ;;  %v3924_v36 = vshrl.u32 %v3923_v9, 5  ;;  %v3931_v61 = vshll.u32 %v8890_v56, %v3925_v53 }
 0x3b9   : > { %v7395_v31 = vmul.f32 %v7394_v45, %v7392_v7  ;;  %7520 = vst.msk [vmem:[#allocation2 + $0x3c] sm:$0xf] %vm7504_vm0, %v5766_v23  ;;  %v3934_v17 = vshll.u32 %v8891_v58, %v3925_v53  ;;  %v3938_v18 = vshrl.u32 %v8893_v62, %v3926_v24  ;;  %v3930_v52 = vor.u32 %v3929_v30, %v3928_v14  ;;  %v11887_v43 = vpop.permute.xlu1 %7791 }
 0x3ba   : > { %v11869_v20 = vshrl.u32 %v2308_v10, 30  ;;  %v3937_v5 = vshll.u32 %v8892_v60, %v3925_v53  ;;  %v3933_v13 = vor.u32 %v3932_v27, %v3931_v61  ;;  %v3940_v40 = vshll.u32 %v8893_v62, %v3925_v53  ;;  %v7559_v10 = vld [vmem:[#allocation2 + $0x8] sm:$0xf] }
 0x3bb   : > { %v7396_v55 = vxor.u32 2147483648, %v7395_v31  ;;  %v3936_v29 = vor.u32 %v3935_v50, %v3934_v17  ;;  %v3941_v9 = vshrl.u32 %v8894_v11, %v3926_v24  ;;  %v11880_v35 = vand.u32 3, %v7401_v26  ;;  %v7558_v50 = vld [vmem:[#allocation2 + $0x4] sm:$0xf] }
 0x3bc   : > { %v2310_v58 = vshll.u32 %v11869_v20, 30  ;;  %v3939_v38 = vor.u32 %v3938_v18, %v3937_v5  ;;  %v11882_v60 = vshll.u32 %v3919_v57, 8  ;;  %vm3943_vm4 = vcmp.lt.s32.totalorder %v3924_v36, 1 }
 0x3bd   : > { %v7397_v56 = vsel %vm7314_vm6, %v7396_v55, %v7395_v31  ;;  %v3942_v41 = vor.u32 %v3941_v9, %v3940_v40  ;;  %vm3946_vm5 = vcmp.lt.s32.totalorder %v3924_v36, 4  ;;  %v3927_v62 = vshrl.u32 %v8889_v54, %v3926_v24  ;;  %v7560_v40 = vld [vmem:[#allocation2 + $0xc] sm:$0xf] }
 0x3be   : > { %v7400_v34 = vsel %vm11806_vm12, %v11549_v19, %v7397_v56  ;;  %v11884_v42 = vsub.s32 %v2307_v48, %v2310_v58  ;;  %v3948_v11 = vsel %vm3946_vm5, %v3936_v29, 2102212464  ;;  %v3951_v53 = vsel %vm3943_vm4, %v3930_v52, %v3933_v13 }
 0x3bf   : > { %8808 = vcosq.f32 %v7400_v34  ;;  %vm3944_vm6 = vcmp.lt.s32.totalorder %v3924_v36, 2  ;;  %vm3945_vm7 = vcmp.lt.s32.totalorder %v3924_v36, 3  ;;  %v3952_v26 = vsel %vm3946_vm5, %v3939_v38, 920167782 }
 0x3c0   : > { %8810 = vsinq.f32 %v7400_v34  ;;  %v2313_v21 = vsub.s32 0, %v11884_v42  ;;  %v3947_v57 = vsel %vm3943_vm4, %v3927_v62, %v3930_v52  ;;  %v3953_v7 = vsel %vm3945_vm7, %v3936_v29, %v3952_v26  ;;  %v11905_v52 = vpop.permute.xlu1 %7799 }
 0x3c1   : > { %v3955_v45 = vsel %vm3943_vm4, %v3933_v13, %v3936_v29  ;;  %v3956_v48 = vsel %vm3946_vm5, %v3942_v41, 1326507024  ;;  %v3949_v14 = vsel %vm3945_vm7, %v3933_v13, %v3948_v11  ;;  %v3954_v30 = vsel %vm3944_vm6, %v3951_v53, %v3953_v7  ;;  %v7561_v7 = vld [vmem:[#allocation2 + $0x10] sm:$0xf] }
 0x3c2   : > { %v8249_v49 = vmin.u32 %v2313_v21, %v11884_v42  ;;  %v3957_v54 = vsel %vm3945_vm7, %v3939_v38, %v3956_v48  ;;  %v11894_v27 = vmul.u32.u64.low %v11882_v60, %v3954_v30  ;;  %v11895_v23 = vmul.u32.u64.high %v11882_v60, %v3954_v30, %v11894_v27 }
 0x3c3   : > { %v3958_v24 = vsel %vm3944_vm6, %v3955_v45, %v3957_v54  ;;  %v7858_v31 = vmul.f32 %v11794_v12, %v7557_v44  ;;  %vm7404_vm9 = vweird.f32 %v11549_v19  ;;  %v3950_v17 = vsel %vm3944_vm6, %v3947_v57, %v3949_v14 }
 0x3c4   : > { %v2315_v61 = vclz %v8249_v49  ;;  %v11902_v18 = vmul.u32.u64.low %v11882_v60, %v3958_v24  ;;  %v11903_v55 = vmul.u32.u64.high %v11882_v60, %v3958_v24, %v11902_v18  ;;  %vm7406_vm8 = vcmp.lt.s32.totalorder %v11880_v35, 2  ;;  %v11926_v48 = vpop.permute.xlu1 %7807 }
 0x3c5   : > { %v7860_v13 = vmul.f32 %v11817_v47, %v7559_v10  ;;  %v7859_v29 = vmul.f32 %v11381_v39, %v7558_v50  ;;  %vm7407_vm12 = vcmp.eq.s32.totalorder %v11880_v35, 0  ;;  %vm7410_vm13 = vcmp.eq.s32.totalorder %v11880_v35, 2  ;;  %v7583_v10 = vld [vmem:[#allocation2 + $0x68] sm:$0xf] }
 0x3c6   : > { %v8250_v5 = vadd.s32 4294967294, %v2315_v61  ;;  %v3969_v36 = vadd.s32 1, %v11895_v23  ;;  %v7908_v9 = vsel %vm7504_vm0, %v7858_v31, 0.0  ;;  %v2303_v58 = vadd.s32 %v11830_v51, %v11827_v6  ;;  %v7582_v31 = vld [vmem:[#allocation2 + $0x64] sm:$0xf] }
 0x3c7   : > { %v3966_v38 = vmul.u32 %v11882_v60, %v3950_v17  ;;  %v7909_v34 = vsel %vm7504_vm0, %v7859_v29, 0.0  ;;  %vm3968_vm10 = vc.u32 %v11903_v55, %v11894_v27  ;;  %v7861_v53 = vmul.f32 %v11408_v4, %v7560_v40  ;;  %v7563_v40 = vld [vmem:[#allocation2 + $0x18] sm:$0xf] }
 0x3c8   : > { %vm8251_vm14 = vcmp.lt.s32.totalorder %v8250_v5, 0  ;;  %v7911_v57 = vsel %vm7504_vm0, %v7860_v13, 0.0  ;;  %v3970_v60 = vsel %vm3968_vm10, %v3969_v36, %v11895_v23  ;;  %v7910_v45 = vadd.f32 %v7909_v34, %v7908_v9  ;;  %v7562_v13 = vld [vmem:[#allocation2 + $0x14] sm:$0xf] }
 0x3c9   : > { %v8809_v56 = vpop.eup %8808  ;;  %v2318_v11 = vsel %vm8251_vm14, 0, %v8250_v5  ;;  %v3971_v54 = vadd.s32 %v3970_v60, %v3966_v38  ;;  %v7862_v50 = vmul.f32 %v11847_v32, %v7561_v7  ;;  %v7883_v9 = vmul.f32 %v11794_v12, %v7582_v31  ;;  %v11943_v38 = vpop.permute.xlu1 %7815  ;;  %v7584_v12 = vld [vmem:[#allocation2 + $0x6c] sm:$0xf] }
 0x3ca   : > { %v8811_v41 = vpop.eup %8810  ;;  %v7411_v62 = vxor.u32 2147483648, %v8809_v56  ;;  %v2319_v21 = vsub.s32 32, %v2318_v11  ;;  %v2323_v26 = vsub.s32 4294967266, %v2318_v11  ;;  %v2320_v51 = vshll.u32 %v11884_v42, %v2318_v11 }
 0x3cb   : > { %v7408_v44 = vxor.u32 2147483648, %v8811_v41  ;;  %v7912_v61 = vadd.f32 %v7911_v57, %v7910_v45  ;;  %v7913_v42 = vsel %vm7504_vm0, %v7861_v53, 0.0  ;;  %v3972_v5 = vadd.s32 536870912, %v3971_v54  ;;  %v7564_v57 = vld [vmem:[#allocation2 + $0x1c] sm:$0xf] }
 0x3cc   : > { %v7412_v6 = vsel %vm7410_vm13, %v7411_v62, %v8811_v41  ;;  %v2321_v14 = vshrl.u32 %v2303_v58, %v2319_v21  ;;  %v2324_v30 = vadd.s32 127, %v2323_v26  ;;  %v7915_v58 = vsel %vm7504_vm0, %v7862_v50, 0.0 }
 0x3cd   : > { %v7409_v49 = vsel %vm7407_vm12, %v8809_v56, %v7408_v44  ;;  %v7914_v29 = vadd.f32 %v7913_v42, %v7912_v61  ;;  %v11937_v36 = vshrl.u32 %v3972_v5, 30  ;;  %v7884_v56 = vmul.f32 %v11381_v39, %v7583_v10  ;;  %v11959_v10 = vpop.permute.xlu1 %7823 }
 0x3ce   : > { %v7413_v24 = vsel %vm7406_vm8, %v7409_v49, %v7412_v6  ;;  %v2322_v17 = vor.u32 %v2321_v14, %v2320_v51  ;;  %v2325_v18 = vshll.u32 %v2324_v30, 23  ;;  %v7863_v19 = vmul.f32 %v11434_v15, %v7562_v13  ;;  %v7565_v14 = vld [vmem:[#allocation2 + $0x20] sm:$0xf]  ;;  %v7566_v13 = vld [vmem:[#allocation2 + $0x24] sm:$0xf] }
 0x3cf   : > { %v7414_v23 = vsel %vm7404_vm9, nan, %v7413_v24  ;;  %v3974_v62 = vshll.u32 %v11937_v36, 30  ;;  %v7864_v11 = vmul.f32 %v11867_v22, %v7563_v40  ;;  %v2333_v53 = vsub.s32 4, %v11869_v20 }
 0x3d0   : > { %7536 = vst.msk [vmem:[#allocation2 + $0xa0] sm:$0xf] %vm7504_vm0, %v7414_v23  ;;  %v2326_v35 = vor.u32 4788187, %v2325_v18  ;;  %v2329_v41 = vcvt.s32.f32 %v2322_v17  ;;  %v7916_v44 = vadd.f32 %v7915_v58, %v7914_v29  ;;  %v7917_v39 = vsel %vm7504_vm0, %v7863_v19, 0.0 }
 0x3d1   : > { %v11948_v26 = vsub.s32 %v3971_v54, %v3974_v62  ;;  %vm2249_vm11 = vcmp.lt.s32.totalorder %v11716_v33, 0  ;;  %v7958_v7 = vsel %vm7504_vm0, %v7884_v56, 0.0  ;;  %v7957_v45 = vsel %vm7504_vm0, %v7883_v9, 0.0  ;;  %v7585_v17 = vld [vmem:[#allocation2 + $0x70] sm:$0xf]  ;;  %v11979_v62 = vpop.permute.xlu1 %7827 }
 0x3d2   : > { %v2327_v34 = vand.u32 2147483647, %v2326_v35  ;;  %v7918_v6 = vadd.f32 %v7917_v39, %v7916_v44  ;;  %v7919_v49 = vsel %vm7504_vm0, %v7864_v11, 0.0  ;;  %v2334_v30 = vsel %vm2249_vm11, %v2333_v53, %v11869_v20  ;;  %v7586_v56 = vld [vmem:[#allocation2 + $0x74] sm:$0xf] }
 0x3d3   : > { %v3977_v60 = vsub.s32 0, %v11948_v26  ;;  %v7885_v54 = vmul.f32 %v11817_v47, %v7584_v12  ;;  %v7865_v24 = vmul.f32 %v11467_v28, %v7564_v57  ;;  %vm11963_vm2 = vcmp.le.f32.partialorder %v2247_v59, 0.7853982  ;;  %v7567_v11 = vld [vmem:[#allocation2 + $0x28] sm:$0xf] }
 0x3d4   : > { %v2330_v21 = vmul.f32 %v2329_v41, %v2327_v34  ;;  %v7920_v31 = vadd.f32 %v7919_v49, %v7918_v6  ;;  %v7959_v23 = vadd.f32 %v7958_v7, %v7957_v45  ;;  %v7866_v20 = vmul.f32 %v11887_v43, %v7565_v14  ;;  %v7587_v6 = vld [vmem:[#allocation2 + $0x78] sm:$0xf] }
 0x3d5   : > { %v8313_v42 = vmin.u32 %v3977_v60, %v11948_v26  ;;  %v2336_v18 = vsel %vm11963_vm2, 0, %v2334_v30  ;;  %v7921_v59 = vsel %vm7504_vm0, %v7865_v24, 0.0  ;;  %v7960_v29 = vsel %vm7504_vm0, %v7885_v54, 0.0 }
 0x3d6   : > { %v2331_v51 = vxor.u32 2147483648, %v2330_v21  ;;  %v7886_v40 = vmul.f32 %v11408_v4, %v7585_v17  ;;  %v7922_v35 = vadd.f32 %v7921_v59, %v7920_v31  ;;  %v7961_v58 = vadd.f32 %v7960_v29, %v7959_v23  ;;  %v7569_v59 = vld [vmem:[#allocation2 + $0x30] sm:$0xf] }
 0x3d7   : > { %v3979_v5 = vclz %v8313_v42  ;;  %v2340_v19 = vadd.s32 3, %v2336_v18  ;;  %v7923_v34 = vsel %vm7504_vm0, %v7866_v20, 0.0  ;;  %v7867_v41 = vmul.f32 %v11490_v37, %v7566_v13  ;;  %v7588_v42 = vld [vmem:[#allocation2 + $0x7c] sm:$0xf] }
 0x3d8   : > { %v2332_v61 = vsel %vm2249_vm11, %v2331_v51, %v2330_v21  ;;  %v7924_v53 = vadd.f32 %v7923_v34, %v7922_v35  ;;  %v7887_v21 = vmul.f32 %v11847_v32, %v7586_v56  ;;  %v7962_v12 = vsel %vm7504_vm0, %v7886_v40, 0.0  ;;  %v7568_v32 = vld [vmem:[#allocation2 + $0x2c] sm:$0xf] }
 0x3d9   : > { %v2335_v47 = vsel %vm11963_vm2, %v11716_v33, %v2332_v61  ;;  %v8314_v9 = vadd.s32 4294967294, %v3979_v5  ;;  %v3967_v4 = vadd.s32 %v11894_v27, %v11903_v55  ;;  %v7963_v7 = vadd.f32 %v7962_v12, %v7961_v58  ;;  %v11990_v27 = vpop.permute.xlu1 %7831 }
 0x3da   : > { %8812 = vcosq.f32 %v2335_v47  ;;  %v2341_v51 = vand.u32 3, %v2340_v19  ;;  %v7868_v60 = vmul.f32 %v11905_v52, %v7567_v11  ;;  %v7925_v45 = vsel %vm7504_vm0, %v7867_v41, 0.0  ;;  %v7589_v19 = vld [vmem:[#allocation2 + $0x80] sm:$0xf] }
 0x3db   : > { %8814 = vsinq.f32 %v2335_v47  ;;  %vm8315_vm15 = vcmp.lt.s32.totalorder %v8314_v9, 0  ;;  %v7926_v54 = vadd.f32 %v7925_v45, %v7924_v53  ;;  %v7964_v24 = vsel %vm7504_vm0, %v7887_v21, 0.0 }
 0x3dc   : > { %v3982_v44 = vsel %vm8315_vm15, 0, %v8314_v9  ;;  %v7888_v31 = vmul.f32 %v11434_v15, %v7587_v6  ;;  %v7965_v23 = vadd.f32 %v7964_v24, %v7963_v7  ;;  %vm2342_vm1 = vcmp.lt.s32.totalorder %v2341_v51, 2  ;;  %v7590_v7 = vld [vmem:[#allocation2 + $0x84] sm:$0xf] }
 0x3dd   : > { %v3983_v39 = vsub.s32 32, %v3982_v44  ;;  %v3987_v57 = vsub.s32 4294967266, %v3982_v44  ;;  %v3984_v49 = vshll.u32 %v11948_v26, %v3982_v44  ;;  %v7927_v26 = vsel %vm7504_vm0, %v7868_v60, 0.0  ;;  %v12000_v53 = vpop.permute.xlu1 %7835 }
 0x3de   : > { %v7869_v20 = vmul.f32 %v11511_v16, %v7568_v32  ;;  %vm2346_vm3 = vcmp.eq.s32.totalorder %v2341_v51, 2  ;;  %v7928_v13 = vadd.f32 %v7927_v26, %v7926_v54  ;;  %vm2343_vm4 = vcmp.eq.s32.totalorder %v2341_v51, 0 }
 0x3df   : > { %v3985_v14 = vshrl.u32 %v3967_v4, %v3983_v39  ;;  %v3988_v30 = vadd.s32 127, %v3987_v57  ;;  %v7889_v29 = vmul.f32 %v11867_v22, %v7588_v42  ;;  %v7966_v40 = vsel %vm7504_vm0, %v7888_v31, 0.0  ;;  %v7570_v4 = vld [vmem:[#allocation2 + $0x34] sm:$0xf] }
 0x3e0   : > { %v7967_v58 = vadd.f32 %v7966_v40, %v7965_v23  ;;  %vm2339_vm5 = vweird.f32 %v11716_v33  ;;  %v7870_v41 = vmul.f32 %v11926_v48, %v7569_v59  ;;  %v7929_v11 = vsel %vm7504_vm0, %v7869_v20, 0.0  ;;  %v7573_v23 = vld [vmem:[#allocation2 + $0x40] sm:$0xf]  ;;  %v7574_v59 = vld [vmem:[#allocation2 + $0x44] sm:$0xf] }
 0x3e1   : > { %v3986_v50 = vor.u32 %v3985_v14, %v3984_v49  ;;  %v3989_v61 = vshll.u32 %v3988_v30, 23  ;;  %v3997_v22 = vsub.s32 4, %v11937_v36  ;;  %v7930_v12 = vadd.f32 %v7929_v11, %v7928_v13  ;;  %v12021_v24 = vpop.permute.xlu1 %7839 }
 0x3e2   : > { %v7968_v39 = vsel %vm7504_vm0, %v7889_v29, 0.0  ;;  %v7890_v33 = vmul.f32 %v11467_v28, %v7589_v19  ;;  %vm3913_vm6 = vcmp.lt.s32.totalorder %v11731_v63, 0  ;;  %v7931_v51 = vsel %vm7504_vm0, %v7870_v41, 0.0  ;;  %v7593_v41 = vld [vmem:[#allocation2 + $0x90] sm:$0xf] }
 0x3e3   : > { %v3990_v5 = vor.u32 4788187, %v3989_v61  ;;  %v3993_v56 = vcvt.s32.f32 %v3986_v50  ;;  %v7969_v6 = vadd.f32 %v7968_v39, %v7967_v58  ;;  %v7871_v60 = vmul.f32 %v11525_v46, %v7570_v4  ;;  %v7577_v39 = vld [vmem:[#allocation2 + $0x50] sm:$0xf] }
 0x3e4   : > { %v8813_v55 = vpop.eup %8812  ;;  %vm12011_vm7 = vcmp.le.f32.partialorder %v3911_v8, 0.7853982  ;;  %v3998_v14 = vsel %vm3913_vm6, %v3997_v22, %v11937_v36  ;;  %v7932_v30 = vadd.f32 %v7931_v51, %v7930_v12  ;;  %v7891_v54 = vmul.f32 %v11887_v43, %v7590_v7  ;;  %v7591_v8 = vld [vmem:[#allocation2 + $0x88] sm:$0xf]  ;;  %v7592_v43 = vld [vmem:[#allocation2 + $0x8c] sm:$0xf] }
 0x3e5   : > { %v8815_v17 = vpop.eup %8814  ;;  %v2347_v47 = vxor.u32 2147483648, %v8813_v55  ;;  %v3991_v9 = vand.u32 2147483647, %v3990_v5  ;;  %v7970_v32 = vsel %vm7504_vm0, %v7890_v33, 0.0  ;;  %v4000_v50 = vsel %vm12011_vm7, 0, %v3998_v14  ;;  %v12032_v29 = vpop.permute.xlu1 %7843 }
 0x3e6   : > { %v2344_v18 = vxor.u32 2147483648, %v8815_v17  ;;  %v7971_v31 = vadd.f32 %v7970_v32, %v7969_v6  ;;  %v7933_v36 = vsel %vm7504_vm0, %v7871_v60, 0.0  ;;  %v7893_v40 = vmul.f32 %v11905_v52, %v7592_v43  ;;  %v7594_v7 = vld [vmem:[#allocation2 + $0x94] sm:$0xf] }
 0x3e7   : > { %v2348_v15 = vsel %vm2346_vm3, %v2347_v47, %v8815_v17  ;;  %v3994_v21 = vmul.f32 %v3993_v56, %v3991_v9  ;;  %v7934_v42 = vadd.f32 %v7933_v36, %v7932_v30  ;;  %v7972_v17 = vsel %vm7504_vm0, %v7891_v54, 0.0  ;;  %v7575_v9 = vld [vmem:[#allocation2 + $0x48] sm:$0xf]  ;;  %v7578_v30 = vld [vmem:[#allocation2 + $0x54] sm:$0xf] }
 0x3e8   : > { %v2345_v35 = vsel %vm2343_vm4, %v8813_v55, %v2344_v18  ;;  %v7572_v55 = vld [vmem:[#allocation2 + $0x3c] sm:$0xf]  ;;  %v7892_v47 = vmul.f32 %v11490_v37, %v7591_v8  ;;  %v4004_v18 = vadd.s32 3, %v4000_v50  ;;  %v7973_v5 = vadd.f32 %v7972_v17, %v7971_v31 }
 0x3e9   : > { %v2349_v34 = vsel %vm2342_vm1, %v2345_v35, %v2348_v15  ;;  %v3995_v57 = vxor.u32 2147483648, %v3994_v21  ;;  %v7873_v20 = vmul.f32 %v11560_v25, %v7572_v55  ;;  %v7874_v15 = vmul.f32 %v11959_v10, %v7573_v23  ;;  %v12043_v51 = vpop.permute.xlu1 %7847  ;;  %v7579_v55 = vld [vmem:[#allocation2 + $0x58] sm:$0xf] }
 0x3ea   : > { %v2350_v44 = vsel %vm2339_vm5, nan, %v2349_v34  ;;  %v7974_v56 = vsel %vm7504_vm0, %v7892_v47, 0.0  ;;  %v7875_v58 = vmul.f32 %v11979_v62, %v7574_v59  ;;  %v4005_v19 = vand.u32 3, %v4004_v18  ;;  %v7595_v47 = vld [vmem:[#allocation2 + $0x98] sm:$0xf] }
 0x3eb   : > { %7519 = vst.msk [vmem:[#allocation2 + $0x38] sm:$0xf] %vm7504_vm0, %v2350_v44  ;;  %v3996_v49 = vsel %vm3913_vm6, %v3995_v57, %v3994_v21  ;;  %v7937_v37 = vsel %vm7504_vm0, %v7873_v20, 0.0  ;;  %v7975_v34 = vadd.f32 %v7974_v56, %v7973_v5  ;;  %v7576_v44 = vld [vmem:[#allocation2 + $0x4c] sm:$0xf]  ;;  %v7939_v21 = vsel %vm7504_vm0, %v7874_v15, 0.0 }
 0x3ec   : > { %v3999_v28 = vsel %vm12011_vm7, %v11731_v63, %v3996_v49  ;;  %v7876_v22 = vmul.f32 %v11990_v27, %v7575_v9  ;;  %vm4003_vm9 = vweird.f32 %v11731_v63  ;;  %v7976_v52 = vsel %vm7504_vm0, %v7893_v40, 0.0  ;;  %v7581_v59 = vld [vmem:[#allocation2 + $0x60] sm:$0xf] }
 0x3ed   : > { %8816 = vcosq.f32 %v3999_v28  ;;  %v7894_v6 = vmul.f32 %v11511_v16, %v7593_v41  ;;  %v7877_v60 = vmul.f32 %v12000_v53, %v7576_v44  ;;  %v7941_v45 = vsel %vm7504_vm0, %v7875_v58, 0.0  ;;  %v7852_v18 = vpop.permute.xlu1 %7851 }
 0x3ee   : > { %8818 = vsinq.f32 %v3999_v28  ;;  %vm4010_vm8 = vcmp.eq.s32.totalorder %v4005_v19, 2  ;;  %v7977_v14 = vadd.f32 %v7976_v52, %v7975_v34  ;;  %vm4007_vm12 = vcmp.eq.s32.totalorder %v4005_v19, 0  ;;  %v7597_v34 = vld [vmem:[#allocation2 + $0xa0] sm:$0xf]  ;;  %v7598_v52 = vld [vmem:[#allocation2 + $0xa4] sm:$0xf] }
 0x3ef   : > { %v7878_v32 = vmul.f32 %v12021_v24, %v7577_v39  ;;  %v7943_v31 = vsel %vm7504_vm0, %v7876_v22, 0.0  ;;  %vm4006_vm13 = vcmp.lt.s32.totalorder %v4005_v19, 2  ;;  %v7895_v16 = vmul.f32 %v11926_v48, %v7594_v7 }
 0x3f0   : > { %v7945_v23 = vsel %vm7504_vm0, %v7877_v60, 0.0  ;;  %v7880_v48 = vmul.f32 %v12043_v51, %v7579_v55  ;;  %v8007_v41 = vmul.f32 %v9013_v2, %v9003_v0  ;;  %v7602_v55 = vld [vmem:[#allocation2 + $0xb4] sm:$0xf] }
 0x3f1   : > { %v7947_v5 = vsel %vm7504_vm0, %v7878_v32, 0.0  ;;  %v7980_v40 = vsel %vm7504_vm0, %v7895_v16, 0.0 }
 0x3f2   : > { %v7571_v61 = vld [vmem:[#allocation2 + $0x38] sm:$0xf]  ;;  %v7951_v58 = vsel %vm7504_vm0, %v7880_v48, 0.0  ;;  %v7606_v48 = vld [vmem:[#allocation2 + $0xc4] sm:$0xf] }
 0x3f3   : > { %v7872_v26 = vmul.f32 %v11943_v38, %v7571_v61  ;;  %v7978_v61 = vsel %vm7504_vm0, %v7894_v6, 0.0  ;;  %v7599_v6 = vld [vmem:[#allocation2 + $0xa8] sm:$0xf] }
 0x3f4   : > { %v7979_v43 = vadd.f32 %v7978_v61, %v7977_v14  ;;  %v7900_v32 = vmul.f32 %v11979_v62, %v7599_v6 }
 0x3f5   : > { %v7935_v13 = vsel %vm7504_vm0, %v7872_v26, 0.0  ;;  %v7580_v26 = vld [vmem:[#allocation2 + $0x5c] sm:$0xf] }
 0x3f6   : > { %v7936_v35 = vadd.f32 %v7935_v13, %v7934_v42  ;;  %v7879_v42 = vmul.f32 %v12032_v29, %v7578_v30  ;;  %v7856_v13 = vpop.permute.xlu0 %7855  ;;  %v7881_v63 = vmul.f32 %v7852_v18, %v7580_v26  ;;  %v7981_v56 = vadd.f32 %v7980_v40, %v7979_v43  ;;  %v7600_v30 = vld [vmem:[#allocation2 + $0xac] sm:$0xf]  ;;  %v7605_v26 = vld [vmem:[#allocation2 + $0xc0] sm:$0xf] }
 0x3f7   : > { %v8817_v12 = vpop.eup %8816  ;;  %v7882_v19 = vmul.f32 %v7856_v13, %v7581_v59  ;;  %v7906_v59 = vmul.f32 %v7852_v18, %v7605_v26 }
 0x3f8   : > { %v7938_v11 = vadd.f32 %v7937_v37, %v7936_v35  ;;  %v8819_v33 = vpop.eup %8818  ;;  %v4011_v57 = vxor.u32 2147483648, %v8817_v12  ;;  %v7896_v35 = vmul.f32 %v11525_v46, %v7595_v47  ;;  %v7949_v9 = vsel %vm7504_vm0, %v7879_v42, 0.0 }
 0x3f9   : > { %v4008_v49 = vxor.u32 2147483648, %v8819_v33  ;;  %v7953_v22 = vsel %vm7504_vm0, %v7881_v63, 0.0  ;;  %v7903_v42 = vmul.f32 %v12021_v24, %v7602_v55 }
 0x3fa   : > { %v7940_v4 = vadd.f32 %v7939_v21, %v7938_v11  ;;  %v4012_v54 = vsel %vm4010_vm8, %v4011_v57, %v8819_v33  ;;  %v7982_v44 = vsel %vm7504_vm0, %v7896_v35, 0.0  ;;  %v8016_v21 = vpop.permute.xlu1 %8015  ;;  %v7898_v33 = vmul.f32 %v11560_v25, %v7597_v34 }
 0x3fb   : > { %v4009_v8 = vsel %vm4007_vm12, %v8817_v12, %v4008_v49  ;;  %v7983_v46 = vadd.f32 %v7982_v44, %v7981_v56  ;;  %v7955_v57 = vsel %vm7504_vm0, %v7882_v19, 0.0  ;;  %v8018_v7 = vmul.f32 %v8016_v21, %v8007_v41 }
 0x3fc   : > { %v7942_v28 = vadd.f32 %v7941_v45, %v7940_v4  ;;  %v4013_v36 = vsel %vm4006_vm13, %v4009_v8, %v4012_v54  ;;  %v7899_v49 = vmul.f32 %v11959_v10, %v7598_v52  ;;  %v7986_v54 = vsel %vm7504_vm0, %v7898_v33, 0.0 }
 0x3fd   : > { %v4014_v17 = vsel %vm4003_vm9, nan, %v4013_v36  ;;  %v7901_v8 = vmul.f32 %v11990_v27, %v7600_v30  ;;  %v7990_v10 = vsel %vm7504_vm0, %v7900_v32, 0.0  ;;  %v7603_v36 = vld [vmem:[#allocation2 + $0xb8] sm:$0xf]  ;;  %v7907_v35 = vmul.f32 %v7856_v13, %v7606_v48 }
 0x3fe   : > { %v7944_v50 = vadd.f32 %v7943_v31, %v7942_v28  ;;  %7535 = vst.msk [vmem:[#allocation2 + $0x9c] sm:$0xf] %vm7504_vm0, %v4014_v17  ;;  %v7988_v25 = vsel %vm7504_vm0, %v7899_v49, 0.0  ;;  %v7904_v43 = vmul.f32 %v12032_v29, %v7603_v36  ;;  %v8008_v29 = vmul.f32 %v9018_v3, %v9008_v1 }
 0x3ff   : > { %v7992_v62 = vsel %vm7504_vm0, %v7901_v8, 0.0 }
 0x400   : > { %v7946_v20 = vadd.f32 %v7945_v23, %v7944_v50  ;;  %v7604_v23 = vld [vmem:[#allocation2 + $0xbc] sm:$0xf] }
 0x402   : > { %v7948_v15 = vadd.f32 %v7947_v5, %v7946_v20  ;;  %v7905_v20 = vmul.f32 %v12043_v51, %v7604_v23  ;;  %v8004_v51 = vsel %vm7504_vm0, %v7907_v35, 0.0 }
 0x404   : > { %v7950_v37 = vadd.f32 %v7949_v9, %v7948_v15  ;;  %v7998_v15 = vsel %vm7504_vm0, %v7904_v43, 0.0  ;;  %v8000_v40 = vsel %vm7504_vm0, %v7905_v20, 0.0  ;;  %v8002_v9 = vsel %vm7504_vm0, %v7906_v59, 0.0 }
 0x405   : > { %v7596_v12 = vld [vmem:[#allocation2 + $0x9c] sm:$0xf] }
 0x406   : > { %v7952_v11 = vadd.f32 %v7951_v58, %v7950_v37  ;;  %v7897_v39 = vmul.f32 %v11943_v38, %v7596_v12  ;;  %v7601_v38 = vld [vmem:[#allocation2 + $0xb0] sm:$0xf]  ;;  %v8019_v37 = vmul.f32 %v8016_v21, %v8008_v29 }
 0x407   : > { %v7902_v50 = vmul.f32 %v12000_v53, %v7601_v38  ;;  %v7996_v53 = vsel %vm7504_vm0, %v7903_v42, 0.0 }
 0x408   : > { %v7954_v4 = vadd.f32 %v7953_v22, %v7952_v11  ;;  %v7984_v45 = vsel %vm7504_vm0, %v7897_v39, 0.0 }
 0x409   : > { %v7985_v14 = vadd.f32 %v7984_v45, %v7983_v46  ;;  %v7994_v47 = vsel %vm7504_vm0, %v7902_v50, 0.0 }
 0x40a   : > { %v7956_v60 = vadd.f32 %v7955_v57, %v7954_v4 }
 0x40b   : > { %v7987_v31 = vadd.f32 %v7986_v54, %v7985_v14 }
 0x40c   : > { %v8020_v28 = vadd.f32 %v8018_v7, %v7956_v60 }
 0x40d   : > { %v7989_v16 = vadd.f32 %v7988_v25, %v7987_v31 }
 0x40e   : > { %8022 = vst.msk [vmem:[#allocation3] sm:$0xf] %vm7504_vm0, %v8020_v28 }
 0x40f   : > { %v7991_v61 = vadd.f32 %v7990_v10, %v7989_v16 }
 0x411   : > { %v7993_v17 = vadd.f32 %v7992_v62, %v7991_v61 }
 0x413   : > { %v7995_v27 = vadd.f32 %v7994_v47, %v7993_v17 }
 0x415   : > { %v7997_v5 = vadd.f32 %v7996_v53, %v7995_v27 }
 0x417   : > { %v7999_v24 = vadd.f32 %v7998_v15, %v7997_v5 }
 0x419   : > { %v8001_v63 = vadd.f32 %v8000_v40, %v7999_v24 }
 0x41b   : > { %v8003_v56 = vadd.f32 %v8002_v9, %v8001_v63 }
 0x41d   : > { %v8005_v58 = vadd.f32 %v8004_v51, %v8003_v56 }
 0x41f   : > { %v8021_v19 = vadd.f32 %v8019_v37, %v8005_v58 }
 0x421   : > { %8023 = vst.msk [vmem:[#allocation3 + $0x4] sm:$0xf] %vm7504_vm0, %v8021_v19 }
 0x422 PF: > { %v8500_v18 = vld [vmem:[%s12145_s5 + $0x1] ss:$0 sm:$0xff]  ;;  %v8896_v13 = vmov 0   ;;  %v8060_v41 = vld [vmem:[%s12148_s8 + $0x4] sm:$0xf]  ;;  %vm8067_vm0 = vcmask 125952  }
 0x423   : > { %8820 = vset.pattern.permute.xlu0 %v8896_v13  ;;  %v8059_v34 = vld [vmem:[%s12148_s8] sm:$0xf]  ;;  %v8062_v44 = vsub.f32 %v8060_v41, %v9018_v3  ;;  %s8026_s12 = sld [smem:[#allocation4 + %s8959_s14]]  ;;  %v8029_v52 = vld [vmem:[%s9024_s21 + $0x4] sm:$0xf]  ;;  %v8038_v49 = vsub.f32 1.0, %v9013_v2 }
 0x424   : > { %8052 = vperm.xlu0 %8820, %v8500_v18   ;;  %v8061_v11 = vsub.f32 %v8059_v34, %v9013_v2  ;;  %s8027_s15 = sld [smem:[#allocation7 + %s8959_s14]]  ;;  %v8028_v46 = vld [vmem:[%s9024_s21] sm:$0xf]  ;;  %v8039_v14 = vsub.f32 1.0, %v9018_v3  ;;  %v8042_v32 = vld [vmem:[#allocation3] sm:$0xf] }
 0x425   : > { %v8069_v22 = vsel %vm8067_vm0, %v8062_v44, 0.0  ;;  %s8100_s16 = sld [smem:[#allocation9]]  ;;  %p8666_p13 = scmp.eq.s32.totalorder %s8959_s14, 3 }
 0x426   : > { %v8068_v21 = vsel %vm8067_vm0, %v8061_v11, 0.0  ;;  %s8853_s25 = scalar_lea.hbm %s12150_s10, 16 }
 0x427   : > { %v8070_v12 = vadd.f32 %v8069_v22, %v8068_v21  ;;  %p8854_p0 = scmp.ne.s32.totalorder %s12150_s10, %s8853_s25  ;;  %p8859_p7 = scmp.lt.u32.totalorder %s8853_s25, %s12150_s10 }
 0x428   : > { %v8043_v31 = vld [vmem:[#allocation3 + $0x4] sm:$0xf] }
 0x429   : > { %v8030_v4 = vstv %s8026_s12  ;;  %p8855_p1 = pnand %p8854_p0, %p8666_p13 }
 0x42a   : > { %v8033_v39 = vstv %s8027_s15  ;;  %v8031_v33 = vmul.f32 %v8030_v4, %v9003_v0  ;;  %v8032_v57 = vmul.f32 %v8030_v4, %v9008_v1 }
 0x42b   : > { %v8034_v7 = vmul.f32 %v8033_v39, %v8028_v46  ;;  %v8035_v6 = vmul.f32 %v8033_v39, %v8029_v52  ;;  %p8856_p5 = pneg %p8855_p1 }
 0x42d   : > { %v8036_v60 = vadd.f32 %v8034_v7, %v8031_v33  ;;  %v8037_v45 = vadd.f32 %v8035_v6, %v8032_v57  ;;  %p8861_p9 = pnand %p8859_p7, %p8856_p5 }
 0x42f   : > { %v8040_v30 = vmul.f32 %v8038_v49, %v8036_v60  ;;  %v8041_v28 = vmul.f32 %v8039_v14, %v8037_v45 }
 0x443   : > { %8071 = vadd.xlane.f32.xlu0 %v8070_v12 }
 0x4a3   : > { %v8053_v54 = vpop.permute.xlu0 %8052 }
 0x4a4   : > { %v8055_v38 = vmul.f32 %v8053_v54, %v8040_v30  ;;  %v8056_v25 = vmul.f32 %v8053_v54, %v8041_v28 }
 0x4a6   : > { %v8057_v8 = vadd.f32 %v8055_v38, %v8042_v32  ;;  %v8058_v16 = vadd.f32 %v8056_v25, %v8043_v31 }
 0x4a8   : > { %v8063_v0 = vsub.f32 %v8028_v46, %v8057_v8  ;;  %v8064_v55 = vsub.f32 %v8029_v52, %v8058_v16 }
 0x4aa   : > { %v8065_v1 = vmul.f32 %v8063_v0, %v8061_v11  ;;  %v8066_v50 = vmul.f32 %v8064_v55, %v8062_v44 }
 0x4ac   : > { %v8080_v10 = vmul.f32 %v8065_v1, %v8065_v1  ;;  %v8081_v36 = vmul.f32 %v8066_v50, %v8066_v50 }
 0x4ae   : > { %v8082_v61 = vsel %vm8067_vm0, %v8080_v10, 0.0  ;;  %v8083_v2 = vsel %vm8067_vm0, %v8081_v36, 0.0 }
 0x4af   : > { %v8084_v3 = vadd.f32 %v8083_v2, %v8082_v61 }
 0x4b1   : > { %8085 = vadd.xlane.f32.xlu1 %v8084_v3 }
 0x4d0   : > { %v8072_v42 = vpop.xlane.xlu0 %8071 }
 0x4d1   : > { %v8073_v62 = vrot.slane %v8072_v42, 4 }
 0x4d3   : > { %v8074_v23 = vadd.f32 %v8073_v62, %v8072_v42 }
 0x4d5   : > { %v8075_v17 = vrot.slane %v8074_v23, 2 }
 0x4d7   : > { %v8076_v43 = vadd.f32 %v8075_v17, %v8074_v23 }
 0x4d9   : > { %v8077_v47 = vrot.slane %v8076_v43, 1 }
 0x4db   : > { %v8078_v26 = vadd.f32 %v8077_v47, %v8076_v43 }
 0x4dd   : > { %8635 = vpush %v8078_v26 }
 0x50e   : > { %s8636_s21 = spop %8635 }
 0x50f   : > { %p8094_p6 = scmp.gt.f32.partialorder %s8636_s21, 0.0 }
 0x511   : > { %s12226_s21 = smov (!%p8094_p6, %s8636_s21), 1.0 }
 0x512   : > { %v8096_v27 = vstv %s12226_s21 }
 0x513   : > { %8821 = vrcp.f32 %v8096_v27 }
 0x51d   : > { %v8822_v40 = vpop.eup %8821 }
 0x53e   : > { %v8086_v20 = vpop.xlane.xlu1 %8085 }
 0x53f   : > { %v8087_v53 = vrot.slane %v8086_v20, 4 }
 0x541   : > { %v8088_v48 = vadd.f32 %v8087_v53, %v8086_v20 }
 0x543   : > { %v8089_v5 = vrot.slane %v8088_v48, 2 }
 0x545   : > { %v8090_v59 = vadd.f32 %v8089_v5, %v8088_v48 }
 0x547   : > { %v8091_v15 = vrot.slane %v8090_v59, 1 }
 0x549   : > { %v8092_v24 = vadd.f32 %v8091_v15, %v8090_v59 }
 0x54b   : > { %8637 = vpush %v8092_v24 }
 0x54c   : > { %8639 = vpush %v8822_v40 }
 0x57c   : > { %s8638_s17 = spop %8637 }
 0x57d   : > { %s8640_s18 = spop %8639 }
 0x57e   : > { %s8099_s19 = smul.f32 %s8640_s18, %s8638_s17 }
 0x580   : > { %s8101_s20 = sadd.f32 %s8100_s16, %s8099_s19 }
 0x582   : > { %8103 = sst [smem:[#allocation9]] %s8101_s20  ;;  %s8111_s22 = smul.f32 0.25, %s8101_s20 }
 0x584   : > { %8650 = sst [smem:[#allocation9]] (%p8666_p13), %s8111_s22 }
 0x585   : > { %8864 = shalt.err (!%p8861_p9)
}
 0x586   : > { %s8897_s30 = smov [#allocation9]  }
 0x587   : > { %8652 = dma.smem_to_hbm (%p8666_p13), %s8897_s30, 16, %s12150_s10, [#allocation5]  }
 0x588   : > { %8878 = dma.done.wait (%p8666_p13), [#allocation5], 16  }
 0x589   : > { %8880 = vsyncadd (%p8666_p13), [#allocation5], 4294967280 }
 0x58a   : > { %8126 = sfence }
 0x58b PF: > { %s23_s13 = sadd.s32 1, %s8883_s13  }
 0x58c   : > { %p20_p10 = scmp.ge.s32.totalorder %s23_s13, 6  }
 0x58e   :  { %22 = sbr.rel (!%p20_p10) target bundleno = 3 (0x3), region = 110 }
 0x595   :  { %8132 = vsyncpa [#allocation5], 1 }
 0x596   :  { %8134 = vsyncpa [#allocation5 + $0x1], 1 }
 0x597   :  { %8135 = vsyncpa [#allocation6], 1 }
 0x598   :  { %8137 = vsyncpa [#allocation6 + $0x1], 1 }
 0x599   :  { %8138 = vsyncpa [#allocation8], 1 }

</bundles_post_ra>
